<compile_context>
chip_gen: v5e
topology: v5e:2x2
jax: 0.10.0
libtpu: 0.0.40
codegen_flags: <defaults>
</compile_context>

<pallas_src>
import jax
import jax.numpy as jnp
from jax.experimental import pallas as pl
from jax.experimental.pallas import tpu as pltpu


# ------------------------------ Pallas kernel ------------------------------ #

def _stem_kernel(x_ref,
                 w1_ref, s1_ref, b1_ref,
                 wl1_ref, sl1_ref, bl1_ref,
                 wl2_ref, sl2_ref, bl2_ref,
                 wf_ref, sf_ref, bf_ref,
                 t16_ref, td_ref, t8_ref,
                 o_ref):
    """Fused StemBlock forward for one image; activations live as (C, H*W)."""
    f32 = jnp.float32

    def gather(img, tap_ref, t):
        # img: (C, P_in); tap_ref[t]: (P_in, P_out) 0/1 shift(+downsample) matrix.
        return jnp.dot(img, tap_ref[t], preferred_element_type=f32)

    def patches(img, tap_ref):
        # im2col patch matrix, rows ordered tap-major then channel -> (9*C, P_out)
        return jnp.concatenate([gather(img, tap_ref, t) for t in range(9)], axis=0)

    def conv_bn_relu(p, w_ref, s_ref, b_ref):
        y = jnp.dot(w_ref[...], p, preferred_element_type=f32)      # (Cout, P)
        return jnp.maximum(y * s_ref[...] + b_ref[...], 0.0)        # fused BN + ReLU

    x = x_ref[0].astype(f32)                                        # (Cin_pad, H*W)

    # conv: 3x3 s1 p1, Cin->16, BN, ReLU
    f1 = conv_bn_relu(patches(x, t16_ref), w1_ref, s1_ref, b1_ref)  # (16, H*W)

    # left[0]: 1x1 conv, 16->8, BN, ReLU (pure matmul, already lane-dense)
    l1 = conv_bn_relu(f1, wl1_ref, sl1_ref, bl1_ref)                # (8, H*W)

    # left[1]: 3x3 s2 p1, 8->16, BN, ReLU (stride-2 folded into the gather matrices)
    left = conv_bn_relu(patches(l1, td_ref), wl2_ref, sl2_ref, bl2_ref)   # (16, HW/4)

    # right: maxpool 3x3 s2 p1 on f1.  f1 >= 0 post-ReLU, so the zeros produced by
    # out-of-bounds (padded) taps never win the max -> identical to -inf padding.
    right = gather(f1, td_ref, 0)
    for t in range(1, 9):
        right = jnp.maximum(right, gather(f1, td_ref, t))           # (16, HW/4)

    # fuse: concat([left, right], C) -> 3x3 s1 p1, 32->16, BN, ReLU
    cat = jnp.concatenate([left, right], axis=0)                    # (32, HW/4)
    out = conv_bn_relu(patches(cat, t8_ref), wf_ref, sf_ref, bf_ref)  # (16, HW/4)

    o_ref[0] = out.astype(o_ref.dtype)


# ------------------------------ JAX wrapper -------------------------------- #

def _shift_mats(H, W, stride):
    """(9, H*W, Ho*Wo) 0/1 matrices: x_flat @ mat[t] == tap-t window of the zero-
    padded (pad=1, k=3) image sampled with `stride` (out-of-bounds taps -> 0)."""
    Ho = (H + 2 - 3) // stride + 1
    Wo = (W + 2 - 3) // stride + 1
    ph = jnp.arange(H * W) // W
    pw = jnp.arange(H * W) % W
    qh = jnp.arange(Ho * Wo) // Wo
    qw = jnp.arange(Ho * Wo) % Wo
    mats = []
    for dh in range(3):
        for dw in range(3):
            hit = (ph[:, None] == stride * qh[None, :] + dh - 1) & \
                  (pw[:, None] == stride * qw[None, :] + dw - 1)
            mats.append(hit.astype(jnp.float32))
    return jnp.stack(mats, axis=0)


def _to_mat(w_hwio):
    """HWIO (K,K,Cin,Cout) -> (Cout, K*K*Cin), columns tap-major to match patches."""
    K1, K2, Ci, Co = w_hwio.shape
    return jnp.transpose(w_hwio, (3, 0, 1, 2)).reshape(Co, K1 * K2 * Ci)


def _col(v):
    return v.reshape(-1, 1).astype(jnp.float32)


def _full_spec(a):
    nd = a.ndim
    return pl.BlockSpec(a.shape, lambda n: (0,) * nd)


def stem_block(x_nchw, p):
    """StemBlock forward. Input (N, 3, H, W) NCHW, output (N, 16, H/2, W/2) NCHW."""
    N, Cin, H, W = x_nchw.shape
    Ho, Wo = H // 2, W // 2
    Cf = p['fuse_w'].shape[-1]

    # Pad input channels to a sublane multiple (8) so all patch blocks stay aligned.
    Cp = -(-Cin // 8) * 8
    x_flat = x_nchw.reshape(N, Cin, H * W)                           # free reshape
    x_flat = jnp.pad(x_flat, ((0, 0), (0, Cp - Cin), (0, 0)))
    conv_w = jnp.pad(p['conv_w'], ((0, 0), (0, 0), (0, Cp - Cin), (0, 0)))

    w1, s1, b1 = _to_mat(conv_w), _col(p['conv_s']), _col(p['conv_b'])
    wl1, sl1, bl1 = _to_mat(p['left1_w']), _col(p['left1_s']), _col(p['left1_b'])
    wl2, sl2, bl2 = _to_mat(p['left2_w']), _col(p['left2_s']), _col(p['left2_b'])
    wf, sf, bf = _to_mat(p['fuse_w']), _col(p['fuse_s']), _col(p['fuse_b'])

    t16 = _shift_mats(H, W, 1)       # (9, HW, HW)      conv1 windows
    td = _shift_mats(H, W, 2)        # (9, HW, HW/4)    stride-2 conv + maxpool windows
    t8 = _shift_mats(Ho, Wo, 1)      # (9, HW/4, HW/4)  fuse conv windows

    consts = (w1, s1, b1, wl1, sl1, bl1, wl2, sl2, bl2, wf, sf, bf, t16, td, t8)

    out = pl.pallas_call(
        _stem_kernel,
        out_shape=jax.ShapeDtypeStruct((N, Cf, Ho * Wo), x_nchw.dtype),
        grid=(N,),
        in_specs=[pl.BlockSpec((1, Cp, H * W), lambda n: (n, 0, 0))]
                 + [_full_spec(a) for a in consts],
        out_specs=pl.BlockSpec((1, Cf, Ho * Wo), lambda n: (n, 0, 0)),
        compiler_params=pltpu.CompilerParams(dimension_semantics=("parallel",)),
    )(x_flat, *consts)
    return out.reshape(N, Cf, Ho, Wo)                                # free reshape


# --------------------------- parameter utilities --------------------------- #

def fold_bn(gamma, beta, mean, var, eps=1e-5):
    scale = gamma / jnp.sqrt(var + eps)
    return scale, beta - mean * scale


def init_bn(key, c):
    k1, k2, k3, k4 = jax.random.split(key, 4)
    gamma = jax.random.uniform(k1, (c,), jnp.float32, 0.5, 1.5)
    beta = jax.random.normal(k2, (c,), jnp.float32) * 0.1
    mean = jax.random.normal(k3, (c,), jnp.float32) * 0.1
    var = jax.random.uniform(k4, (c,), jnp.float32, 0.5, 1.5)
    return fold_bn(gamma, beta, mean, var)


# ------------------------------ pure-JAX ref -------------------------------- #

def _stem_ref(x, p):
    dn = ('NCHW', 'HWIO', 'NCHW')

    def cbr(x, w, s, b, stride, pad):
        y = jax.lax.conv_general_dilated(x, w, (stride, stride), pad,
                                         dimension_numbers=dn)
        y = y * s.reshape(1, -1, 1, 1) + b.reshape(1, -1, 1, 1)
        return jnp.maximum(y, 0.0)

    f = cbr(x, p['conv_w'], p['conv_s'], p['conv_b'], 1, [(1, 1), (1, 1)])
    l = cbr(f, p['left1_w'], p['left1_s'], p['left1_b'], 1, [(0, 0), (0, 0)])
    l = cbr(l, p['left2_w'], p['left2_s'], p['left2_b'], 2, [(1, 1), (1, 1)])
    r = jax.lax.reduce_window(f, -jnp.inf, jax.lax.max, (1, 1, 3, 3), (1, 1, 2, 2),
                              [(0, 0), (0, 0), (1, 1), (1, 1)])
    cat = jnp.concatenate([l, r], axis=1)
    return cbr(cat, p['fuse_w'], p['fuse_s'], p['fuse_b'], 1, [(1, 1), (1, 1)])


# ----------------------------------- main ----------------------------------- #

if __name__ == "__main__":
    N, H, W = 2, 16, 16

    key = jax.random.PRNGKey(0)
    keys = jax.random.split(key, 10)
    w_init = lambda k, s: jax.random.normal(k, s, jnp.float32) * 0.2

    params = {
        'conv_w': w_init(keys[1], (3, 3, 3, 16)),     # ConvBNReLU(3, 16, 3, s1)
        'left1_w': w_init(keys[3], (1, 1, 16, 8)),    # ConvBNReLU(16, 8, 1, s1)
        'left2_w': w_init(keys[5], (3, 3, 8, 16)),    # ConvBNReLU(8, 16, 3, s2)
        'fuse_w': w_init(keys[7], (3, 3, 32, 16)),    # ConvBNReLU(32, 16, 3, s1)
    }
    params['conv_s'], params['conv_b'] = init_bn(keys[2], 16)
    params['left1_s'], params['left1_b'] = init_bn(keys[4], 8)
    params['left2_s'], params['left2_b'] = init_bn(keys[6], 16)
    params['fuse_s'], params['fuse_b'] = init_bn(keys[8], 16)

    x_nchw = jax.random.normal(keys[0], (N, 3, H, W), jnp.float32)

    out = stem_block(x_nchw, params)
    jax.block_until_ready(out)
    assert out.shape == (N, 16, H // 2, W // 2), out.shape

    ref = _stem_ref(x_nchw, params)
    max_err = float(jnp.max(jnp.abs(out - ref)))
    assert jnp.allclose(out, ref, atol=1e-3, rtol=1e-3), max_err

    print("KERNEL_OK")
</pallas_src>

<mosaic_0001>
module attributes {stable_mosaic.version = 11 : i64} {
  func.func @_stem_kernel(%arg0: i32, %arg1: memref<1x8x256xf32, #tpu.memory_space<vmem>>, %arg2: memref<16x72xf32, #tpu.memory_space<vmem>>, %arg3: memref<16x1xf32, #tpu.memory_space<vmem>>, %arg4: memref<16x1xf32, #tpu.memory_space<vmem>>, %arg5: memref<8x16xf32, #tpu.memory_space<vmem>>, %arg6: memref<8x1xf32, #tpu.memory_space<vmem>>, %arg7: memref<8x1xf32, #tpu.memory_space<vmem>>, %arg8: memref<16x72xf32, #tpu.memory_space<vmem>>, %arg9: memref<16x1xf32, #tpu.memory_space<vmem>>, %arg10: memref<16x1xf32, #tpu.memory_space<vmem>>, %arg11: memref<16x288xf32, #tpu.memory_space<vmem>>, %arg12: memref<16x1xf32, #tpu.memory_space<vmem>>, %arg13: memref<16x1xf32, #tpu.memory_space<vmem>>, %arg14: memref<9x256x256xf32, #tpu.memory_space<vmem>>, %arg15: memref<9x256x64xf32, #tpu.memory_space<vmem>>, %arg16: memref<9x64x64xf32, #tpu.memory_space<vmem>>, %arg17: memref<1x16x64xf32, #tpu.memory_space<vmem>>) attributes {dimension_semantics = [#tpu.dimension_semantics<parallel>], iteration_bounds = array<i64: 2>, scalar_prefetch = 0 : i64, scratch_operands = 0 : i64, tpu.core_type = #tpu.core_type<tc>, window_params = [{transform_indices = @transform_0, window_bounds = array<i64: 1, 8, 256>}, {pipeline_mode = #tpu.pipeline_mode<synchronous>, transform_indices = @transform_1, window_bounds = array<i64: 16, 72>}, {pipeline_mode = #tpu.pipeline_mode<synchronous>, transform_indices = @transform_2, window_bounds = array<i64: 16, 1>}, {pipeline_mode = #tpu.pipeline_mode<synchronous>, transform_indices = @transform_3, window_bounds = array<i64: 16, 1>}, {pipeline_mode = #tpu.pipeline_mode<synchronous>, transform_indices = @transform_4, window_bounds = array<i64: 8, 16>}, {pipeline_mode = #tpu.pipeline_mode<synchronous>, transform_indices = @transform_5, window_bounds = array<i64: 8, 1>}, {pipeline_mode = #tpu.pipeline_mode<synchronous>, transform_indices = @transform_6, window_bounds = array<i64: 8, 1>}, {pipeline_mode = #tpu.pipeline_mode<synchronous>, transform_indices = @transform_7, window_bounds = array<i64: 16, 72>}, {pipeline_mode = #tpu.pipeline_mode<synchronous>, transform_indices = @transform_8, window_bounds = array<i64: 16, 1>}, {pipeline_mode = #tpu.pipeline_mode<synchronous>, transform_indices = @transform_9, window_bounds = array<i64: 16, 1>}, {pipeline_mode = #tpu.pipeline_mode<synchronous>, transform_indices = @transform_10, window_bounds = array<i64: 16, 288>}, {pipeline_mode = #tpu.pipeline_mode<synchronous>, transform_indices = @transform_11, window_bounds = array<i64: 16, 1>}, {pipeline_mode = #tpu.pipeline_mode<synchronous>, transform_indices = @transform_12, window_bounds = array<i64: 16, 1>}, {pipeline_mode = #tpu.pipeline_mode<synchronous>, transform_indices = @transform_13, window_bounds = array<i64: 9, 256, 256>}, {pipeline_mode = #tpu.pipeline_mode<synchronous>, transform_indices = @transform_14, window_bounds = array<i64: 9, 256, 64>}, {pipeline_mode = #tpu.pipeline_mode<synchronous>, transform_indices = @transform_15, window_bounds = array<i64: 9, 64, 64>}, {transform_indices = @transform_16, window_bounds = array<i64: 1, 16, 64>}]} {
    %c0 = arith.constant 0 : index
    %c0_0 = arith.constant 0 : index
    %c0_1 = arith.constant 0 : index
    %0 = vector.load %arg1[%c0, %c0_0, %c0_1] : memref<1x8x256xf32, #tpu.memory_space<vmem>>, vector<1x8x256xf32>
    %1 = vector.shape_cast %0 : vector<1x8x256xf32> to vector<8x256xf32>
    %c0_2 = arith.constant 0 : index
    %c0_3 = arith.constant 0 : index
    %c0_4 = arith.constant 0 : index
    %2 = vector.load %arg14[%c0_2, %c0_3, %c0_4] : memref<9x256x256xf32, #tpu.memory_space<vmem>>, vector<1x256x256xf32>
    %3 = vector.shape_cast %2 : vector<1x256x256xf32> to vector<256x256xf32>
    %cst = arith.constant dense<0.000000e+00> : vector<8x256xf32>
    %4 = tpu.matmul %1, %3, %cst {dimension_numbers = #tpu.dot_dimension_numbers<[1], [0], [0], [1], [0, 0, 1, 1], [], []>} : vector<8x256xf32>, vector<256x256xf32>, vector<8x256xf32> -> vector<8x256xf32>
    %c1 = arith.constant 1 : index
    %c0_5 = arith.constant 0 : index
    %c0_6 = arith.constant 0 : index
    %5 = vector.load %arg14[%c1, %c0_5, %c0_6] : memref<9x256x256xf32, #tpu.memory_space<vmem>>, vector<1x256x256xf32>
    %6 = vector.shape_cast %5 : vector<1x256x256xf32> to vector<256x256xf32>
    %cst_7 = arith.constant dense<0.000000e+00> : vector<8x256xf32>
    %7 = tpu.matmul %1, %6, %cst_7 {dimension_numbers = #tpu.dot_dimension_numbers<[1], [0], [0], [1], [0, 0, 1, 1], [], []>} : vector<8x256xf32>, vector<256x256xf32>, vector<8x256xf32> -> vector<8x256xf32>
    %c2 = arith.constant 2 : index
    %c0_8 = arith.constant 0 : index
    %c0_9 = arith.constant 0 : index
    %8 = vector.load %arg14[%c2, %c0_8, %c0_9] : memref<9x256x256xf32, #tpu.memory_space<vmem>>, vector<1x256x256xf32>
    %9 = vector.shape_cast %8 : vector<1x256x256xf32> to vector<256x256xf32>
    %cst_10 = arith.constant dense<0.000000e+00> : vector<8x256xf32>
    %10 = tpu.matmul %1, %9, %cst_10 {dimension_numbers = #tpu.dot_dimension_numbers<[1], [0], [0], [1], [0, 0, 1, 1], [], []>} : vector<8x256xf32>, vector<256x256xf32>, vector<8x256xf32> -> vector<8x256xf32>
    %c3 = arith.constant 3 : index
    %c0_11 = arith.constant 0 : index
    %c0_12 = arith.constant 0 : index
    %11 = vector.load %arg14[%c3, %c0_11, %c0_12] : memref<9x256x256xf32, #tpu.memory_space<vmem>>, vector<1x256x256xf32>
    %12 = vector.shape_cast %11 : vector<1x256x256xf32> to vector<256x256xf32>
    %cst_13 = arith.constant dense<0.000000e+00> : vector<8x256xf32>
    %13 = tpu.matmul %1, %12, %cst_13 {dimension_numbers = #tpu.dot_dimension_numbers<[1], [0], [0], [1], [0, 0, 1, 1], [], []>} : vector<8x256xf32>, vector<256x256xf32>, vector<8x256xf32> -> vector<8x256xf32>
    %c4 = arith.constant 4 : index
    %c0_14 = arith.constant 0 : index
    %c0_15 = arith.constant 0 : index
    %14 = vector.load %arg14[%c4, %c0_14, %c0_15] : memref<9x256x256xf32, #tpu.memory_space<vmem>>, vector<1x256x256xf32>
    %15 = vector.shape_cast %14 : vector<1x256x256xf32> to vector<256x256xf32>
    %cst_16 = arith.constant dense<0.000000e+00> : vector<8x256xf32>
    %16 = tpu.matmul %1, %15, %cst_16 {dimension_numbers = #tpu.dot_dimension_numbers<[1], [0], [0], [1], [0, 0, 1, 1], [], []>} : vector<8x256xf32>, vector<256x256xf32>, vector<8x256xf32> -> vector<8x256xf32>
    %c5 = arith.constant 5 : index
    %c0_17 = arith.constant 0 : index
    %c0_18 = arith.constant 0 : index
    %17 = vector.load %arg14[%c5, %c0_17, %c0_18] : memref<9x256x256xf32, #tpu.memory_space<vmem>>, vector<1x256x256xf32>
    %18 = vector.shape_cast %17 : vector<1x256x256xf32> to vector<256x256xf32>
    %cst_19 = arith.constant dense<0.000000e+00> : vector<8x256xf32>
    %19 = tpu.matmul %1, %18, %cst_19 {dimension_numbers = #tpu.dot_dimension_numbers<[1], [0], [0], [1], [0, 0, 1, 1], [], []>} : vector<8x256xf32>, vector<256x256xf32>, vector<8x256xf32> -> vector<8x256xf32>
    %c6 = arith.constant 6 : index
    %c0_20 = arith.constant 0 : index
    %c0_21 = arith.constant 0 : index
    %20 = vector.load %arg14[%c6, %c0_20, %c0_21] : memref<9x256x256xf32, #tpu.memory_space<vmem>>, vector<1x256x256xf32>
    %21 = vector.shape_cast %20 : vector<1x256x256xf32> to vector<256x256xf32>
    %cst_22 = arith.constant dense<0.000000e+00> : vector<8x256xf32>
    %22 = tpu.matmul %1, %21, %cst_22 {dimension_numbers = #tpu.dot_dimension_numbers<[1], [0], [0], [1], [0, 0, 1, 1], [], []>} : vector<8x256xf32>, vector<256x256xf32>, vector<8x256xf32> -> vector<8x256xf32>
    %c7 = arith.constant 7 : index
    %c0_23 = arith.constant 0 : index
    %c0_24 = arith.constant 0 : index
    %23 = vector.load %arg14[%c7, %c0_23, %c0_24] : memref<9x256x256xf32, #tpu.memory_space<vmem>>, vector<1x256x256xf32>
    %24 = vector.shape_cast %23 : vector<1x256x256xf32> to vector<256x256xf32>
    %cst_25 = arith.constant dense<0.000000e+00> : vector<8x256xf32>
    %25 = tpu.matmul %1, %24, %cst_25 {dimension_numbers = #tpu.dot_dimension_numbers<[1], [0], [0], [1], [0, 0, 1, 1], [], []>} : vector<8x256xf32>, vector<256x256xf32>, vector<8x256xf32> -> vector<8x256xf32>
    %c8 = arith.constant 8 : index
    %c0_26 = arith.constant 0 : index
    %c0_27 = arith.constant 0 : index
    %26 = vector.load %arg14[%c8, %c0_26, %c0_27] : memref<9x256x256xf32, #tpu.memory_space<vmem>>, vector<1x256x256xf32>
    %27 = vector.shape_cast %26 : vector<1x256x256xf32> to vector<256x256xf32>
    %cst_28 = arith.constant dense<0.000000e+00> : vector<8x256xf32>
    %28 = tpu.matmul %1, %27, %cst_28 {dimension_numbers = #tpu.dot_dimension_numbers<[1], [0], [0], [1], [0, 0, 1, 1], [], []>} : vector<8x256xf32>, vector<256x256xf32>, vector<8x256xf32> -> vector<8x256xf32>
    %29 = tpu.concatenate %4, %7, %10, %13, %16, %19, %22, %25, %28 in 0 : vector<8x256xf32>, vector<8x256xf32>, vector<8x256xf32>, vector<8x256xf32>, vector<8x256xf32>, vector<8x256xf32>, vector<8x256xf32>, vector<8x256xf32>, vector<8x256xf32> -> vector<72x256xf32>
    %c0_29 = arith.constant 0 : index
    %c0_30 = arith.constant 0 : index
    %30 = vector.load %arg2[%c0_29, %c0_30] : memref<16x72xf32, #tpu.memory_space<vmem>>, vector<16x72xf32>
    %cst_31 = arith.constant dense<0.000000e+00> : vector<16x256xf32>
    %31 = tpu.matmul %30, %29, %cst_31 {dimension_numbers = #tpu.dot_dimension_numbers<[1], [0], [0], [1], [0, 0, 1, 1], [], []>} : vector<16x72xf32>, vector<72x256xf32>, vector<16x256xf32> -> vector<16x256xf32>
    %c0_32 = arith.constant 0 : index
    %c0_33 = arith.constant 0 : index
    %32 = vector.load %arg3[%c0_32, %c0_33] : memref<16x1xf32, #tpu.memory_space<vmem>>, vector<16x1xf32>
    %33 = vector.broadcast %32 : vector<16x1xf32> to vector<16x256xf32>
    %34 = arith.mulf %31, %33 : vector<16x256xf32>
    %c0_34 = arith.constant 0 : index
    %c0_35 = arith.constant 0 : index
    %35 = vector.load %arg4[%c0_34, %c0_35] : memref<16x1xf32, #tpu.memory_space<vmem>>, vector<16x1xf32>
    %36 = vector.broadcast %35 : vector<16x1xf32> to vector<16x256xf32>
    %37 = arith.addf %34, %36 : vector<16x256xf32>
    %cst_36 = arith.constant 0.000000e+00 : f32
    %38 = vector.broadcast %cst_36 : f32 to vector<16x256xf32>
    %39 = arith.maximumf %37, %38 : vector<16x256xf32>
    %c0_37 = arith.constant 0 : index
    %c0_38 = arith.constant 0 : index
    %40 = vector.load %arg5[%c0_37, %c0_38] : memref<8x16xf32, #tpu.memory_space<vmem>>, vector<8x16xf32>
    %cst_39 = arith.constant dense<0.000000e+00> : vector<8x256xf32>
    %41 = tpu.matmul %40, %39, %cst_39 {dimension_numbers = #tpu.dot_dimension_numbers<[1], [0], [0], [1], [0, 0, 1, 1], [], []>} : vector<8x16xf32>, vector<16x256xf32>, vector<8x256xf32> -> vector<8x256xf32>
    %c0_40 = arith.constant 0 : index
    %c0_41 = arith.constant 0 : index
    %42 = vector.load %arg6[%c0_40, %c0_41] : memref<8x1xf32, #tpu.memory_space<vmem>>, vector<8x1xf32>
    %43 = vector.broadcast %42 : vector<8x1xf32> to vector<8x256xf32>
    %44 = arith.mulf %41, %43 : vector<8x256xf32>
    %c0_42 = arith.constant 0 : index
    %c0_43 = arith.constant 0 : index
    %45 = vector.load %arg7[%c0_42, %c0_43] : memref<8x1xf32, #tpu.memory_space<vmem>>, vector<8x1xf32>
    %46 = vector.broadcast %45 : vector<8x1xf32> to vector<8x256xf32>
    %47 = arith.addf %44, %46 : vector<8x256xf32>
    %cst_44 = arith.constant 0.000000e+00 : f32
    %48 = vector.broadcast %cst_44 : f32 to vector<8x256xf32>
    %49 = arith.maximumf %47, %48 : vector<8x256xf32>
    %c0_45 = arith.constant 0 : index
    %c0_46 = arith.constant 0 : index
    %c0_47 = arith.constant 0 : index
    %50 = vector.load %arg15[%c0_45, %c0_46, %c0_47] : memref<9x256x64xf32, #tpu.memory_space<vmem>>, vector<1x256x64xf32>
    %51 = vector.shape_cast %50 : vector<1x256x64xf32> to vector<256x64xf32>
    %cst_48 = arith.constant dense<0.000000e+00> : vector<8x64xf32>
    %52 = tpu.matmul %49, %51, %cst_48 {dimension_numbers = #tpu.dot_dimension_numbers<[1], [0], [0], [1], [0, 0, 1, 1], [], []>} : vector<8x256xf32>, vector<256x64xf32>, vector<8x64xf32> -> vector<8x64xf32>
    %c1_49 = arith.constant 1 : index
    %c0_50 = arith.constant 0 : index
    %c0_51 = arith.constant 0 : index
    %53 = vector.load %arg15[%c1_49, %c0_50, %c0_51] : memref<9x256x64xf32, #tpu.memory_space<vmem>>, vector<1x256x64xf32>
    %54 = vector.shape_cast %53 : vector<1x256x64xf32> to vector<256x64xf32>
    %cst_52 = arith.constant dense<0.000000e+00> : vector<8x64xf32>
    %55 = tpu.matmul %49, %54, %cst_52 {dimension_numbers = #tpu.dot_dimension_numbers<[1], [0], [0], [1], [0, 0, 1, 1], [], []>} : vector<8x256xf32>, vector<256x64xf32>, vector<8x64xf32> -> vector<8x64xf32>
    %c2_53 = arith.constant 2 : index
    %c0_54 = arith.constant 0 : index
    %c0_55 = arith.constant 0 : index
    %56 = vector.load %arg15[%c2_53, %c0_54, %c0_55] : memref<9x256x64xf32, #tpu.memory_space<vmem>>, vector<1x256x64xf32>
    %57 = vector.shape_cast %56 : vector<1x256x64xf32> to vector<256x64xf32>
    %cst_56 = arith.constant dense<0.000000e+00> : vector<8x64xf32>
    %58 = tpu.matmul %49, %57, %cst_56 {dimension_numbers = #tpu.dot_dimension_numbers<[1], [0], [0], [1], [0, 0, 1, 1], [], []>} : vector<8x256xf32>, vector<256x64xf32>, vector<8x64xf32> -> vector<8x64xf32>
    %c3_57 = arith.constant 3 : index
    %c0_58 = arith.constant 0 : index
    %c0_59 = arith.constant 0 : index
    %59 = vector.load %arg15[%c3_57, %c0_58, %c0_59] : memref<9x256x64xf32, #tpu.memory_space<vmem>>, vector<1x256x64xf32>
    %60 = vector.shape_cast %59 : vector<1x256x64xf32> to vector<256x64xf32>
    %cst_60 = arith.constant dense<0.000000e+00> : vector<8x64xf32>
    %61 = tpu.matmul %49, %60, %cst_60 {dimension_numbers = #tpu.dot_dimension_numbers<[1], [0], [0], [1], [0, 0, 1, 1], [], []>} : vector<8x256xf32>, vector<256x64xf32>, vector<8x64xf32> -> vector<8x64xf32>
    %c4_61 = arith.constant 4 : index
    %c0_62 = arith.constant 0 : index
    %c0_63 = arith.constant 0 : index
    %62 = vector.load %arg15[%c4_61, %c0_62, %c0_63] : memref<9x256x64xf32, #tpu.memory_space<vmem>>, vector<1x256x64xf32>
    %63 = vector.shape_cast %62 : vector<1x256x64xf32> to vector<256x64xf32>
    %cst_64 = arith.constant dense<0.000000e+00> : vector<8x64xf32>
    %64 = tpu.matmul %49, %63, %cst_64 {dimension_numbers = #tpu.dot_dimension_numbers<[1], [0], [0], [1], [0, 0, 1, 1], [], []>} : vector<8x256xf32>, vector<256x64xf32>, vector<8x64xf32> -> vector<8x64xf32>
    %c5_65 = arith.constant 5 : index
    %c0_66 = arith.constant 0 : index
    %c0_67 = arith.constant 0 : index
    %65 = vector.load %arg15[%c5_65, %c0_66, %c0_67] : memref<9x256x64xf32, #tpu.memory_space<vmem>>, vector<1x256x64xf32>
    %66 = vector.shape_cast %65 : vector<1x256x64xf32> to vector<256x64xf32>
    %cst_68 = arith.constant dense<0.000000e+00> : vector<8x64xf32>
    %67 = tpu.matmul %49, %66, %cst_68 {dimension_numbers = #tpu.dot_dimension_numbers<[1], [0], [0], [1], [0, 0, 1, 1], [], []>} : vector<8x256xf32>, vector<256x64xf32>, vector<8x64xf32> -> vector<8x64xf32>
    %c6_69 = arith.constant 6 : index
    %c0_70 = arith.constant 0 : index
    %c0_71 = arith.constant 0 : index
    %68 = vector.load %arg15[%c6_69, %c0_70, %c0_71] : memref<9x256x64xf32, #tpu.memory_space<vmem>>, vector<1x256x64xf32>
    %69 = vector.shape_cast %68 : vector<1x256x64xf32> to vector<256x64xf32>
    %cst_72 = arith.constant dense<0.000000e+00> : vector<8x64xf32>
    %70 = tpu.matmul %49, %69, %cst_72 {dimension_numbers = #tpu.dot_dimension_numbers<[1], [0], [0], [1], [0, 0, 1, 1], [], []>} : vector<8x256xf32>, vector<256x64xf32>, vector<8x64xf32> -> vector<8x64xf32>
    %c7_73 = arith.constant 7 : index
    %c0_74 = arith.constant 0 : index
    %c0_75 = arith.constant 0 : index
    %71 = vector.load %arg15[%c7_73, %c0_74, %c0_75] : memref<9x256x64xf32, #tpu.memory_space<vmem>>, vector<1x256x64xf32>
    %72 = vector.shape_cast %71 : vector<1x256x64xf32> to vector<256x64xf32>
    %cst_76 = arith.constant dense<0.000000e+00> : vector<8x64xf32>
    %73 = tpu.matmul %49, %72, %cst_76 {dimension_numbers = #tpu.dot_dimension_numbers<[1], [0], [0], [1], [0, 0, 1, 1], [], []>} : vector<8x256xf32>, vector<256x64xf32>, vector<8x64xf32> -> vector<8x64xf32>
    %c8_77 = arith.constant 8 : index
    %c0_78 = arith.constant 0 : index
    %c0_79 = arith.constant 0 : index
    %74 = vector.load %arg15[%c8_77, %c0_78, %c0_79] : memref<9x256x64xf32, #tpu.memory_space<vmem>>, vector<1x256x64xf32>
    %75 = vector.shape_cast %74 : vector<1x256x64xf32> to vector<256x64xf32>
    %cst_80 = arith.constant dense<0.000000e+00> : vector<8x64xf32>
    %76 = tpu.matmul %49, %75, %cst_80 {dimension_numbers = #tpu.dot_dimension_numbers<[1], [0], [0], [1], [0, 0, 1, 1], [], []>} : vector<8x256xf32>, vector<256x64xf32>, vector<8x64xf32> -> vector<8x64xf32>
    %77 = tpu.concatenate %52, %55, %58, %61, %64, %67, %70, %73, %76 in 0 : vector<8x64xf32>, vector<8x64xf32>, vector<8x64xf32>, vector<8x64xf32>, vector<8x64xf32>, vector<8x64xf32>, vector<8x64xf32>, vector<8x64xf32>, vector<8x64xf32> -> vector<72x64xf32>
    %c0_81 = arith.constant 0 : index
    %c0_82 = arith.constant 0 : index
    %78 = vector.load %arg8[%c0_81, %c0_82] : memref<16x72xf32, #tpu.memory_space<vmem>>, vector<16x72xf32>
    %cst_83 = arith.constant dense<0.000000e+00> : vector<16x64xf32>
    %79 = tpu.matmul %78, %77, %cst_83 {dimension_numbers = #tpu.dot_dimension_numbers<[1], [0], [0], [1], [0, 0, 1, 1], [], []>} : vector<16x72xf32>, vector<72x64xf32>, vector<16x64xf32> -> vector<16x64xf32>
    %c0_84 = arith.constant 0 : index
    %c0_85 = arith.constant 0 : index
    %80 = vector.load %arg9[%c0_84, %c0_85] : memref<16x1xf32, #tpu.memory_space<vmem>>, vector<16x1xf32>
    %81 = vector.broadcast %80 : vector<16x1xf32> to vector<16x64xf32>
    %82 = arith.mulf %79, %81 : vector<16x64xf32>
    %c0_86 = arith.constant 0 : index
    %c0_87 = arith.constant 0 : index
    %83 = vector.load %arg10[%c0_86, %c0_87] : memref<16x1xf32, #tpu.memory_space<vmem>>, vector<16x1xf32>
    %84 = vector.broadcast %83 : vector<16x1xf32> to vector<16x64xf32>
    %85 = arith.addf %82, %84 : vector<16x64xf32>
    %cst_88 = arith.constant 0.000000e+00 : f32
    %86 = vector.broadcast %cst_88 : f32 to vector<16x64xf32>
    %87 = arith.maximumf %85, %86 : vector<16x64xf32>
    %c0_89 = arith.constant 0 : index
    %c0_90 = arith.constant 0 : index
    %c0_91 = arith.constant 0 : index
    %88 = vector.load %arg15[%c0_89, %c0_90, %c0_91] : memref<9x256x64xf32, #tpu.memory_space<vmem>>, vector<1x256x64xf32>
    %89 = vector.shape_cast %88 : vector<1x256x64xf32> to vector<256x64xf32>
    %cst_92 = arith.constant dense<0.000000e+00> : vector<16x64xf32>
    %90 = tpu.matmul %39, %89, %cst_92 {dimension_numbers = #tpu.dot_dimension_numbers<[1], [0], [0], [1], [0, 0, 1, 1], [], []>} : vector<16x256xf32>, vector<256x64xf32>, vector<16x64xf32> -> vector<16x64xf32>
    %c1_93 = arith.constant 1 : index
    %c0_94 = arith.constant 0 : index
    %c0_95 = arith.constant 0 : index
    %91 = vector.load %arg15[%c1_93, %c0_94, %c0_95] : memref<9x256x64xf32, #tpu.memory_space<vmem>>, vector<1x256x64xf32>
    %92 = vector.shape_cast %91 : vector<1x256x64xf32> to vector<256x64xf32>
    %cst_96 = arith.constant dense<0.000000e+00> : vector<16x64xf32>
    %93 = tpu.matmul %39, %92, %cst_96 {dimension_numbers = #tpu.dot_dimension_numbers<[1], [0], [0], [1], [0, 0, 1, 1], [], []>} : vector<16x256xf32>, vector<256x64xf32>, vector<16x64xf32> -> vector<16x64xf32>
    %94 = arith.maximumf %90, %93 : vector<16x64xf32>
    %c2_97 = arith.constant 2 : index
    %c0_98 = arith.constant 0 : index
    %c0_99 = arith.constant 0 : index
    %95 = vector.load %arg15[%c2_97, %c0_98, %c0_99] : memref<9x256x64xf32, #tpu.memory_space<vmem>>, vector<1x256x64xf32>
    %96 = vector.shape_cast %95 : vector<1x256x64xf32> to vector<256x64xf32>
    %cst_100 = arith.constant dense<0.000000e+00> : vector<16x64xf32>
    %97 = tpu.matmul %39, %96, %cst_100 {dimension_numbers = #tpu.dot_dimension_numbers<[1], [0], [0], [1], [0, 0, 1, 1], [], []>} : vector<16x256xf32>, vector<256x64xf32>, vector<16x64xf32> -> vector<16x64xf32>
    %98 = arith.maximumf %94, %97 : vector<16x64xf32>
    %c3_101 = arith.constant 3 : index
    %c0_102 = arith.constant 0 : index
    %c0_103 = arith.constant 0 : index
    %99 = vector.load %arg15[%c3_101, %c0_102, %c0_103] : memref<9x256x64xf32, #tpu.memory_space<vmem>>, vector<1x256x64xf32>
    %100 = vector.shape_cast %99 : vector<1x256x64xf32> to vector<256x64xf32>
    %cst_104 = arith.constant dense<0.000000e+00> : vector<16x64xf32>
    %101 = tpu.matmul %39, %100, %cst_104 {dimension_numbers = #tpu.dot_dimension_numbers<[1], [0], [0], [1], [0, 0, 1, 1], [], []>} : vector<16x256xf32>, vector<256x64xf32>, vector<16x64xf32> -> vector<16x64xf32>
    %102 = arith.maximumf %98, %101 : vector<16x64xf32>
    %c4_105 = arith.constant 4 : index
    %c0_106 = arith.constant 0 : index
    %c0_107 = arith.constant 0 : index
    %103 = vector.load %arg15[%c4_105, %c0_106, %c0_107] : memref<9x256x64xf32, #tpu.memory_space<vmem>>, vector<1x256x64xf32>
    %104 = vector.shape_cast %103 : vector<1x256x64xf32> to vector<256x64xf32>
    %cst_108 = arith.constant dense<0.000000e+00> : vector<16x64xf32>
    %105 = tpu.matmul %39, %104, %cst_108 {dimension_numbers = #tpu.dot_dimension_numbers<[1], [0], [0], [1], [0, 0, 1, 1], [], []>} : vector<16x256xf32>, vector<256x64xf32>, vector<16x64xf32> -> vector<16x64xf32>
    %106 = arith.maximumf %102, %105 : vector<16x64xf32>
    %c5_109 = arith.constant 5 : index
    %c0_110 = arith.constant 0 : index
    %c0_111 = arith.constant 0 : index
    %107 = vector.load %arg15[%c5_109, %c0_110, %c0_111] : memref<9x256x64xf32, #tpu.memory_space<vmem>>, vector<1x256x64xf32>
    %108 = vector.shape_cast %107 : vector<1x256x64xf32> to vector<256x64xf32>
    %cst_112 = arith.constant dense<0.000000e+00> : vector<16x64xf32>
    %109 = tpu.matmul %39, %108, %cst_112 {dimension_numbers = #tpu.dot_dimension_numbers<[1], [0], [0], [1], [0, 0, 1, 1], [], []>} : vector<16x256xf32>, vector<256x64xf32>, vector<16x64xf32> -> vector<16x64xf32>
    %110 = arith.maximumf %106, %109 : vector<16x64xf32>
    %c6_113 = arith.constant 6 : index
    %c0_114 = arith.constant 0 : index
    %c0_115 = arith.constant 0 : index
    %111 = vector.load %arg15[%c6_113, %c0_114, %c0_115] : memref<9x256x64xf32, #tpu.memory_space<vmem>>, vector<1x256x64xf32>
    %112 = vector.shape_cast %111 : vector<1x256x64xf32> to vector<256x64xf32>
    %cst_116 = arith.constant dense<0.000000e+00> : vector<16x64xf32>
    %113 = tpu.matmul %39, %112, %cst_116 {dimension_numbers = #tpu.dot_dimension_numbers<[1], [0], [0], [1], [0, 0, 1, 1], [], []>} : vector<16x256xf32>, vector<256x64xf32>, vector<16x64xf32> -> vector<16x64xf32>
    %114 = arith.maximumf %110, %113 : vector<16x64xf32>
    %c7_117 = arith.constant 7 : index
    %c0_118 = arith.constant 0 : index
    %c0_119 = arith.constant 0 : index
    %115 = vector.load %arg15[%c7_117, %c0_118, %c0_119] : memref<9x256x64xf32, #tpu.memory_space<vmem>>, vector<1x256x64xf32>
    %116 = vector.shape_cast %115 : vector<1x256x64xf32> to vector<256x64xf32>
    %cst_120 = arith.constant dense<0.000000e+00> : vector<16x64xf32>
    %117 = tpu.matmul %39, %116, %cst_120 {dimension_numbers = #tpu.dot_dimension_numbers<[1], [0], [0], [1], [0, 0, 1, 1], [], []>} : vector<16x256xf32>, vector<256x64xf32>, vector<16x64xf32> -> vector<16x64xf32>
    %118 = arith.maximumf %114, %117 : vector<16x64xf32>
    %c8_121 = arith.constant 8 : index
    %c0_122 = arith.constant 0 : index
    %c0_123 = arith.constant 0 : index
    %119 = vector.load %arg15[%c8_121, %c0_122, %c0_123] : memref<9x256x64xf32, #tpu.memory_space<vmem>>, vector<1x256x64xf32>
    %120 = vector.shape_cast %119 : vector<1x256x64xf32> to vector<256x64xf32>
    %cst_124 = arith.constant dense<0.000000e+00> : vector<16x64xf32>
    %121 = tpu.matmul %39, %120, %cst_124 {dimension_numbers = #tpu.dot_dimension_numbers<[1], [0], [0], [1], [0, 0, 1, 1], [], []>} : vector<16x256xf32>, vector<256x64xf32>, vector<16x64xf32> -> vector<16x64xf32>
    %122 = arith.maximumf %118, %121 : vector<16x64xf32>
    %123 = tpu.concatenate %87, %122 in 0 : vector<16x64xf32>, vector<16x64xf32> -> vector<32x64xf32>
    %c0_125 = arith.constant 0 : index
    %c0_126 = arith.constant 0 : index
    %c0_127 = arith.constant 0 : index
    %124 = vector.load %arg16[%c0_125, %c0_126, %c0_127] : memref<9x64x64xf32, #tpu.memory_space<vmem>>, vector<1x64x64xf32>
    %125 = vector.shape_cast %124 : vector<1x64x64xf32> to vector<64x64xf32>
    %cst_128 = arith.constant dense<0.000000e+00> : vector<32x64xf32>
    %126 = tpu.matmul %123, %125, %cst_128 {dimension_numbers = #tpu.dot_dimension_numbers<[1], [0], [0], [1], [0, 0, 1, 1], [], []>} : vector<32x64xf32>, vector<64x64xf32>, vector<32x64xf32> -> vector<32x64xf32>
    %c1_129 = arith.constant 1 : index
    %c0_130 = arith.constant 0 : index
    %c0_131 = arith.constant 0 : index
    %127 = vector.load %arg16[%c1_129, %c0_130, %c0_131] : memref<9x64x64xf32, #tpu.memory_space<vmem>>, vector<1x64x64xf32>
    %128 = vector.shape_cast %127 : vector<1x64x64xf32> to vector<64x64xf32>
    %cst_132 = arith.constant dense<0.000000e+00> : vector<32x64xf32>
    %129 = tpu.matmul %123, %128, %cst_132 {dimension_numbers = #tpu.dot_dimension_numbers<[1], [0], [0], [1], [0, 0, 1, 1], [], []>} : vector<32x64xf32>, vector<64x64xf32>, vector<32x64xf32> -> vector<32x64xf32>
    %c2_133 = arith.constant 2 : index
    %c0_134 = arith.constant 0 : index
    %c0_135 = arith.constant 0 : index
    %130 = vector.load %arg16[%c2_133, %c0_134, %c0_135] : memref<9x64x64xf32, #tpu.memory_space<vmem>>, vector<1x64x64xf32>
    %131 = vector.shape_cast %130 : vector<1x64x64xf32> to vector<64x64xf32>
    %cst_136 = arith.constant dense<0.000000e+00> : vector<32x64xf32>
    %132 = tpu.matmul %123, %131, %cst_136 {dimension_numbers = #tpu.dot_dimension_numbers<[1], [0], [0], [1], [0, 0, 1, 1], [], []>} : vector<32x64xf32>, vector<64x64xf32>, vector<32x64xf32> -> vector<32x64xf32>
    %c3_137 = arith.constant 3 : index
    %c0_138 = arith.constant 0 : index
    %c0_139 = arith.constant 0 : index
    %133 = vector.load %arg16[%c3_137, %c0_138, %c0_139] : memref<9x64x64xf32, #tpu.memory_space<vmem>>, vector<1x64x64xf32>
    %134 = vector.shape_cast %133 : vector<1x64x64xf32> to vector<64x64xf32>
    %cst_140 = arith.constant dense<0.000000e+00> : vector<32x64xf32>
    %135 = tpu.matmul %123, %134, %cst_140 {dimension_numbers = #tpu.dot_dimension_numbers<[1], [0], [0], [1], [0, 0, 1, 1], [], []>} : vector<32x64xf32>, vector<64x64xf32>, vector<32x64xf32> -> vector<32x64xf32>
    %c4_141 = arith.constant 4 : index
    %c0_142 = arith.constant 0 : index
    %c0_143 = arith.constant 0 : index
    %136 = vector.load %arg16[%c4_141, %c0_142, %c0_143] : memref<9x64x64xf32, #tpu.memory_space<vmem>>, vector<1x64x64xf32>
    %137 = vector.shape_cast %136 : vector<1x64x64xf32> to vector<64x64xf32>
    %cst_144 = arith.constant dense<0.000000e+00> : vector<32x64xf32>
    %138 = tpu.matmul %123, %137, %cst_144 {dimension_numbers = #tpu.dot_dimension_numbers<[1], [0], [0], [1], [0, 0, 1, 1], [], []>} : vector<32x64xf32>, vector<64x64xf32>, vector<32x64xf32> -> vector<32x64xf32>
    %c5_145 = arith.constant 5 : index
    %c0_146 = arith.constant 0 : index
    %c0_147 = arith.constant 0 : index
    %139 = vector.load %arg16[%c5_145, %c0_146, %c0_147] : memref<9x64x64xf32, #tpu.memory_space<vmem>>, vector<1x64x64xf32>
    %140 = vector.shape_cast %139 : vector<1x64x64xf32> to vector<64x64xf32>
    %cst_148 = arith.constant dense<0.000000e+00> : vector<32x64xf32>
    %141 = tpu.matmul %123, %140, %cst_148 {dimension_numbers = #tpu.dot_dimension_numbers<[1], [0], [0], [1], [0, 0, 1, 1], [], []>} : vector<32x64xf32>, vector<64x64xf32>, vector<32x64xf32> -> vector<32x64xf32>
    %c6_149 = arith.constant 6 : index
    %c0_150 = arith.constant 0 : index
    %c0_151 = arith.constant 0 : index
    %142 = vector.load %arg16[%c6_149, %c0_150, %c0_151] : memref<9x64x64xf32, #tpu.memory_space<vmem>>, vector<1x64x64xf32>
    %143 = vector.shape_cast %142 : vector<1x64x64xf32> to vector<64x64xf32>
    %cst_152 = arith.constant dense<0.000000e+00> : vector<32x64xf32>
    %144 = tpu.matmul %123, %143, %cst_152 {dimension_numbers = #tpu.dot_dimension_numbers<[1], [0], [0], [1], [0, 0, 1, 1], [], []>} : vector<32x64xf32>, vector<64x64xf32>, vector<32x64xf32> -> vector<32x64xf32>
    %c7_153 = arith.constant 7 : index
    %c0_154 = arith.constant 0 : index
    %c0_155 = arith.constant 0 : index
    %145 = vector.load %arg16[%c7_153, %c0_154, %c0_155] : memref<9x64x64xf32, #tpu.memory_space<vmem>>, vector<1x64x64xf32>
    %146 = vector.shape_cast %145 : vector<1x64x64xf32> to vector<64x64xf32>
    %cst_156 = arith.constant dense<0.000000e+00> : vector<32x64xf32>
    %147 = tpu.matmul %123, %146, %cst_156 {dimension_numbers = #tpu.dot_dimension_numbers<[1], [0], [0], [1], [0, 0, 1, 1], [], []>} : vector<32x64xf32>, vector<64x64xf32>, vector<32x64xf32> -> vector<32x64xf32>
    %c8_157 = arith.constant 8 : index
    %c0_158 = arith.constant 0 : index
    %c0_159 = arith.constant 0 : index
    %148 = vector.load %arg16[%c8_157, %c0_158, %c0_159] : memref<9x64x64xf32, #tpu.memory_space<vmem>>, vector<1x64x64xf32>
    %149 = vector.shape_cast %148 : vector<1x64x64xf32> to vector<64x64xf32>
    %cst_160 = arith.constant dense<0.000000e+00> : vector<32x64xf32>
    %150 = tpu.matmul %123, %149, %cst_160 {dimension_numbers = #tpu.dot_dimension_numbers<[1], [0], [0], [1], [0, 0, 1, 1], [], []>} : vector<32x64xf32>, vector<64x64xf32>, vector<32x64xf32> -> vector<32x64xf32>
    %151 = tpu.concatenate %126, %129, %132, %135, %138, %141, %144, %147, %150 in 0 : vector<32x64xf32>, vector<32x64xf32>, vector<32x64xf32>, vector<32x64xf32>, vector<32x64xf32>, vector<32x64xf32>, vector<32x64xf32>, vector<32x64xf32>, vector<32x64xf32> -> vector<288x64xf32>
    %c0_161 = arith.constant 0 : index
    %c0_162 = arith.constant 0 : index
    %152 = vector.load %arg11[%c0_161, %c0_162] : memref<16x288xf32, #tpu.memory_space<vmem>>, vector<16x288xf32>
    %cst_163 = arith.constant dense<0.000000e+00> : vector<16x64xf32>
    %153 = tpu.matmul %152, %151, %cst_163 {dimension_numbers = #tpu.dot_dimension_numbers<[1], [0], [0], [1], [0, 0, 1, 1], [], []>} : vector<16x288xf32>, vector<288x64xf32>, vector<16x64xf32> -> vector<16x64xf32>
    %c0_164 = arith.constant 0 : index
    %c0_165 = arith.constant 0 : index
    %154 = vector.load %arg12[%c0_164, %c0_165] : memref<16x1xf32, #tpu.memory_space<vmem>>, vector<16x1xf32>
    %155 = vector.broadcast %154 : vector<16x1xf32> to vector<16x64xf32>
    %156 = arith.mulf %153, %155 : vector<16x64xf32>
    %c0_166 = arith.constant 0 : index
    %c0_167 = arith.constant 0 : index
    %157 = vector.load %arg13[%c0_166, %c0_167] : memref<16x1xf32, #tpu.memory_space<vmem>>, vector<16x1xf32>
    %158 = vector.broadcast %157 : vector<16x1xf32> to vector<16x64xf32>
    %159 = arith.addf %156, %158 : vector<16x64xf32>
    %cst_168 = arith.constant 0.000000e+00 : f32
    %160 = vector.broadcast %cst_168 : f32 to vector<16x64xf32>
    %161 = arith.maximumf %159, %160 : vector<16x64xf32>
    %c0_169 = arith.constant 0 : index
    %c0_170 = arith.constant 0 : index
    %c0_171 = arith.constant 0 : index
    %162 = vector.load %arg17[%c0_169, %c0_170, %c0_171] : memref<1x16x64xf32, #tpu.memory_space<vmem>>, vector<1x16x64xf32>
    %163 = vector.shape_cast %162 : vector<1x16x64xf32> to vector<16x64xf32>
    %164 = vector.shape_cast %161 : vector<16x64xf32> to vector<1x16x64xf32>
    tpu.vector_store %arg17[%c0_169, %c0_170, %c0_171], %164 {strides = array<i32>} : memref<1x16x64xf32, #tpu.memory_space<vmem>>, vector<1x16x64xf32>,
    return
  }
  func.func @transform_0(%arg0: i32) -> (i32, i32, i32) {
    %c0_i32 = arith.constant 0 : i32
    %c0_i32_0 = arith.constant 0 : i32
    %c0_i32_1 = arith.constant 0 : i32
    return %arg0, %c0_i32, %c0_i32_0 : i32, i32, i32
  }
  func.func @transform_1(%arg0: i32) -> (i32, i32) {
    %c0_i32 = arith.constant 0 : i32
    %c0_i32_0 = arith.constant 0 : i32
    %c0_i32_1 = arith.constant 0 : i32
    return %c0_i32, %c0_i32_0 : i32, i32
  }
  func.func @transform_2(%arg0: i32) -> (i32, i32) {
    %c0_i32 = arith.constant 0 : i32
    %c0_i32_0 = arith.constant 0 : i32
    %c0_i32_1 = arith.constant 0 : i32
    return %c0_i32, %c0_i32_0 : i32, i32
  }
  func.func @transform_3(%arg0: i32) -> (i32, i32) {
    %c0_i32 = arith.constant 0 : i32
    %c0_i32_0 = arith.constant 0 : i32
    %c0_i32_1 = arith.constant 0 : i32
    return %c0_i32, %c0_i32_0 : i32, i32
  }
  func.func @transform_4(%arg0: i32) -> (i32, i32) {
    %c0_i32 = arith.constant 0 : i32
    %c0_i32_0 = arith.constant 0 : i32
    %c0_i32_1 = arith.constant 0 : i32
    return %c0_i32, %c0_i32_0 : i32, i32
  }
  func.func @transform_5(%arg0: i32) -> (i32, i32) {
    %c0_i32 = arith.constant 0 : i32
    %c0_i32_0 = arith.constant 0 : i32
    %c0_i32_1 = arith.constant 0 : i32
    return %c0_i32, %c0_i32_0 : i32, i32
  }
  func.func @transform_6(%arg0: i32) -> (i32, i32) {
    %c0_i32 = arith.constant 0 : i32
    %c0_i32_0 = arith.constant 0 : i32
    %c0_i32_1 = arith.constant 0 : i32
    return %c0_i32, %c0_i32_0 : i32, i32
  }
  func.func @transform_7(%arg0: i32) -> (i32, i32) {
    %c0_i32 = arith.constant 0 : i32
    %c0_i32_0 = arith.constant 0 : i32
    %c0_i32_1 = arith.constant 0 : i32
    return %c0_i32, %c0_i32_0 : i32, i32
  }
  func.func @transform_8(%arg0: i32) -> (i32, i32) {
    %c0_i32 = arith.constant 0 : i32
    %c0_i32_0 = arith.constant 0 : i32
    %c0_i32_1 = arith.constant 0 : i32
    return %c0_i32, %c0_i32_0 : i32, i32
  }
  func.func @transform_9(%arg0: i32) -> (i32, i32) {
    %c0_i32 = arith.constant 0 : i32
    %c0_i32_0 = arith.constant 0 : i32
    %c0_i32_1 = arith.constant 0 : i32
    return %c0_i32, %c0_i32_0 : i32, i32
  }
  func.func @transform_10(%arg0: i32) -> (i32, i32) {
    %c0_i32 = arith.constant 0 : i32
    %c0_i32_0 = arith.constant 0 : i32
    %c0_i32_1 = arith.constant 0 : i32
    return %c0_i32, %c0_i32_0 : i32, i32
  }
  func.func @transform_11(%arg0: i32) -> (i32, i32) {
    %c0_i32 = arith.constant 0 : i32
    %c0_i32_0 = arith.constant 0 : i32
    %c0_i32_1 = arith.constant 0 : i32
    return %c0_i32, %c0_i32_0 : i32, i32
  }
  func.func @transform_12(%arg0: i32) -> (i32, i32) {
    %c0_i32 = arith.constant 0 : i32
    %c0_i32_0 = arith.constant 0 : i32
    %c0_i32_1 = arith.constant 0 : i32
    return %c0_i32, %c0_i32_0 : i32, i32
  }
  func.func @transform_13(%arg0: i32) -> (i32, i32, i32) {
    %c0_i32 = arith.constant 0 : i32
    %c0_i32_0 = arith.constant 0 : i32
    %c0_i32_1 = arith.constant 0 : i32
    %c0_i32_2 = arith.constant 0 : i32
    return %c0_i32, %c0_i32_0, %c0_i32_1 : i32, i32, i32
  }
  func.func @transform_14(%arg0: i32) -> (i32, i32, i32) {
    %c0_i32 = arith.constant 0 : i32
    %c0_i32_0 = arith.constant 0 : i32
    %c0_i32_1 = arith.constant 0 : i32
    %c0_i32_2 = arith.constant 0 : i32
    return %c0_i32, %c0_i32_0, %c0_i32_1 : i32, i32, i32
  }
  func.func @transform_15(%arg0: i32) -> (i32, i32, i32) {
    %c0_i32 = arith.constant 0 : i32
    %c0_i32_0 = arith.constant 0 : i32
    %c0_i32_1 = arith.constant 0 : i32
    %c0_i32_2 = arith.constant 0 : i32
    return %c0_i32, %c0_i32_0, %c0_i32_1 : i32, i32, i32
  }
  func.func @transform_16(%arg0: i32) -> (i32, i32, i32) {
    %c0_i32 = arith.constant 0 : i32
    %c0_i32_0 = arith.constant 0 : i32
    %c0_i32_1 = arith.constant 0 : i32
    return %arg0, %c0_i32, %c0_i32_0 : i32, i32, i32
  }
}

</mosaic_0001>

<bundles_post_ra>
// kernel: tpu_custom_call.1
= control target key start
LH: loop header
LB: loop body
LE: loop exit
PB: predicated region body
PF: predicated region fallthrough
CT: control target
= control target key end

     0   :  { %s7244_s0 = inlined_call_operand.hbm [shape: f32[2,8,256], index: 0, kind: input, shape index: {}]   ;;  %s7245_s1 = inlined_call_operand.hbm [shape: f32[16,72], index: 1, kind: input, shape index: {}]   ;;  %s7246_s2 = inlined_call_operand.vmem [shape: f32[16,1], index: 2, kind: input, shape index: {}]   ;;  %s7247_s3 = inlined_call_operand.vmem [shape: f32[16,1], index: 3, kind: input, shape index: {}]   ;;  %s7248_s4 = inlined_call_operand.hbm [shape: f32[8,16], index: 4, kind: input, shape index: {}]   ;;  %s7249_s5 = inlined_call_operand.vmem [shape: f32[8,1], index: 5, kind: input, shape index: {}]   ;;  %s7250_s6 = inlined_call_operand.vmem [shape: f32[8,1], index: 6, kind: input, shape index: {}]   ;;  %s7251_s7 = inlined_call_operand.hbm [shape: f32[16,72], index: 7, kind: input, shape index: {}]   ;;  %s7252_s8 = inlined_call_operand.vmem [shape: f32[16,1], index: 8, kind: input, shape index: {}]   ;;  %s7253_s9 = inlined_call_operand.vmem [shape: f32[16,1], index: 9, kind: input, shape index: {}]   ;;  %s7254_s10 = inlined_call_operand.hbm [shape: f32[16,288], index: 10, kind: input, shape index: {}]   ;;  %s7255_s11 = inlined_call_operand.vmem [shape: f32[16,1], index: 11, kind: input, shape index: {}]   ;;  %s7256_s12 = inlined_call_operand.vmem [shape: f32[16,1], index: 12, kind: input, shape index: {}]   ;;  %s7257_s13 = inlined_call_operand.hbm [shape: f32[9,256,256], index: 13, kind: input, shape index: {}]   ;;  %s7258_s14 = inlined_call_operand.vmem [shape: f32[9,256,64], index: 14, kind: input, shape index: {}]   ;;  %s7259_s15 = inlined_call_operand.hbm [shape: f32[9,64,64], index: 15, kind: input, shape index: {}]   ;;  %s7260_s16 = inlined_call_operand.hbm [shape: f32[2,16,64], index: 16, kind: output, shape index: {}]  }
   0x1   :  { %7380 = sst [smem:[#allocation135_spill]] %s7244_s0 }
   0x2   :  { %7381 = sst [smem:[#allocation136_spill]] %s7245_s1 }
   0x3   :  { %7382 = sst [smem:[#allocation137_spill]] %s7248_s4 }
   0x4   :  { %7383 = sst [smem:[#allocation138_spill]] %s7249_s5 }
   0x5   :  { %7384 = sst [smem:[#allocation139_spill]] %s7250_s6 }
   0x6   :  { %7385 = sst [smem:[#allocation140_spill]] %s7251_s7 }
   0x7   :  { %7386 = sst [smem:[#allocation141_spill]] %s7254_s10 }
   0x8   :  { %7387 = sst [smem:[#allocation142_spill]] %s7256_s12 }
   0x9   :  { %7388 = sst [smem:[#allocation143_spill]] %s7257_s13 }
   0xa   :  { %7389 = sst [smem:[#allocation144_spill]] %s7258_s14 }
   0xb   :  { %7390 = sst [smem:[#allocation145_spill]] %s7259_s15 }
   0xc   :  { %7391 = sst [smem:[#allocation146_spill]] %s7260_s16 }
   0xd   :  { %21 = vsyncpa [#allocation3], 0 }
   0xe   :  { %23 = vsyncpa [#allocation3 + $0x1], 0 }
   0xf   :  { %24 = vsyncpa [#allocation6], 0 }
  0x10   :  { %25 = vsyncpa [#allocation9], 0 }
  0x11   :  { %26 = vsyncpa [#allocation12], 0 }
  0x12   :  { %27 = vsyncpa [#allocation4], 0 }
  0x13   :  { %29 = vsyncpa [#allocation4 + $0x1], 0  ;;  %s4806_s21 = smov 0   ;;  %s4808_s22 = smov 0  }
  0x14   :  { %s4810_s23 = smov 0   ;;  %s4812_s24 = smov 0  }
  0x15 LB: > { %s7392_s1 = sld [smem:[#allocation136_spill]]  ;;  %s4830_s28 = sadd.s32 4294967295, %s4704_s24   ;;  %s4704_s24 = sphi %s4812_s24, %s7645_s24   ;;  %s4700_s23 = sphi %s4810_s23, %s7644_s23   ;;  %s4696_s22 = sphi %s4808_s22, %s7643_s22   ;;  %s4692_s21 = sphi %s4806_s21, %s7642_s21  }
  0x16   : > { %p3859_p0 = scmp.ge.s32.totalorder %s4704_s24, 1  ;;  %p56_p1 = scmp.eq.s32.totalorder %s4830_s28, 0 }
  0x17   : > { %p407_p2 = scmp.lt.s32.totalorder %s4704_s24, 3  ;;  %s4706_s30 = smov [#allocation5]  }
  0x18   : > { %s420_s0 = sshll.u32 %s4706_s30, 4  ;;  %s7394_s7 = sld [smem:[#allocation140_spill]]  ;;  %s421_s0 = int_to_ptr.vmem [resolvable:$true] %s420_s0 }
  0x19   : > { %p4835_p3 = pnand %p3859_p0, %p407_p2  ;;  %s7396_s13 = sld [smem:[#allocation143_spill]] }
  0x1a   : > { %s4708_s6 = smov 128   ;;  %s4709_s14 = smov 8  }
  0x1b   : > { %s418_s27 = sshll.u32 %s7392_s1, 4  ;;  %p4216_p4 = pneg %p4835_p3  ;;  %s419_s27 = int_to_ptr.hbm [resolvable:$true] %s418_s27 }
  0x1c   : > { %s4707_s1 = smov [#allocation8]   ;;  %s4710_s17 = smov [#allocation11]  }
  0x1d   : > { %p4847_p6 = pnand %p4216_p4, %p56_p1  ;;  %s458_s16 = sshll.u32 %s4707_s1, 4  ;;  %s459_s16 = int_to_ptr.vmem [resolvable:$true] %s458_s16 }
  0x1e   : > { %s456_s19 = sshll.u32 %s7394_s7, 4  ;;  %s498_s18 = sshll.u32 %s4710_s17, 4  ;;  %s457_s19 = int_to_ptr.hbm [resolvable:$true] %s456_s19  ;;  %s499_s18 = int_to_ptr.vmem [resolvable:$true] %s498_s18 }
  0x1f   : > { %s496_s30 = sshll.u32 %s7396_s13, 4  ;;  %s7397_s4 = sld [smem:[#allocation137_spill]]  ;;  %s497_s30 = int_to_ptr.hbm [resolvable:$true] %s496_s30 }
  0x20   : > { %4219 = dma.hbm_to_vmem [thread:$0]  (!%p4847_p6), %s419_s27, 256, %s421_s0, [#allocation6], %s4708_s6, %s4708_s6, %s4709_s14  }
  0x21   : > { %4225 = dma.hbm_to_vmem [thread:$0]  (!%p4847_p6), %s457_s19, 256, %s459_s16, [#allocation9], %s4708_s6, %s4708_s6, %s4709_s14  }
  0x22   : > { %s4711_s7 = smov 256   ;;  %s4712_s13 = smov 16  }
  0x23   : > { %4231 = dma.hbm_to_vmem [thread:$0]  (!%p4847_p6), %s497_s30, 73728, %s499_s18, [#allocation12], %s4711_s7, %s4711_s7, %s4712_s13  }
  0x24   : > { %s4713_s27 = smov [#allocation7]   ;;  %s7398_s10 = sld [smem:[#allocation141_spill]] }
  0x25   : > { %s439_s26 = sshll.u32 %s7397_s4, 4  ;;  %s441_s0 = sshll.u32 %s4713_s27, 4  ;;  %s440_s26 = int_to_ptr.hbm [resolvable:$true] %s439_s26  ;;  %s442_s0 = int_to_ptr.vmem [resolvable:$true] %s441_s0 }
  0x26   : > { %4222 = dma.hbm_to_vmem [thread:$0]  (!%p4847_p6), %s440_s26, 128, %s442_s0, [#allocation6]  }
  0x27   : > { %s4714_s19 = smov [#allocation10]   ;;  %s7399_s15 = sld [smem:[#allocation145_spill]] }
  0x28   : > { %s478_s17 = sshll.u32 %s4714_s19, 4  ;;  %s4715_s12 = smov 384   ;;  %s479_s17 = int_to_ptr.vmem [resolvable:$true] %s478_s17 }
  0x29   : > { %s4716_s30 = smov 24   ;;  %s4717_s18 = smov [#allocation13]  }
  0x2a   : > { %s476_s16 = sshll.u32 %s7398_s10, 4  ;;  %s515_s25 = sshll.u32 %s4717_s18, 4  ;;  %s477_s16 = int_to_ptr.hbm [resolvable:$true] %s476_s16  ;;  %s516_s25 = int_to_ptr.vmem [resolvable:$true] %s515_s25 }
  0x2b   : > { %4228 = dma.hbm_to_vmem [thread:$0]  (!%p4847_p6), %s477_s16, 768, %s479_s17, [#allocation9], %s4715_s12, %s4715_s12, %s4716_s30  }
  0x2c   : > { %s3858_s1 = sadd.s32 4294967294, %s4704_s24   ;;  %s4886_s26 = sadd.s32 1, %s4704_s24  }
  0x2d   : > { %s513_s5 = sshll.u32 %s7399_s15, 4  ;;  %s39_s27 = ssub.s32 %s4704_s24, %s4886_s26  ;;  %s514_s5 = int_to_ptr.hbm [resolvable:$true] %s513_s5 }
  0x2e   : > { %4234 = dma.hbm_to_vmem [thread:$0]  (!%p4847_p6), %s514_s5, 9216, %s516_s25, [#allocation12], %s4708_s6, %s4708_s6, %s4709_s14  }
  0x2f   : > { %s42_s0 = sadd.s32 1, %s4700_s23  ;;  %p40_p7 = scmp.eq.s32.totalorder %s39_s27, 0 }
  0x30   : > { %p49_p8 = scmp.ne.s32.totalorder %s4700_s23, %s4696_s22  ;;  %p50_p9 = scmp.eq.s32.totalorder %s4704_s24, 0 }
  0x31   : > { %p55_p10 = scmp.ne.s32.totalorder %s4696_s22, %s4692_s21  ;;  %p394_p13 = scmp.eq.s32.totalorder %s4830_s28, 1 }
  0x32   : > { %s4897_s16 = scalar_select %p40_p7, %s4700_s23, %s42_s0  }
  0x33   : > { %p4899_p11 = por %p50_p9, %p49_p8  ;;  %p4905_p12 = por %p56_p1, %p55_p10 }
  0x34   : > { %p400_p0 = scmp.eq.s32.totalorder %s3858_s1, 1  ;;  %p4249_p2 = scmp.lt.s32.totalorder %s4704_s24, 2 }
  0x35   : > { %s529_s14 = sand.u32 1, %s4700_s23   ;;  %p4912_p4 = por %p394_p13, %p49_p8 }
  0x36   : > { %p4916_p6 = por %p400_p0, %p55_p10  ;;  %s3867_s7 = sshll.u32 %s529_s14, 4 }
  0x37   : > { %s4186_s13 = sshll.u32 %s4704_s24, 4  ;;  %s7404_s30 = sld [smem:[#allocation135_spill]] }
  0x38   : > { %s533_s25 = scalar_lea.vmem [#allocation2], %s3867_s7  ;;  %p4926_p7 = pnand %p4249_p2, %p4899_p11 }
  0x39   : > { %s542_s27 = sshll.u32 %s533_s25, 4  ;;  %s530_s4 = scalar_lea.sflag [#allocation3], %s529_s14  ;;  %s543_s27 = int_to_ptr.vmem [resolvable:$true] %s542_s27 }
  0x3a   : > { %p4600_p9 = pneg %p4926_p7 }
  0x3d   : > { %s538_s18 = scalar_lea.hbm %s7404_s30, %s4186_s13  ;;  %s4603_s5 = scalar_lea.hbm %s7404_s30, 32 }
  0x3e   : > { %s540_s0 = sshll.u32 %s538_s18, 4  ;;  %s541_s0 = int_to_ptr.hbm [resolvable:$true] %s540_s0 }
  0x3f   : > { %s4596_s10 = sshra.s32 %s541_s0, 4  ;;  %s4597_s10 = int_to_ptr.hbm [resolvable:$true] %s4596_s10 }
  0x40   : > { %s4598_s15 = scalar_lea.hbm %s4597_s10, 16  ;;  %p4604_p11 = scmp.lt.s32.totalorder %s4597_s10, %s7404_s30 }
  0x41   : > { %p4599_p8 = scmp.ne.s32.totalorder %s4597_s10, %s4598_s15  ;;  %p4605_p0 = scmp.lt.s32.totalorder %s4603_s5, %s4598_s15 }
  0x43   : > { %p4601_p10 = pnand %p4600_p9, %p4599_p8  ;;  %p4606_p2 = por %p4605_p0, %p4604_p11 }
  0x45   : > { %p4602_p13 = pneg %p4601_p10 }
  0x47   : > { %p4607_p5 = pnand %p4606_p2, %p4602_p13 }
  0x49   : > { %4610 = shalt.err (!%p4607_p5)
}
  0x4a   : > { %4238 = dma.hbm_to_vmem [thread:$0]  (!%p4926_p7), %s541_s0, 256, %s543_s27, %s530_s4  }
  0x4b   : > { %551 = sbr.rel (%p4835_p3) target bundleno = 1749 (0x6d5), region = 84 }
  0x50   : > { %s4943_s14 = sand.u32 1, %s4696_s22  }
  0x51   : > { %s3871_s18 = sshll.u32 %s4943_s14, 4  ;;  %s554_s25 = scalar_lea.sflag [#allocation3], %s4943_s14 }
  0x52   : > { %s4949_s10 = scalar_lea.vmem [#allocation2], %s3871_s18 }
  0x53   : > { %4671 = dma.done.wait (%p4905_p12), %s554_s25, 256  }
  0x54   : > { %4673 = vsyncadd (%p4905_p12), %s554_s25, 4294967040 }
  0x55   : > { %4675 = dma.done.wait (%p56_p1), [#allocation6], 384  }
  0x56   : > { %4677 = vsyncadd (%p56_p1), [#allocation6], 4294966912 }
  0x57   : > { %4679 = dma.done.wait (%p56_p1), [#allocation9], 1024  }
  0x58   : > { %4681 = vsyncadd (%p56_p1), [#allocation9], 4294966272 }
  0x59   : > { %4683 = dma.done.wait (%p56_p1), [#allocation12], 82944  }
  0x5a   : > { %4685 = vsyncadd (%p56_p1), [#allocation12], 4294884352  ;;  %v669_v0 = vld [vmem:[#allocation11 + $0xf0] sm:$0xff]  ;;  %v670_v2 = vld [vmem:[#allocation11 + $0xf8] sm:$0xff]  ;;  %s7406_s27 = sld [smem:[#allocation142_spill]]  ;;  %vm1945_vm0 = vcmask 588800  }
  0x5b   : > { %v701_v1 = vld [vmem:[#allocation11 + $0x1f0] sm:$0xff]  ;;  %703 = vmatpush.msra.mxu0 %v669_v0  ;;  %v702_v3 = vld [vmem:[#allocation11 + $0x1f8] sm:$0xff]  ;;  %v667_v4 = vld [vmem:[#allocation11 + $0xe0] sm:$0xff]  ;;  %743 = vmatpush.msra.mxu2 %v670_v2  ;;  %s7407_s5 = sld [smem:[#allocation138_spill]]  ;;  %vm2035_vm1 = vcmask 130048   ;;  %vm3252_vm2 = vcmask 523264  }
  0x5c   : > { %723 = vmatpush.msra.mxu1 %v701_v1  ;;  %v699_v5 = vld [vmem:[#allocation11 + $0x1e0] sm:$0xff]  ;;  %763 = vmatpush.msra.mxu3 %v702_v3  ;;  %v668_v6 = vld [vmem:[#allocation11 + $0xe8] sm:$0xff]  ;;  %v665_v8 = vld [vmem:[#allocation11 + $0xd0] sm:$0xff]  ;;  %s7408_s25 = sld [smem:[#allocation144_spill]]  ;;  %vm3604_vm3 = vcmask 261120   ;;  %s4187_s29 = sshll.u32 %s4830_s28, 4 }
  0x5d   : > { %v700_v7 = vld [vmem:[#allocation11 + $0x1e8] sm:$0xff]  ;;  %704 = vmatpush.msra.mxu0 %v667_v4  ;;  %v697_v9 = vld [vmem:[#allocation11 + $0x1d0] sm:$0xff]  ;;  %v666_v10 = vld [vmem:[#allocation11 + $0xd8] sm:$0xff]  ;;  %744 = vmatpush.msra.mxu2 %v668_v6  ;;  %s7640_s1 = sld [smem:[#allocation146_spill]]  ;;  %s636_s13 = scalar_lea.vmem [#allocation14], %s3871_s18 }
  0x5e   : > { %724 = vmatpush.msra.mxu1 %v699_v5  ;;  %v698_v11 = vld [vmem:[#allocation11 + $0x1d8] sm:$0xff]  ;;  %764 = vmatpush.msra.mxu3 %v700_v7  ;;  %v663_v12 = vld [vmem:[#allocation11 + $0xc0] sm:$0xff]  ;;  %v664_v14 = vld [vmem:[#allocation11 + $0xc8] sm:$0xff]  ;;  %s3713_s28 = scalar_lea.sflag [#allocation4], %s4943_s14 }
  0x5f   : > { %v695_v13 = vld [vmem:[#allocation11 + $0x1c0] sm:$0xff]  ;;  %705 = vmatpush.msra.mxu0 %v665_v8  ;;  %v696_v15 = vld [vmem:[#allocation11 + $0x1c8] sm:$0xff]  ;;  %745 = vmatpush.msra.mxu2 %v666_v10  ;;  %v661_v16 = vld [vmem:[#allocation11 + $0xb0] sm:$0xff] }
  0x60   : > { %725 = vmatpush.msra.mxu1 %v697_v9  ;;  %765 = vmatpush.msra.mxu3 %v698_v11  ;;  %v693_v17 = vld [vmem:[#allocation11 + $0x1b0] sm:$0xff]  ;;  %v662_v18 = vld [vmem:[#allocation11 + $0xb8] sm:$0xff]  ;;  %v659_v20 = vld [vmem:[#allocation11 + $0xa0] sm:$0xff] }
  0x61   : > { %706 = vmatpush.msra.mxu0 %v663_v12  ;;  %v694_v19 = vld [vmem:[#allocation11 + $0x1b8] sm:$0xff]  ;;  %746 = vmatpush.msra.mxu2 %v664_v14  ;;  %v691_v21 = vld [vmem:[#allocation11 + $0x1a0] sm:$0xff]  ;;  %v660_v22 = vld [vmem:[#allocation11 + $0xa8] sm:$0xff] }
  0x62   : > { %726 = vmatpush.msra.mxu1 %v695_v13  ;;  %766 = vmatpush.msra.mxu3 %v696_v15  ;;  %v692_v23 = vld [vmem:[#allocation11 + $0x1a8] sm:$0xff]  ;;  %v657_v24 = vld [vmem:[#allocation11 + $0x90] sm:$0xff]  ;;  %v658_v26 = vld [vmem:[#allocation11 + $0x98] sm:$0xff] }
  0x63   : > { %707 = vmatpush.msra.mxu0 %v661_v16  ;;  %747 = vmatpush.msra.mxu2 %v662_v18  ;;  %v689_v25 = vld [vmem:[#allocation11 + $0x190] sm:$0xff]  ;;  %v690_v27 = vld [vmem:[#allocation11 + $0x198] sm:$0xff]  ;;  %v655_v28 = vld [vmem:[#allocation11 + $0x80] sm:$0xff]  ;;  %s3724_s7 = scalar_lea.hbm %s7640_s1, %s4187_s29  ;;  %s4646_s15 = scalar_lea.hbm %s7640_s1, 32 }
  0x64   : > { %727 = vmatpush.msra.mxu1 %v693_v17  ;;  %767 = vmatpush.msra.mxu3 %v694_v19  ;;  %v687_v29 = vld [vmem:[#allocation11 + $0x180] sm:$0xff]  ;;  %v656_v30 = vld [vmem:[#allocation11 + $0x88] sm:$0xff]  ;;  %v653_v32 = vld [vmem:[#allocation11 + $0x70] sm:$0xff]  ;;  %s3727_s12 = sshll.u32 %s3724_s7, 4  ;;  %s3728_s12 = int_to_ptr.hbm [resolvable:$true] %s3727_s12 }
  0x65   : > { %708 = vmatpush.msra.mxu0 %v659_v20  ;;  %748 = vmatpush.msra.mxu2 %v660_v22  ;;  %v688_v31 = vld [vmem:[#allocation11 + $0x188] sm:$0xff]  ;;  %v685_v33 = vld [vmem:[#allocation11 + $0x170] sm:$0xff]  ;;  %v654_v34 = vld [vmem:[#allocation11 + $0x78] sm:$0xff]  ;;  %s4640_s20 = sshra.s32 %s3728_s12, 4  ;;  %s4641_s20 = int_to_ptr.hbm [resolvable:$true] %s4640_s20 }
  0x66   : > { %728 = vmatpush.msra.mxu1 %v691_v21  ;;  %768 = vmatpush.msra.mxu3 %v692_v23  ;;  %v686_v35 = vld [vmem:[#allocation11 + $0x178] sm:$0xff]  ;;  %v651_v36 = vld [vmem:[#allocation11 + $0x60] sm:$0xff]  ;;  %v652_v38 = vld [vmem:[#allocation11 + $0x68] sm:$0xff]  ;;  %p4647_p12 = scmp.lt.s32.totalorder %s4641_s20, %s7640_s1 }
  0x67   : > { %709 = vmatpush.msra.mxu0 %v657_v24  ;;  %749 = vmatpush.msra.mxu2 %v658_v26  ;;  %v683_v37 = vld [vmem:[#allocation11 + $0x160] sm:$0xff]  ;;  %v684_v39 = vld [vmem:[#allocation11 + $0x168] sm:$0xff]  ;;  %v649_v40 = vld [vmem:[#allocation11 + $0x50] sm:$0xff] }
  0x68   : > { %729 = vmatpush.msra.mxu1 %v689_v25  ;;  %769 = vmatpush.msra.mxu3 %v690_v27  ;;  %v681_v41 = vld [vmem:[#allocation11 + $0x150] sm:$0xff]  ;;  %v650_v42 = vld [vmem:[#allocation11 + $0x58] sm:$0xff]  ;;  %v647_v44 = vld [vmem:[#allocation11 + $0x40] sm:$0xff] }
  0x69   : > { %710 = vmatpush.msra.mxu0 %v655_v28  ;;  %750 = vmatpush.msra.mxu2 %v656_v30  ;;  %v682_v43 = vld [vmem:[#allocation11 + $0x158] sm:$0xff]  ;;  %v679_v45 = vld [vmem:[#allocation11 + $0x140] sm:$0xff]  ;;  %v648_v46 = vld [vmem:[#allocation11 + $0x48] sm:$0xff] }
  0x6a   : > { %730 = vmatpush.msra.mxu1 %v687_v29  ;;  %770 = vmatpush.msra.mxu3 %v688_v31  ;;  %v680_v47 = vld [vmem:[#allocation11 + $0x148] sm:$0xff]  ;;  %v645_v48 = vld [vmem:[#allocation11 + $0x30] sm:$0xff]  ;;  %v646_v50 = vld [vmem:[#allocation11 + $0x38] sm:$0xff] }
  0x6b   : > { %711 = vmatpush.msra.mxu0 %v653_v32  ;;  %751 = vmatpush.msra.mxu2 %v654_v34  ;;  %v677_v49 = vld [vmem:[#allocation11 + $0x130] sm:$0xff]  ;;  %v678_v51 = vld [vmem:[#allocation11 + $0x138] sm:$0xff]  ;;  %v643_v52 = vld [vmem:[#allocation11 + $0x20] sm:$0xff] }
  0x6c   : > { %731 = vmatpush.msra.mxu1 %v685_v33  ;;  %771 = vmatpush.msra.mxu3 %v686_v35  ;;  %v675_v53 = vld [vmem:[#allocation11 + $0x120] sm:$0xff]  ;;  %v644_v54 = vld [vmem:[#allocation11 + $0x28] sm:$0xff]  ;;  %v641_v56 = vld [vmem:[#allocation11 + $0x10] sm:$0xff] }
  0x6d   : > { %712 = vmatpush.msra.mxu0 %v651_v36  ;;  %752 = vmatpush.msra.mxu2 %v652_v38  ;;  %v676_v55 = vld [vmem:[#allocation11 + $0x128] sm:$0xff]  ;;  %v673_v57 = vld [vmem:[#allocation11 + $0x110] sm:$0xff]  ;;  %v642_v58 = vld [vmem:[#allocation11 + $0x18] sm:$0xff] }
  0x6e   : > { %732 = vmatpush.msra.mxu1 %v683_v37  ;;  %772 = vmatpush.msra.mxu3 %v684_v39  ;;  %v674_v59 = vld [vmem:[#allocation11 + $0x118] sm:$0xff]  ;;  %v639_v60 = vld [vmem:[#allocation11] sm:$0xff]  ;;  %v640_v62 = vld [vmem:[#allocation11 + $0x8] sm:$0xff] }
  0x6f   : > { %713 = vmatpush.msra.mxu0 %v649_v40  ;;  %753 = vmatpush.msra.mxu2 %v650_v42  ;;  %v671_v61 = vld [vmem:[#allocation11 + $0x100] sm:$0xff]  ;;  %v672_v63 = vld [vmem:[#allocation11 + $0x108] sm:$0xff]  ;;  %v814_v0 = vld [vmem:[#allocation11 + $0x2f0] sm:$0xff] }
  0x70   : > { %733 = vmatpush.msra.mxu1 %v681_v41  ;;  %773 = vmatpush.msra.mxu3 %v682_v43  ;;  %v846_v1 = vld [vmem:[#allocation11 + $0x3f0] sm:$0xff]  ;;  %v815_v2 = vld [vmem:[#allocation11 + $0x2f8] sm:$0xff]  ;;  %v812_v4 = vld [vmem:[#allocation11 + $0x2e0] sm:$0xff] }
  0x71   : > { %714 = vmatpush.msra.mxu0 %v647_v44  ;;  %754 = vmatpush.msra.mxu2 %v648_v46  ;;  %v847_v3 = vld [vmem:[#allocation11 + $0x3f8] sm:$0xff]  ;;  %v844_v5 = vld [vmem:[#allocation11 + $0x3e0] sm:$0xff]  ;;  %v813_v6 = vld [vmem:[#allocation11 + $0x2e8] sm:$0xff] }
  0x72   : > { %734 = vmatpush.msra.mxu1 %v679_v45  ;;  %774 = vmatpush.msra.mxu3 %v680_v47  ;;  %v845_v7 = vld [vmem:[#allocation11 + $0x3e8] sm:$0xff]  ;;  %v810_v8 = vld [vmem:[#allocation11 + $0x2d0] sm:$0xff]  ;;  %v811_v10 = vld [vmem:[#allocation11 + $0x2d8] sm:$0xff] }
  0x73   : > { %715 = vmatpush.msra.mxu0 %v645_v48  ;;  %755 = vmatpush.msra.mxu2 %v646_v50  ;;  %v842_v9 = vld [vmem:[#allocation11 + $0x3d0] sm:$0xff]  ;;  %v843_v11 = vld [vmem:[#allocation11 + $0x3d8] sm:$0xff]  ;;  %v808_v12 = vld [vmem:[#allocation11 + $0x2c0] sm:$0xff] }
  0x74   : > { %735 = vmatpush.msra.mxu1 %v677_v49  ;;  %775 = vmatpush.msra.mxu3 %v678_v51  ;;  %v840_v13 = vld [vmem:[#allocation11 + $0x3c0] sm:$0xff]  ;;  %v809_v14 = vld [vmem:[#allocation11 + $0x2c8] sm:$0xff]  ;;  %v806_v16 = vld [vmem:[#allocation11 + $0x2b0] sm:$0xff] }
  0x75   : > { %716 = vmatpush.msra.mxu0 %v643_v52  ;;  %756 = vmatpush.msra.mxu2 %v644_v54  ;;  %v841_v15 = vld [vmem:[#allocation11 + $0x3c8] sm:$0xff]  ;;  %v838_v17 = vld [vmem:[#allocation11 + $0x3b0] sm:$0xff]  ;;  %v807_v18 = vld [vmem:[#allocation11 + $0x2b8] sm:$0xff] }
  0x76   : > { %736 = vmatpush.msra.mxu1 %v675_v53  ;;  %776 = vmatpush.msra.mxu3 %v676_v55  ;;  %v839_v19 = vld [vmem:[#allocation11 + $0x3b8] sm:$0xff]  ;;  %v804_v20 = vld [vmem:[#allocation11 + $0x2a0] sm:$0xff]  ;;  %v805_v22 = vld [vmem:[#allocation11 + $0x2a8] sm:$0xff] }
  0x77   : > { %717 = vmatpush.msra.mxu0 %v641_v56  ;;  %757 = vmatpush.msra.mxu2 %v642_v58  ;;  %v836_v21 = vld [vmem:[#allocation11 + $0x3a0] sm:$0xff]  ;;  %v837_v23 = vld [vmem:[#allocation11 + $0x3a8] sm:$0xff]  ;;  %v802_v24 = vld [vmem:[#allocation11 + $0x290] sm:$0xff] }
  0x78   : > { %737 = vmatpush.msra.mxu1 %v673_v57  ;;  %777 = vmatpush.msra.mxu3 %v674_v59  ;;  %v834_v25 = vld [vmem:[#allocation11 + $0x390] sm:$0xff]  ;;  %v803_v26 = vld [vmem:[#allocation11 + $0x298] sm:$0xff]  ;;  %v800_v28 = vld [vmem:[#allocation11 + $0x280] sm:$0xff] }
  0x79   : > { %718 = vmatpush.msra.mxu0 %v639_v60  ;;  %758 = vmatpush.msra.mxu2 %v640_v62  ;;  %v835_v27 = vld [vmem:[#allocation11 + $0x398] sm:$0xff]  ;;  %v832_v29 = vld [vmem:[#allocation11 + $0x380] sm:$0xff]  ;;  %v801_v30 = vld [vmem:[#allocation11 + $0x288] sm:$0xff] }
  0x7a   : > { %738 = vmatpush.msra.mxu1 %v671_v61  ;;  %778 = vmatpush.msra.mxu3 %v672_v63  ;;  %v833_v31 = vld [vmem:[#allocation11 + $0x388] sm:$0xff]  ;;  %v798_v32 = vld [vmem:[#allocation11 + $0x270] sm:$0xff]  ;;  %v799_v34 = vld [vmem:[#allocation11 + $0x278] sm:$0xff] }
  0x7b   : > { %848 = vmatpush.msrb.mxu0 %v814_v0  ;;  %888 = vmatpush.msrb.mxu2 %v815_v2  ;;  %v830_v33 = vld [vmem:[#allocation11 + $0x370] sm:$0xff]  ;;  %v831_v35 = vld [vmem:[#allocation11 + $0x378] sm:$0xff]  ;;  %v796_v36 = vld [vmem:[#allocation11 + $0x260] sm:$0xff] }
  0x7c   : > { %868 = vmatpush.msrb.mxu1 %v846_v1  ;;  %908 = vmatpush.msrb.mxu3 %v847_v3  ;;  %v828_v37 = vld [vmem:[#allocation11 + $0x360] sm:$0xff]  ;;  %v797_v38 = vld [vmem:[#allocation11 + $0x268] sm:$0xff]  ;;  %v794_v40 = vld [vmem:[#allocation11 + $0x250] sm:$0xff] }
  0x7d   : > { %849 = vmatpush.msrb.mxu0 %v812_v4  ;;  %889 = vmatpush.msrb.mxu2 %v813_v6  ;;  %v829_v39 = vld [vmem:[#allocation11 + $0x368] sm:$0xff]  ;;  %v826_v41 = vld [vmem:[#allocation11 + $0x350] sm:$0xff]  ;;  %v795_v42 = vld [vmem:[#allocation11 + $0x258] sm:$0xff] }
  0x7e   : > { %869 = vmatpush.msrb.mxu1 %v844_v5  ;;  %909 = vmatpush.msrb.mxu3 %v845_v7  ;;  %v827_v43 = vld [vmem:[#allocation11 + $0x358] sm:$0xff]  ;;  %v792_v44 = vld [vmem:[#allocation11 + $0x240] sm:$0xff]  ;;  %v793_v46 = vld [vmem:[#allocation11 + $0x248] sm:$0xff] }
  0x7f   : > { %850 = vmatpush.msrb.mxu0 %v810_v8  ;;  %890 = vmatpush.msrb.mxu2 %v811_v10  ;;  %v824_v45 = vld [vmem:[#allocation11 + $0x340] sm:$0xff]  ;;  %v825_v47 = vld [vmem:[#allocation11 + $0x348] sm:$0xff]  ;;  %v790_v48 = vld [vmem:[#allocation11 + $0x230] sm:$0xff] }
  0x80   : > { %870 = vmatpush.msrb.mxu1 %v842_v9  ;;  %910 = vmatpush.msrb.mxu3 %v843_v11  ;;  %v822_v49 = vld [vmem:[#allocation11 + $0x330] sm:$0xff]  ;;  %v791_v50 = vld [vmem:[#allocation11 + $0x238] sm:$0xff]  ;;  %v788_v52 = vld [vmem:[#allocation11 + $0x220] sm:$0xff] }
  0x81   : > { %851 = vmatpush.msrb.mxu0 %v808_v12  ;;  %891 = vmatpush.msrb.mxu2 %v809_v14  ;;  %v823_v51 = vld [vmem:[#allocation11 + $0x338] sm:$0xff]  ;;  %v820_v53 = vld [vmem:[#allocation11 + $0x320] sm:$0xff]  ;;  %v789_v54 = vld [vmem:[#allocation11 + $0x228] sm:$0xff] }
  0x82   : > { %871 = vmatpush.msrb.mxu1 %v840_v13  ;;  %911 = vmatpush.msrb.mxu3 %v841_v15  ;;  %v821_v55 = vld [vmem:[#allocation11 + $0x328] sm:$0xff]  ;;  %v786_v56 = vld [vmem:[#allocation11 + $0x210] sm:$0xff]  ;;  %v787_v58 = vld [vmem:[#allocation11 + $0x218] sm:$0xff] }
  0x83   : > { %852 = vmatpush.msrb.mxu0 %v806_v16  ;;  %892 = vmatpush.msrb.mxu2 %v807_v18  ;;  %v818_v57 = vld [vmem:[#allocation11 + $0x310] sm:$0xff]  ;;  %v819_v59 = vld [vmem:[#allocation11 + $0x318] sm:$0xff]  ;;  %v784_v60 = vld [vmem:[#allocation11 + $0x200] sm:$0xff] }
  0x84   : > { %872 = vmatpush.msrb.mxu1 %v838_v17  ;;  %912 = vmatpush.msrb.mxu3 %v839_v19  ;;  %v816_v61 = vld [vmem:[#allocation11 + $0x300] sm:$0xff]  ;;  %v785_v62 = vld [vmem:[#allocation11 + $0x208] sm:$0xff]  ;;  %v959_v2 = vld [vmem:[#allocation11 + $0x4f0] sm:$0xff] }
  0x85   : > { %853 = vmatpush.msrb.mxu0 %v804_v20  ;;  %893 = vmatpush.msrb.mxu2 %v805_v22  ;;  %v817_v63 = vld [vmem:[#allocation11 + $0x308] sm:$0xff]  ;;  %v4971_v1 = vld [vmem:[%s4949_s10 + $0x8] sm:$0xff]  ;;  %v960_v4 = vld [vmem:[#allocation11 + $0x4f8] sm:$0xff] }
  0x86   : > { %873 = vmatpush.msrb.mxu1 %v836_v21  ;;  %913 = vmatpush.msrb.mxu3 %v837_v23  ;;  %v4968_v0 = vld [vmem:[%s4949_s10] sm:$0xff]  ;;  %v991_v3 = vld [vmem:[#allocation11 + $0x5f0] sm:$0xff]  ;;  %v957_v6 = vld [vmem:[#allocation11 + $0x4e0] sm:$0xff] }
  0x87   : > { %854 = vmatpush.msrb.mxu0 %v802_v24  ;;  %894 = vmatpush.msrb.mxu2 %v803_v26  ;;  %v992_v5 = vld [vmem:[#allocation11 + $0x5f8] sm:$0xff]  ;;  %v989_v7 = vld [vmem:[#allocation11 + $0x5e0] sm:$0xff]  ;;  %v958_v8 = vld [vmem:[#allocation11 + $0x4e8] sm:$0xff] }
  0x88   : > { %874 = vmatpush.msrb.mxu1 %v834_v25  ;;  %914 = vmatpush.msrb.mxu3 %v835_v27  ;;  %v990_v9 = vld [vmem:[#allocation11 + $0x5e8] sm:$0xff]  ;;  %v955_v10 = vld [vmem:[#allocation11 + $0x4d0] sm:$0xff]  ;;  %v956_v12 = vld [vmem:[#allocation11 + $0x4d8] sm:$0xff] }
  0x89   : > { %855 = vmatpush.msrb.mxu0 %v800_v28  ;;  %895 = vmatpush.msrb.mxu2 %v801_v30  ;;  %v987_v11 = vld [vmem:[#allocation11 + $0x5d0] sm:$0xff]  ;;  %v988_v13 = vld [vmem:[#allocation11 + $0x5d8] sm:$0xff]  ;;  %v953_v14 = vld [vmem:[#allocation11 + $0x4c0] sm:$0xff] }
  0x8a   : > { %875 = vmatpush.msrb.mxu1 %v832_v29  ;;  %915 = vmatpush.msrb.mxu3 %v833_v31  ;;  %v985_v15 = vld [vmem:[#allocation11 + $0x5c0] sm:$0xff]  ;;  %v954_v16 = vld [vmem:[#allocation11 + $0x4c8] sm:$0xff]  ;;  %v951_v18 = vld [vmem:[#allocation11 + $0x4b0] sm:$0xff] }
  0x8b   : > { %856 = vmatpush.msrb.mxu0 %v798_v32  ;;  %896 = vmatpush.msrb.mxu2 %v799_v34  ;;  %v986_v17 = vld [vmem:[#allocation11 + $0x5c8] sm:$0xff]  ;;  %v983_v19 = vld [vmem:[#allocation11 + $0x5b0] sm:$0xff]  ;;  %v952_v20 = vld [vmem:[#allocation11 + $0x4b8] sm:$0xff] }
  0x8c   : > { %876 = vmatpush.msrb.mxu1 %v830_v33  ;;  %916 = vmatpush.msrb.mxu3 %v831_v35  ;;  %v984_v21 = vld [vmem:[#allocation11 + $0x5b8] sm:$0xff]  ;;  %v949_v22 = vld [vmem:[#allocation11 + $0x4a0] sm:$0xff]  ;;  %v950_v24 = vld [vmem:[#allocation11 + $0x4a8] sm:$0xff] }
  0x8d   : > { %857 = vmatpush.msrb.mxu0 %v796_v36  ;;  %897 = vmatpush.msrb.mxu2 %v797_v38  ;;  %v981_v23 = vld [vmem:[#allocation11 + $0x5a0] sm:$0xff]  ;;  %v982_v25 = vld [vmem:[#allocation11 + $0x5a8] sm:$0xff]  ;;  %v947_v26 = vld [vmem:[#allocation11 + $0x490] sm:$0xff] }
  0x8e   : > { %877 = vmatpush.msrb.mxu1 %v828_v37  ;;  %917 = vmatpush.msrb.mxu3 %v829_v39  ;;  %v979_v27 = vld [vmem:[#allocation11 + $0x590] sm:$0xff]  ;;  %v948_v28 = vld [vmem:[#allocation11 + $0x498] sm:$0xff]  ;;  %v945_v30 = vld [vmem:[#allocation11 + $0x480] sm:$0xff] }
  0x8f   : > { %858 = vmatpush.msrb.mxu0 %v794_v40  ;;  %898 = vmatpush.msrb.mxu2 %v795_v42  ;;  %v980_v29 = vld [vmem:[#allocation11 + $0x598] sm:$0xff]  ;;  %v977_v31 = vld [vmem:[#allocation11 + $0x580] sm:$0xff]  ;;  %v946_v32 = vld [vmem:[#allocation11 + $0x488] sm:$0xff] }
  0x90   : > { %878 = vmatpush.msrb.mxu1 %v826_v41  ;;  %918 = vmatpush.msrb.mxu3 %v827_v43  ;;  %v978_v33 = vld [vmem:[#allocation11 + $0x588] sm:$0xff]  ;;  %v943_v34 = vld [vmem:[#allocation11 + $0x470] sm:$0xff]  ;;  %v944_v36 = vld [vmem:[#allocation11 + $0x478] sm:$0xff] }
  0x91   : > { %859 = vmatpush.msrb.mxu0 %v792_v44  ;;  %899 = vmatpush.msrb.mxu2 %v793_v46  ;;  %v975_v35 = vld [vmem:[#allocation11 + $0x570] sm:$0xff]  ;;  %v976_v37 = vld [vmem:[#allocation11 + $0x578] sm:$0xff]  ;;  %v941_v38 = vld [vmem:[#allocation11 + $0x460] sm:$0xff] }
  0x92   : > { %879 = vmatpush.msrb.mxu1 %v824_v45  ;;  %919 = vmatpush.msrb.mxu3 %v825_v47  ;;  %v973_v39 = vld [vmem:[#allocation11 + $0x560] sm:$0xff]  ;;  %v942_v40 = vld [vmem:[#allocation11 + $0x468] sm:$0xff]  ;;  %v939_v42 = vld [vmem:[#allocation11 + $0x450] sm:$0xff] }
  0x93   : > { %860 = vmatpush.msrb.mxu0 %v790_v48  ;;  %900 = vmatpush.msrb.mxu2 %v791_v50  ;;  %v974_v41 = vld [vmem:[#allocation11 + $0x568] sm:$0xff]  ;;  %v971_v43 = vld [vmem:[#allocation11 + $0x550] sm:$0xff]  ;;  %v940_v44 = vld [vmem:[#allocation11 + $0x458] sm:$0xff] }
  0x94   : > { %880 = vmatpush.msrb.mxu1 %v822_v49  ;;  %920 = vmatpush.msrb.mxu3 %v823_v51  ;;  %v972_v45 = vld [vmem:[#allocation11 + $0x558] sm:$0xff]  ;;  %v937_v46 = vld [vmem:[#allocation11 + $0x440] sm:$0xff]  ;;  %v938_v48 = vld [vmem:[#allocation11 + $0x448] sm:$0xff] }
  0x95   : > { %861 = vmatpush.msrb.mxu0 %v788_v52  ;;  %901 = vmatpush.msrb.mxu2 %v789_v54  ;;  %v969_v47 = vld [vmem:[#allocation11 + $0x540] sm:$0xff]  ;;  %v970_v49 = vld [vmem:[#allocation11 + $0x548] sm:$0xff]  ;;  %v935_v50 = vld [vmem:[#allocation11 + $0x430] sm:$0xff] }
  0x96   : > { %881 = vmatpush.msrb.mxu1 %v820_v53  ;;  %921 = vmatpush.msrb.mxu3 %v821_v55  ;;  %v967_v51 = vld [vmem:[#allocation11 + $0x530] sm:$0xff]  ;;  %v936_v52 = vld [vmem:[#allocation11 + $0x438] sm:$0xff]  ;;  %v933_v54 = vld [vmem:[#allocation11 + $0x420] sm:$0xff] }
  0x97   : > { %862 = vmatpush.msrb.mxu0 %v786_v56  ;;  %902 = vmatpush.msrb.mxu2 %v787_v58  ;;  %v968_v53 = vld [vmem:[#allocation11 + $0x538] sm:$0xff]  ;;  %v965_v55 = vld [vmem:[#allocation11 + $0x520] sm:$0xff]  ;;  %v934_v56 = vld [vmem:[#allocation11 + $0x428] sm:$0xff] }
  0x98   : > { %882 = vmatpush.msrb.mxu1 %v818_v57  ;;  %922 = vmatpush.msrb.mxu3 %v819_v59  ;;  %v966_v57 = vld [vmem:[#allocation11 + $0x528] sm:$0xff]  ;;  %v931_v58 = vld [vmem:[#allocation11 + $0x410] sm:$0xff] }
  0x99   : > { %863 = vmatpush.msrb.mxu0 %v784_v60  ;;  %903 = vmatpush.msrb.mxu2 %v785_v62  ;;  %v963_v59 = vld [vmem:[#allocation11 + $0x510] sm:$0xff]  ;;  %v932_v60 = vld [vmem:[#allocation11 + $0x418] sm:$0xff]  ;;  %v929_v62 = vld [vmem:[#allocation11 + $0x400] sm:$0xff] }
  0x9a   : > { %883 = vmatpush.msrb.mxu1 %v816_v61  ;;  %923 = vmatpush.msrb.mxu3 %v817_v63  ;;  %v964_v61 = vld [vmem:[#allocation11 + $0x518] sm:$0xff]  ;;  %v961_v63 = vld [vmem:[#allocation11 + $0x500] sm:$0xff] }
  0x9b   : > { %719 = vmatmul.f32.vlgmr.msra.gmra.mxu0 %v4968_v0  ;;  %739 = vmatmul.f32.vlgmr.msra.gmra.mxu1 %v4971_v1 }
  0x9c   : > { %759 = vmatmul.f32.vlgmr.msra.gmra.mxu2 %v4968_v0  ;;  %779 = vmatmul.f32.vlgmr.msra.gmra.mxu3 %v4971_v1 }
  0x9d   : > { %993 = vmatpush.msra.mxu0 %v959_v2  ;;  %1013 = vmatpush.msra.mxu1 %v991_v3  ;;  %v930_v2 = vld [vmem:[#allocation11 + $0x408] sm:$0xff] }
  0x9e   : > { %1033 = vmatpush.msra.mxu2 %v960_v4  ;;  %1053 = vmatpush.msra.mxu3 %v992_v5  ;;  %v962_v3 = vld [vmem:[#allocation11 + $0x508] sm:$0xff]  ;;  %v1104_v4 = vld [vmem:[#allocation11 + $0x6f0] sm:$0xff] }
  0x9f   : > { %994 = vmatpush.msra.mxu0 %v957_v6  ;;  %1014 = vmatpush.msra.mxu1 %v989_v7  ;;  %v1136_v5 = vld [vmem:[#allocation11 + $0x7f0] sm:$0xff]  ;;  %v1105_v6 = vld [vmem:[#allocation11 + $0x6f8] sm:$0xff] }
  0xa0   : > { %1034 = vmatpush.msra.mxu2 %v958_v8  ;;  %1054 = vmatpush.msra.mxu3 %v990_v9  ;;  %v1137_v7 = vld [vmem:[#allocation11 + $0x7f8] sm:$0xff]  ;;  %v1102_v8 = vld [vmem:[#allocation11 + $0x6e0] sm:$0xff] }
  0xa1   : > { %995 = vmatpush.msra.mxu0 %v955_v10  ;;  %1015 = vmatpush.msra.mxu1 %v987_v11  ;;  %v1134_v9 = vld [vmem:[#allocation11 + $0x7e0] sm:$0xff]  ;;  %v1103_v10 = vld [vmem:[#allocation11 + $0x6e8] sm:$0xff] }
  0xa2   : > { %1035 = vmatpush.msra.mxu2 %v956_v12  ;;  %1055 = vmatpush.msra.mxu3 %v988_v13  ;;  %v1135_v11 = vld [vmem:[#allocation11 + $0x7e8] sm:$0xff]  ;;  %v1100_v12 = vld [vmem:[#allocation11 + $0x6d0] sm:$0xff] }
  0xa3   : > { %996 = vmatpush.msra.mxu0 %v953_v14  ;;  %1016 = vmatpush.msra.mxu1 %v985_v15  ;;  %v1132_v13 = vld [vmem:[#allocation11 + $0x7d0] sm:$0xff]  ;;  %v1101_v14 = vld [vmem:[#allocation11 + $0x6d8] sm:$0xff] }
  0xa4   : > { %1036 = vmatpush.msra.mxu2 %v954_v16  ;;  %1056 = vmatpush.msra.mxu3 %v986_v17  ;;  %v1133_v15 = vld [vmem:[#allocation11 + $0x7d8] sm:$0xff]  ;;  %v1098_v16 = vld [vmem:[#allocation11 + $0x6c0] sm:$0xff] }
  0xa5   : > { %997 = vmatpush.msra.mxu0 %v951_v18  ;;  %1017 = vmatpush.msra.mxu1 %v983_v19  ;;  %v1130_v17 = vld [vmem:[#allocation11 + $0x7c0] sm:$0xff]  ;;  %v1099_v18 = vld [vmem:[#allocation11 + $0x6c8] sm:$0xff] }
  0xa6   : > { %1037 = vmatpush.msra.mxu2 %v952_v20  ;;  %1057 = vmatpush.msra.mxu3 %v984_v21  ;;  %v1131_v19 = vld [vmem:[#allocation11 + $0x7c8] sm:$0xff]  ;;  %v1096_v20 = vld [vmem:[#allocation11 + $0x6b0] sm:$0xff] }
  0xa7   : > { %998 = vmatpush.msra.mxu0 %v949_v22  ;;  %1018 = vmatpush.msra.mxu1 %v981_v23  ;;  %v1128_v21 = vld [vmem:[#allocation11 + $0x7b0] sm:$0xff]  ;;  %v1097_v22 = vld [vmem:[#allocation11 + $0x6b8] sm:$0xff] }
  0xa8   : > { %1038 = vmatpush.msra.mxu2 %v950_v24  ;;  %1058 = vmatpush.msra.mxu3 %v982_v25  ;;  %v1129_v23 = vld [vmem:[#allocation11 + $0x7b8] sm:$0xff]  ;;  %v1094_v24 = vld [vmem:[#allocation11 + $0x6a0] sm:$0xff] }
  0xa9   : > { %999 = vmatpush.msra.mxu0 %v947_v26  ;;  %1019 = vmatpush.msra.mxu1 %v979_v27  ;;  %v1126_v25 = vld [vmem:[#allocation11 + $0x7a0] sm:$0xff]  ;;  %v1095_v26 = vld [vmem:[#allocation11 + $0x6a8] sm:$0xff] }
  0xaa   : > { %1039 = vmatpush.msra.mxu2 %v948_v28  ;;  %1059 = vmatpush.msra.mxu3 %v980_v29  ;;  %v1127_v27 = vld [vmem:[#allocation11 + $0x7a8] sm:$0xff]  ;;  %v1092_v28 = vld [vmem:[#allocation11 + $0x690] sm:$0xff] }
  0xab   : > { %1000 = vmatpush.msra.mxu0 %v945_v30  ;;  %1020 = vmatpush.msra.mxu1 %v977_v31  ;;  %v1124_v29 = vld [vmem:[#allocation11 + $0x790] sm:$0xff]  ;;  %v1093_v30 = vld [vmem:[#allocation11 + $0x698] sm:$0xff] }
  0xac   : > { %1040 = vmatpush.msra.mxu2 %v946_v32  ;;  %1060 = vmatpush.msra.mxu3 %v978_v33  ;;  %v1125_v31 = vld [vmem:[#allocation11 + $0x798] sm:$0xff]  ;;  %v1090_v32 = vld [vmem:[#allocation11 + $0x680] sm:$0xff] }
  0xad   : > { %1001 = vmatpush.msra.mxu0 %v943_v34  ;;  %1021 = vmatpush.msra.mxu1 %v975_v35  ;;  %v1122_v33 = vld [vmem:[#allocation11 + $0x780] sm:$0xff]  ;;  %v1091_v34 = vld [vmem:[#allocation11 + $0x688] sm:$0xff] }
  0xae   : > { %1041 = vmatpush.msra.mxu2 %v944_v36  ;;  %1061 = vmatpush.msra.mxu3 %v976_v37  ;;  %v1123_v35 = vld [vmem:[#allocation11 + $0x788] sm:$0xff]  ;;  %v1088_v36 = vld [vmem:[#allocation11 + $0x670] sm:$0xff] }
  0xaf   : > { %1002 = vmatpush.msra.mxu0 %v941_v38  ;;  %1022 = vmatpush.msra.mxu1 %v973_v39  ;;  %v1120_v37 = vld [vmem:[#allocation11 + $0x770] sm:$0xff]  ;;  %v1089_v38 = vld [vmem:[#allocation11 + $0x678] sm:$0xff] }
  0xb0   : > { %1042 = vmatpush.msra.mxu2 %v942_v40  ;;  %1062 = vmatpush.msra.mxu3 %v974_v41  ;;  %v1121_v39 = vld [vmem:[#allocation11 + $0x778] sm:$0xff]  ;;  %v1086_v40 = vld [vmem:[#allocation11 + $0x660] sm:$0xff] }
  0xb1   : > { %1003 = vmatpush.msra.mxu0 %v939_v42  ;;  %1023 = vmatpush.msra.mxu1 %v971_v43  ;;  %v1118_v41 = vld [vmem:[#allocation11 + $0x760] sm:$0xff]  ;;  %v1087_v42 = vld [vmem:[#allocation11 + $0x668] sm:$0xff] }
  0xb2   : > { %1043 = vmatpush.msra.mxu2 %v940_v44  ;;  %1063 = vmatpush.msra.mxu3 %v972_v45  ;;  %v1119_v43 = vld [vmem:[#allocation11 + $0x768] sm:$0xff]  ;;  %v1084_v44 = vld [vmem:[#allocation11 + $0x650] sm:$0xff] }
  0xb3   : > { %1004 = vmatpush.msra.mxu0 %v937_v46  ;;  %1024 = vmatpush.msra.mxu1 %v969_v47  ;;  %v1116_v45 = vld [vmem:[#allocation11 + $0x750] sm:$0xff]  ;;  %v1085_v46 = vld [vmem:[#allocation11 + $0x658] sm:$0xff] }
  0xb4   : > { %1044 = vmatpush.msra.mxu2 %v938_v48  ;;  %1064 = vmatpush.msra.mxu3 %v970_v49  ;;  %v1117_v47 = vld [vmem:[#allocation11 + $0x758] sm:$0xff]  ;;  %v1082_v48 = vld [vmem:[#allocation11 + $0x640] sm:$0xff] }
  0xb5   : > { %1005 = vmatpush.msra.mxu0 %v935_v50  ;;  %1025 = vmatpush.msra.mxu1 %v967_v51  ;;  %v1114_v49 = vld [vmem:[#allocation11 + $0x740] sm:$0xff]  ;;  %v1083_v50 = vld [vmem:[#allocation11 + $0x648] sm:$0xff] }
  0xb6   : > { %1045 = vmatpush.msra.mxu2 %v936_v52  ;;  %1065 = vmatpush.msra.mxu3 %v968_v53  ;;  %v1115_v51 = vld [vmem:[#allocation11 + $0x748] sm:$0xff]  ;;  %v1080_v52 = vld [vmem:[#allocation11 + $0x630] sm:$0xff] }
  0xb7   : > { %1006 = vmatpush.msra.mxu0 %v933_v54  ;;  %1026 = vmatpush.msra.mxu1 %v965_v55  ;;  %v1112_v53 = vld [vmem:[#allocation11 + $0x730] sm:$0xff]  ;;  %v1081_v54 = vld [vmem:[#allocation11 + $0x638] sm:$0xff] }
  0xb8   : > { %1046 = vmatpush.msra.mxu2 %v934_v56  ;;  %1066 = vmatpush.msra.mxu3 %v966_v57  ;;  %v1113_v55 = vld [vmem:[#allocation11 + $0x738] sm:$0xff]  ;;  %v1078_v56 = vld [vmem:[#allocation11 + $0x620] sm:$0xff] }
  0xb9   : > { %1007 = vmatpush.msra.mxu0 %v931_v58  ;;  %1027 = vmatpush.msra.mxu1 %v963_v59  ;;  %v1110_v57 = vld [vmem:[#allocation11 + $0x720] sm:$0xff]  ;;  %v1079_v58 = vld [vmem:[#allocation11 + $0x628] sm:$0xff] }
  0xba   : > { %1047 = vmatpush.msra.mxu2 %v932_v60  ;;  %1067 = vmatpush.msra.mxu3 %v964_v61  ;;  %v1111_v59 = vld [vmem:[#allocation11 + $0x728] sm:$0xff]  ;;  %v1076_v60 = vld [vmem:[#allocation11 + $0x610] sm:$0xff] }
  0xbb   : > { %1008 = vmatpush.msra.mxu0 %v929_v62  ;;  %1028 = vmatpush.msra.mxu1 %v961_v63  ;;  %v1108_v61 = vld [vmem:[#allocation11 + $0x710] sm:$0xff]  ;;  %v1077_v62 = vld [vmem:[#allocation11 + $0x618] sm:$0xff] }
  0xbc   : > { %1048 = vmatpush.msra.mxu2 %v930_v2  ;;  %1068 = vmatpush.msra.mxu3 %v962_v3  ;;  %v1109_v63 = vld [vmem:[#allocation11 + $0x718] sm:$0xff]  ;;  %v1074_v2 = vld [vmem:[#allocation11 + $0x600] sm:$0xff] }
  0xbd   : > { %864 = vmatmul.f32.vlgmr.msrb.gmra.mxu0 %v4968_v0  ;;  %884 = vmatmul.f32.vlgmr.msrb.gmra.mxu1 %v4971_v1  ;;  %v1106_v3 = vld [vmem:[#allocation11 + $0x700] sm:$0xff] }
  0xbe   : > { %904 = vmatmul.f32.vlgmr.msrb.gmra.mxu2 %v4968_v0  ;;  %924 = vmatmul.f32.vlgmr.msrb.gmra.mxu3 %v4971_v1 }
  0xbf   : > { %1138 = vmatpush.msrb.mxu0 %v1104_v4  ;;  %1158 = vmatpush.msrb.mxu1 %v1136_v5  ;;  %v1075_v4 = vld [vmem:[#allocation11 + $0x608] sm:$0xff] }
  0xc0   : > { %1178 = vmatpush.msrb.mxu2 %v1105_v6  ;;  %1198 = vmatpush.msrb.mxu3 %v1137_v7  ;;  %v1107_v5 = vld [vmem:[#allocation11 + $0x708] sm:$0xff]  ;;  %v1249_v6 = vld [vmem:[#allocation11 + $0x8f0] sm:$0xff] }
  0xc1   : > { %1139 = vmatpush.msrb.mxu0 %v1102_v8  ;;  %1159 = vmatpush.msrb.mxu1 %v1134_v9  ;;  %v1281_v7 = vld [vmem:[#allocation11 + $0x9f0] sm:$0xff]  ;;  %v1250_v8 = vld [vmem:[#allocation11 + $0x8f8] sm:$0xff] }
  0xc2   : > { %1179 = vmatpush.msrb.mxu2 %v1103_v10  ;;  %1199 = vmatpush.msrb.mxu3 %v1135_v11  ;;  %v1282_v9 = vld [vmem:[#allocation11 + $0x9f8] sm:$0xff]  ;;  %v1247_v10 = vld [vmem:[#allocation11 + $0x8e0] sm:$0xff] }
  0xc3   : > { %1140 = vmatpush.msrb.mxu0 %v1100_v12  ;;  %1160 = vmatpush.msrb.mxu1 %v1132_v13  ;;  %v1279_v11 = vld [vmem:[#allocation11 + $0x9e0] sm:$0xff]  ;;  %v1248_v12 = vld [vmem:[#allocation11 + $0x8e8] sm:$0xff] }
  0xc4   : > { %1180 = vmatpush.msrb.mxu2 %v1101_v14  ;;  %1200 = vmatpush.msrb.mxu3 %v1133_v15  ;;  %v1280_v13 = vld [vmem:[#allocation11 + $0x9e8] sm:$0xff]  ;;  %v1245_v14 = vld [vmem:[#allocation11 + $0x8d0] sm:$0xff] }
  0xc5   : > { %1141 = vmatpush.msrb.mxu0 %v1098_v16  ;;  %1161 = vmatpush.msrb.mxu1 %v1130_v17  ;;  %v1277_v15 = vld [vmem:[#allocation11 + $0x9d0] sm:$0xff]  ;;  %v1246_v16 = vld [vmem:[#allocation11 + $0x8d8] sm:$0xff] }
  0xc6   : > { %1181 = vmatpush.msrb.mxu2 %v1099_v18  ;;  %1201 = vmatpush.msrb.mxu3 %v1131_v19  ;;  %v1278_v17 = vld [vmem:[#allocation11 + $0x9d8] sm:$0xff]  ;;  %v1243_v18 = vld [vmem:[#allocation11 + $0x8c0] sm:$0xff] }
  0xc7   : > { %1142 = vmatpush.msrb.mxu0 %v1096_v20  ;;  %1162 = vmatpush.msrb.mxu1 %v1128_v21  ;;  %v1275_v19 = vld [vmem:[#allocation11 + $0x9c0] sm:$0xff]  ;;  %v1244_v20 = vld [vmem:[#allocation11 + $0x8c8] sm:$0xff] }
  0xc8   : > { %1182 = vmatpush.msrb.mxu2 %v1097_v22  ;;  %1202 = vmatpush.msrb.mxu3 %v1129_v23  ;;  %v1276_v21 = vld [vmem:[#allocation11 + $0x9c8] sm:$0xff]  ;;  %v1241_v22 = vld [vmem:[#allocation11 + $0x8b0] sm:$0xff] }
  0xc9   : > { %1143 = vmatpush.msrb.mxu0 %v1094_v24  ;;  %1163 = vmatpush.msrb.mxu1 %v1126_v25  ;;  %v1273_v23 = vld [vmem:[#allocation11 + $0x9b0] sm:$0xff]  ;;  %v1242_v24 = vld [vmem:[#allocation11 + $0x8b8] sm:$0xff] }
  0xca   : > { %1183 = vmatpush.msrb.mxu2 %v1095_v26  ;;  %1203 = vmatpush.msrb.mxu3 %v1127_v27  ;;  %v1274_v25 = vld [vmem:[#allocation11 + $0x9b8] sm:$0xff]  ;;  %v1239_v26 = vld [vmem:[#allocation11 + $0x8a0] sm:$0xff] }
  0xcb   : > { %1144 = vmatpush.msrb.mxu0 %v1092_v28  ;;  %1164 = vmatpush.msrb.mxu1 %v1124_v29  ;;  %v1271_v27 = vld [vmem:[#allocation11 + $0x9a0] sm:$0xff]  ;;  %v1240_v28 = vld [vmem:[#allocation11 + $0x8a8] sm:$0xff] }
  0xcc   : > { %1184 = vmatpush.msrb.mxu2 %v1093_v30  ;;  %1204 = vmatpush.msrb.mxu3 %v1125_v31  ;;  %v1272_v29 = vld [vmem:[#allocation11 + $0x9a8] sm:$0xff]  ;;  %v1237_v30 = vld [vmem:[#allocation11 + $0x890] sm:$0xff] }
  0xcd   : > { %1145 = vmatpush.msrb.mxu0 %v1090_v32  ;;  %1165 = vmatpush.msrb.mxu1 %v1122_v33  ;;  %v1269_v31 = vld [vmem:[#allocation11 + $0x990] sm:$0xff]  ;;  %v1238_v32 = vld [vmem:[#allocation11 + $0x898] sm:$0xff] }
  0xce   : > { %1185 = vmatpush.msrb.mxu2 %v1091_v34  ;;  %1205 = vmatpush.msrb.mxu3 %v1123_v35  ;;  %v1270_v33 = vld [vmem:[#allocation11 + $0x998] sm:$0xff]  ;;  %v1235_v34 = vld [vmem:[#allocation11 + $0x880] sm:$0xff] }
  0xcf   : > { %1146 = vmatpush.msrb.mxu0 %v1088_v36  ;;  %1166 = vmatpush.msrb.mxu1 %v1120_v37  ;;  %v1267_v35 = vld [vmem:[#allocation11 + $0x980] sm:$0xff]  ;;  %v1236_v36 = vld [vmem:[#allocation11 + $0x888] sm:$0xff] }
  0xd0   : > { %1186 = vmatpush.msrb.mxu2 %v1089_v38  ;;  %1206 = vmatpush.msrb.mxu3 %v1121_v39  ;;  %v1268_v37 = vld [vmem:[#allocation11 + $0x988] sm:$0xff]  ;;  %v1233_v38 = vld [vmem:[#allocation11 + $0x870] sm:$0xff] }
  0xd1   : > { %1147 = vmatpush.msrb.mxu0 %v1086_v40  ;;  %1167 = vmatpush.msrb.mxu1 %v1118_v41  ;;  %v1265_v39 = vld [vmem:[#allocation11 + $0x970] sm:$0xff]  ;;  %v1234_v40 = vld [vmem:[#allocation11 + $0x878] sm:$0xff] }
  0xd2   : > { %1187 = vmatpush.msrb.mxu2 %v1087_v42  ;;  %1207 = vmatpush.msrb.mxu3 %v1119_v43  ;;  %v1266_v41 = vld [vmem:[#allocation11 + $0x978] sm:$0xff]  ;;  %v1231_v42 = vld [vmem:[#allocation11 + $0x860] sm:$0xff] }
  0xd3   : > { %1148 = vmatpush.msrb.mxu0 %v1084_v44  ;;  %1168 = vmatpush.msrb.mxu1 %v1116_v45  ;;  %v1263_v43 = vld [vmem:[#allocation11 + $0x960] sm:$0xff]  ;;  %v1232_v44 = vld [vmem:[#allocation11 + $0x868] sm:$0xff] }
  0xd4   : > { %1188 = vmatpush.msrb.mxu2 %v1085_v46  ;;  %1208 = vmatpush.msrb.mxu3 %v1117_v47  ;;  %v1264_v45 = vld [vmem:[#allocation11 + $0x968] sm:$0xff]  ;;  %v1229_v46 = vld [vmem:[#allocation11 + $0x850] sm:$0xff] }
  0xd5   : > { %1149 = vmatpush.msrb.mxu0 %v1082_v48  ;;  %1169 = vmatpush.msrb.mxu1 %v1114_v49  ;;  %v1261_v47 = vld [vmem:[#allocation11 + $0x950] sm:$0xff]  ;;  %v1230_v48 = vld [vmem:[#allocation11 + $0x858] sm:$0xff] }
  0xd6   : > { %1189 = vmatpush.msrb.mxu2 %v1083_v50  ;;  %1209 = vmatpush.msrb.mxu3 %v1115_v51  ;;  %v1262_v49 = vld [vmem:[#allocation11 + $0x958] sm:$0xff]  ;;  %v1227_v50 = vld [vmem:[#allocation11 + $0x840] sm:$0xff] }
  0xd7   : > { %1150 = vmatpush.msrb.mxu0 %v1080_v52  ;;  %1170 = vmatpush.msrb.mxu1 %v1112_v53  ;;  %v1259_v51 = vld [vmem:[#allocation11 + $0x940] sm:$0xff]  ;;  %v1228_v52 = vld [vmem:[#allocation11 + $0x848] sm:$0xff] }
  0xd8   : > { %1190 = vmatpush.msrb.mxu2 %v1081_v54  ;;  %1210 = vmatpush.msrb.mxu3 %v1113_v55  ;;  %v1260_v53 = vld [vmem:[#allocation11 + $0x948] sm:$0xff]  ;;  %v1225_v54 = vld [vmem:[#allocation11 + $0x830] sm:$0xff] }
  0xd9   : > { %1151 = vmatpush.msrb.mxu0 %v1078_v56  ;;  %1171 = vmatpush.msrb.mxu1 %v1110_v57  ;;  %v1257_v55 = vld [vmem:[#allocation11 + $0x930] sm:$0xff]  ;;  %v1226_v56 = vld [vmem:[#allocation11 + $0x838] sm:$0xff] }
  0xda   : > { %1191 = vmatpush.msrb.mxu2 %v1079_v58  ;;  %1211 = vmatpush.msrb.mxu3 %v1111_v59  ;;  %v1258_v57 = vld [vmem:[#allocation11 + $0x938] sm:$0xff]  ;;  %v1223_v58 = vld [vmem:[#allocation11 + $0x820] sm:$0xff] }
  0xdb   : > { %1152 = vmatpush.msrb.mxu0 %v1076_v60  ;;  %1172 = vmatpush.msrb.mxu1 %v1108_v61  ;;  %v1255_v59 = vld [vmem:[#allocation11 + $0x920] sm:$0xff]  ;;  %v1224_v60 = vld [vmem:[#allocation11 + $0x828] sm:$0xff] }
  0xdc   : > { %1192 = vmatpush.msrb.mxu2 %v1077_v62  ;;  %1212 = vmatpush.msrb.mxu3 %v1109_v63  ;;  %v1256_v61 = vld [vmem:[#allocation11 + $0x928] sm:$0xff]  ;;  %v1221_v62 = vld [vmem:[#allocation11 + $0x810] sm:$0xff] }
  0xdd   : > { %1153 = vmatpush.msrb.mxu0 %v1074_v2  ;;  %1173 = vmatpush.msrb.mxu1 %v1106_v3  ;;  %v1253_v63 = vld [vmem:[#allocation11 + $0x910] sm:$0xff]  ;;  %v1222_v2 = vld [vmem:[#allocation11 + $0x818] sm:$0xff] }
  0xde   : > { %1193 = vmatpush.msrb.mxu2 %v1075_v4  ;;  %1213 = vmatpush.msrb.mxu3 %v1107_v5  ;;  %v1254_v3 = vld [vmem:[#allocation11 + $0x918] sm:$0xff]  ;;  %v1219_v4 = vld [vmem:[#allocation11 + $0x800] sm:$0xff] }
  0xdf   : > { %1009 = vmatmul.f32.vlgmr.msra.gmra.mxu0 %v4968_v0  ;;  %1029 = vmatmul.f32.vlgmr.msra.gmra.mxu1 %v4971_v1  ;;  %v1251_v5 = vld [vmem:[#allocation11 + $0x900] sm:$0xff] }
  0xe0   : > { %1049 = vmatmul.f32.vlgmr.msra.gmra.mxu2 %v4968_v0  ;;  %1069 = vmatmul.f32.vlgmr.msra.gmra.mxu3 %v4971_v1 }
  0xe1   : > { %1283 = vmatpush.msra.mxu0 %v1249_v6  ;;  %1303 = vmatpush.msra.mxu1 %v1281_v7  ;;  %v1220_v6 = vld [vmem:[#allocation11 + $0x808] sm:$0xff] }
  0xe2   : > { %1323 = vmatpush.msra.mxu2 %v1250_v8  ;;  %1343 = vmatpush.msra.mxu3 %v1282_v9  ;;  %v1252_v7 = vld [vmem:[#allocation11 + $0x908] sm:$0xff]  ;;  %v1394_v8 = vld [vmem:[#allocation11 + $0xaf0] sm:$0xff] }
  0xe3   : > { %1284 = vmatpush.msra.mxu0 %v1247_v10  ;;  %1304 = vmatpush.msra.mxu1 %v1279_v11  ;;  %v1426_v9 = vld [vmem:[#allocation11 + $0xbf0] sm:$0xff]  ;;  %v1395_v10 = vld [vmem:[#allocation11 + $0xaf8] sm:$0xff] }
  0xe4   : > { %1324 = vmatpush.msra.mxu2 %v1248_v12  ;;  %1344 = vmatpush.msra.mxu3 %v1280_v13  ;;  %v1427_v11 = vld [vmem:[#allocation11 + $0xbf8] sm:$0xff]  ;;  %v1392_v12 = vld [vmem:[#allocation11 + $0xae0] sm:$0xff] }
  0xe5   : > { %1285 = vmatpush.msra.mxu0 %v1245_v14  ;;  %1305 = vmatpush.msra.mxu1 %v1277_v15  ;;  %v1424_v13 = vld [vmem:[#allocation11 + $0xbe0] sm:$0xff]  ;;  %v1393_v14 = vld [vmem:[#allocation11 + $0xae8] sm:$0xff] }
  0xe6   : > { %1325 = vmatpush.msra.mxu2 %v1246_v16  ;;  %1345 = vmatpush.msra.mxu3 %v1278_v17  ;;  %v1425_v15 = vld [vmem:[#allocation11 + $0xbe8] sm:$0xff]  ;;  %v1390_v16 = vld [vmem:[#allocation11 + $0xad0] sm:$0xff] }
  0xe7   : > { %1286 = vmatpush.msra.mxu0 %v1243_v18  ;;  %1306 = vmatpush.msra.mxu1 %v1275_v19  ;;  %v1422_v17 = vld [vmem:[#allocation11 + $0xbd0] sm:$0xff]  ;;  %v1391_v18 = vld [vmem:[#allocation11 + $0xad8] sm:$0xff] }
  0xe8   : > { %1326 = vmatpush.msra.mxu2 %v1244_v20  ;;  %1346 = vmatpush.msra.mxu3 %v1276_v21  ;;  %v1423_v19 = vld [vmem:[#allocation11 + $0xbd8] sm:$0xff]  ;;  %v1388_v20 = vld [vmem:[#allocation11 + $0xac0] sm:$0xff]  ;;  %v1421_v21 = vld [vmem:[#allocation11 + $0xbc8] sm:$0xff] }
  0xe9   : > { %1287 = vmatpush.msra.mxu0 %v1241_v22  ;;  %1307 = vmatpush.msra.mxu1 %v1273_v23  ;;  %v1386_v22 = vld [vmem:[#allocation11 + $0xab0] sm:$0xff] }
  0xea   : > { %1327 = vmatpush.msra.mxu2 %v1242_v24  ;;  %1347 = vmatpush.msra.mxu3 %v1274_v25  ;;  %v1418_v23 = vld [vmem:[#allocation11 + $0xbb0] sm:$0xff]  ;;  %v1387_v24 = vld [vmem:[#allocation11 + $0xab8] sm:$0xff] }
  0xeb   : > { %1288 = vmatpush.msra.mxu0 %v1239_v26  ;;  %1308 = vmatpush.msra.mxu1 %v1271_v27  ;;  %v1419_v25 = vld [vmem:[#allocation11 + $0xbb8] sm:$0xff]  ;;  %v1384_v26 = vld [vmem:[#allocation11 + $0xaa0] sm:$0xff] }
  0xec   : > { %1328 = vmatpush.msra.mxu2 %v1240_v28  ;;  %1348 = vmatpush.msra.mxu3 %v1272_v29  ;;  %v1416_v27 = vld [vmem:[#allocation11 + $0xba0] sm:$0xff]  ;;  %v1385_v28 = vld [vmem:[#allocation11 + $0xaa8] sm:$0xff] }
  0xed   : > { %1289 = vmatpush.msra.mxu0 %v1237_v30  ;;  %1309 = vmatpush.msra.mxu1 %v1269_v31  ;;  %v1417_v29 = vld [vmem:[#allocation11 + $0xba8] sm:$0xff]  ;;  %v1382_v30 = vld [vmem:[#allocation11 + $0xa90] sm:$0xff] }
  0xee   : > { %1329 = vmatpush.msra.mxu2 %v1238_v32  ;;  %1349 = vmatpush.msra.mxu3 %v1270_v33  ;;  %v1414_v31 = vld [vmem:[#allocation11 + $0xb90] sm:$0xff]  ;;  %v1383_v32 = vld [vmem:[#allocation11 + $0xa98] sm:$0xff] }
  0xef   : > { %1290 = vmatpush.msra.mxu0 %v1235_v34  ;;  %1310 = vmatpush.msra.mxu1 %v1267_v35  ;;  %v1415_v33 = vld [vmem:[#allocation11 + $0xb98] sm:$0xff]  ;;  %v1380_v34 = vld [vmem:[#allocation11 + $0xa80] sm:$0xff] }
  0xf0   : > { %1330 = vmatpush.msra.mxu2 %v1236_v36  ;;  %1350 = vmatpush.msra.mxu3 %v1268_v37  ;;  %v1412_v35 = vld [vmem:[#allocation11 + $0xb80] sm:$0xff]  ;;  %v1381_v36 = vld [vmem:[#allocation11 + $0xa88] sm:$0xff] }
  0xf1   : > { %1291 = vmatpush.msra.mxu0 %v1233_v38  ;;  %1311 = vmatpush.msra.mxu1 %v1265_v39  ;;  %v1413_v37 = vld [vmem:[#allocation11 + $0xb88] sm:$0xff]  ;;  %v1378_v38 = vld [vmem:[#allocation11 + $0xa70] sm:$0xff] }
  0xf2   : > { %1331 = vmatpush.msra.mxu2 %v1234_v40  ;;  %1351 = vmatpush.msra.mxu3 %v1266_v41  ;;  %v1410_v39 = vld [vmem:[#allocation11 + $0xb70] sm:$0xff]  ;;  %v1379_v40 = vld [vmem:[#allocation11 + $0xa78] sm:$0xff] }
  0xf3   : > { %1292 = vmatpush.msra.mxu0 %v1231_v42  ;;  %1312 = vmatpush.msra.mxu1 %v1263_v43  ;;  %v1411_v41 = vld [vmem:[#allocation11 + $0xb78] sm:$0xff]  ;;  %v1376_v42 = vld [vmem:[#allocation11 + $0xa60] sm:$0xff] }
  0xf4   : > { %1332 = vmatpush.msra.mxu2 %v1232_v44  ;;  %1352 = vmatpush.msra.mxu3 %v1264_v45  ;;  %v1408_v43 = vld [vmem:[#allocation11 + $0xb60] sm:$0xff]  ;;  %v1377_v44 = vld [vmem:[#allocation11 + $0xa68] sm:$0xff] }
  0xf5   : > { %1293 = vmatpush.msra.mxu0 %v1229_v46  ;;  %1313 = vmatpush.msra.mxu1 %v1261_v47  ;;  %v1409_v45 = vld [vmem:[#allocation11 + $0xb68] sm:$0xff]  ;;  %v1374_v46 = vld [vmem:[#allocation11 + $0xa50] sm:$0xff] }
  0xf6   : > { %1333 = vmatpush.msra.mxu2 %v1230_v48  ;;  %1353 = vmatpush.msra.mxu3 %v1262_v49  ;;  %v1406_v47 = vld [vmem:[#allocation11 + $0xb50] sm:$0xff]  ;;  %v1375_v48 = vld [vmem:[#allocation11 + $0xa58] sm:$0xff] }
  0xf7   : > { %1294 = vmatpush.msra.mxu0 %v1227_v50  ;;  %1314 = vmatpush.msra.mxu1 %v1259_v51  ;;  %v1407_v49 = vld [vmem:[#allocation11 + $0xb58] sm:$0xff]  ;;  %v1372_v50 = vld [vmem:[#allocation11 + $0xa40] sm:$0xff] }
  0xf8   : > { %1334 = vmatpush.msra.mxu2 %v1228_v52  ;;  %1354 = vmatpush.msra.mxu3 %v1260_v53  ;;  %v1404_v51 = vld [vmem:[#allocation11 + $0xb40] sm:$0xff]  ;;  %v1373_v52 = vld [vmem:[#allocation11 + $0xa48] sm:$0xff] }
  0xf9   : > { %1295 = vmatpush.msra.mxu0 %v1225_v54  ;;  %1315 = vmatpush.msra.mxu1 %v1257_v55  ;;  %v1405_v53 = vld [vmem:[#allocation11 + $0xb48] sm:$0xff]  ;;  %v1370_v54 = vld [vmem:[#allocation11 + $0xa30] sm:$0xff] }
  0xfa   : > { %1335 = vmatpush.msra.mxu2 %v1226_v56  ;;  %1355 = vmatpush.msra.mxu3 %v1258_v57  ;;  %v1402_v55 = vld [vmem:[#allocation11 + $0xb30] sm:$0xff]  ;;  %v1371_v56 = vld [vmem:[#allocation11 + $0xa38] sm:$0xff] }
  0xfb   : > { %1296 = vmatpush.msra.mxu0 %v1223_v58  ;;  %1316 = vmatpush.msra.mxu1 %v1255_v59  ;;  %v1403_v57 = vld [vmem:[#allocation11 + $0xb38] sm:$0xff]  ;;  %v1368_v58 = vld [vmem:[#allocation11 + $0xa20] sm:$0xff] }
  0xfc   : > { %1336 = vmatpush.msra.mxu2 %v1224_v60  ;;  %1356 = vmatpush.msra.mxu3 %v1256_v61  ;;  %v1400_v59 = vld [vmem:[#allocation11 + $0xb20] sm:$0xff]  ;;  %v1369_v60 = vld [vmem:[#allocation11 + $0xa28] sm:$0xff] }
  0xfd   : > { %1297 = vmatpush.msra.mxu0 %v1221_v62  ;;  %1317 = vmatpush.msra.mxu1 %v1253_v63  ;;  %v1401_v61 = vld [vmem:[#allocation11 + $0xb28] sm:$0xff]  ;;  %v1366_v62 = vld [vmem:[#allocation11 + $0xa10] sm:$0xff] }
  0xfe   : > { %1337 = vmatpush.msra.mxu2 %v1222_v2  ;;  %1357 = vmatpush.msra.mxu3 %v1254_v3  ;;  %v1398_v63 = vld [vmem:[#allocation11 + $0xb10] sm:$0xff]  ;;  %v1367_v2 = vld [vmem:[#allocation11 + $0xa18] sm:$0xff] }
  0xff   : > { %1298 = vmatpush.msra.mxu0 %v1219_v4  ;;  %1318 = vmatpush.msra.mxu1 %v1251_v5  ;;  %v1399_v3 = vld [vmem:[#allocation11 + $0xb18] sm:$0xff]  ;;  %v1364_v4 = vld [vmem:[#allocation11 + $0xa00] sm:$0xff] }
 0x100   : > { %1338 = vmatpush.msra.mxu2 %v1220_v6  ;;  %1358 = vmatpush.msra.mxu3 %v1252_v7  ;;  %v1396_v5 = vld [vmem:[#allocation11 + $0xb00] sm:$0xff]  ;;  %v1365_v6 = vld [vmem:[#allocation11 + $0xa08] sm:$0xff] }
 0x101   : > { %1154 = vmatmul.f32.vlgmr.msrb.gmra.mxu0 %v4968_v0  ;;  %1174 = vmatmul.f32.vlgmr.msrb.gmra.mxu1 %v4971_v1  ;;  %v1397_v7 = vld [vmem:[#allocation11 + $0xb08] sm:$0xff] }
 0x102   : > { %1194 = vmatmul.f32.vlgmr.msrb.gmra.mxu2 %v4968_v0  ;;  %1214 = vmatmul.f32.vlgmr.msrb.gmra.mxu3 %v4971_v1  ;;  %v1420_v0 = vld [vmem:[#allocation11 + $0xbc0] sm:$0xff]  ;;  %v1389_v1 = vld [vmem:[#allocation11 + $0xac8] sm:$0xff] }
 0x103   : > { %1428 = vmatpush.msrb.mxu0 %v1394_v8  ;;  %1448 = vmatpush.msrb.mxu1 %v1426_v9  ;;  %v1539_v8 = vld [vmem:[#allocation11 + $0xcf0] sm:$0xff] }
 0x104   : > { %1468 = vmatpush.msrb.mxu2 %v1395_v10  ;;  %1488 = vmatpush.msrb.mxu3 %v1427_v11  ;;  %v1571_v9 = vld [vmem:[#allocation11 + $0xdf0] sm:$0xff]  ;;  %v4990_v10 = vld [vmem:[%s4949_s10] sm:$0xff] }
 0x105   : > { %1429 = vmatpush.msrb.mxu0 %v1392_v12  ;;  %1449 = vmatpush.msrb.mxu1 %v1424_v13  ;;  %v4994_v11 = vld [vmem:[%s4949_s10 + $0x8] sm:$0xff]  ;;  %v1540_v12 = vld [vmem:[#allocation11 + $0xcf8] sm:$0xff]  ;;  %s7409_s10 = sld [smem:[#allocation139_spill]] }
 0x106   : > { %1469 = vmatpush.msrb.mxu2 %v1393_v14  ;;  %1489 = vmatpush.msrb.mxu3 %v1425_v15  ;;  %v1572_v13 = vld [vmem:[#allocation11 + $0xdf8] sm:$0xff]  ;;  %v1537_v14 = vld [vmem:[#allocation11 + $0xce0] sm:$0xff] }
 0x107   : > { %1430 = vmatpush.msrb.mxu0 %v1390_v16  ;;  %1450 = vmatpush.msrb.mxu1 %v1422_v17  ;;  %v1569_v15 = vld [vmem:[#allocation11 + $0xde0] sm:$0xff]  ;;  %v1538_v16 = vld [vmem:[#allocation11 + $0xce8] sm:$0xff] }
 0x108   : > { %1470 = vmatpush.msrb.mxu2 %v1391_v18  ;;  %1490 = vmatpush.msrb.mxu3 %v1423_v19  ;;  %v1570_v17 = vld [vmem:[#allocation11 + $0xde8] sm:$0xff]  ;;  %v1535_v18 = vld [vmem:[#allocation11 + $0xcd0] sm:$0xff] }
 0x109   : > { %1431 = vmatpush.msrb.mxu0 %v1388_v20  ;;  %1451 = vmatpush.msrb.mxu1 %v1420_v0  ;;  %v1567_v19 = vld [vmem:[#allocation11 + $0xdd0] sm:$0xff]  ;;  %v1536_v20 = vld [vmem:[#allocation11 + $0xcd8] sm:$0xff] }
 0x10a   : > { %1471 = vmatpush.msrb.mxu2 %v1389_v1  ;;  %1491 = vmatpush.msrb.mxu3 %v1421_v21  ;;  %v1568_v0 = vld [vmem:[#allocation11 + $0xdd8] sm:$0xff]  ;;  %v1533_v1 = vld [vmem:[#allocation11 + $0xcc0] sm:$0xff] }
 0x10b   : > { %1432 = vmatpush.msrb.mxu0 %v1386_v22  ;;  %1452 = vmatpush.msrb.mxu1 %v1418_v23  ;;  %v1565_v21 = vld [vmem:[#allocation11 + $0xdc0] sm:$0xff]  ;;  %v1534_v22 = vld [vmem:[#allocation11 + $0xcc8] sm:$0xff] }
 0x10c   : > { %1472 = vmatpush.msrb.mxu2 %v1387_v24  ;;  %1492 = vmatpush.msrb.mxu3 %v1419_v25  ;;  %v1566_v23 = vld [vmem:[#allocation11 + $0xdc8] sm:$0xff]  ;;  %v1531_v24 = vld [vmem:[#allocation11 + $0xcb0] sm:$0xff] }
 0x10d   : > { %1433 = vmatpush.msrb.mxu0 %v1384_v26  ;;  %1453 = vmatpush.msrb.mxu1 %v1416_v27  ;;  %v1563_v25 = vld [vmem:[#allocation11 + $0xdb0] sm:$0xff]  ;;  %v1532_v26 = vld [vmem:[#allocation11 + $0xcb8] sm:$0xff] }
 0x10e   : > { %1473 = vmatpush.msrb.mxu2 %v1385_v28  ;;  %1493 = vmatpush.msrb.mxu3 %v1417_v29  ;;  %v1564_v27 = vld [vmem:[#allocation11 + $0xdb8] sm:$0xff]  ;;  %v1529_v28 = vld [vmem:[#allocation11 + $0xca0] sm:$0xff] }
 0x10f   : > { %1434 = vmatpush.msrb.mxu0 %v1382_v30  ;;  %1454 = vmatpush.msrb.mxu1 %v1414_v31  ;;  %v1561_v29 = vld [vmem:[#allocation11 + $0xda0] sm:$0xff]  ;;  %v1530_v30 = vld [vmem:[#allocation11 + $0xca8] sm:$0xff] }
 0x110   : > { %1474 = vmatpush.msrb.mxu2 %v1383_v32  ;;  %1494 = vmatpush.msrb.mxu3 %v1415_v33  ;;  %v1562_v31 = vld [vmem:[#allocation11 + $0xda8] sm:$0xff]  ;;  %v1527_v32 = vld [vmem:[#allocation11 + $0xc90] sm:$0xff] }
 0x111   : > { %1435 = vmatpush.msrb.mxu0 %v1380_v34  ;;  %1455 = vmatpush.msrb.mxu1 %v1412_v35  ;;  %v1559_v33 = vld [vmem:[#allocation11 + $0xd90] sm:$0xff]  ;;  %v1528_v34 = vld [vmem:[#allocation11 + $0xc98] sm:$0xff] }
 0x112   : > { %1475 = vmatpush.msrb.mxu2 %v1381_v36  ;;  %1495 = vmatpush.msrb.mxu3 %v1413_v37  ;;  %v1560_v35 = vld [vmem:[#allocation11 + $0xd98] sm:$0xff]  ;;  %v1525_v36 = vld [vmem:[#allocation11 + $0xc80] sm:$0xff] }
 0x113   : > { %1436 = vmatpush.msrb.mxu0 %v1378_v38  ;;  %1456 = vmatpush.msrb.mxu1 %v1410_v39  ;;  %v1557_v37 = vld [vmem:[#allocation11 + $0xd80] sm:$0xff]  ;;  %v1526_v38 = vld [vmem:[#allocation11 + $0xc88] sm:$0xff] }
 0x114   : > { %1476 = vmatpush.msrb.mxu2 %v1379_v40  ;;  %1496 = vmatpush.msrb.mxu3 %v1411_v41  ;;  %v1558_v39 = vld [vmem:[#allocation11 + $0xd88] sm:$0xff]  ;;  %v1523_v40 = vld [vmem:[#allocation11 + $0xc70] sm:$0xff] }
 0x115   : > { %1437 = vmatpush.msrb.mxu0 %v1376_v42  ;;  %1457 = vmatpush.msrb.mxu1 %v1408_v43  ;;  %v1555_v41 = vld [vmem:[#allocation11 + $0xd70] sm:$0xff]  ;;  %v1524_v42 = vld [vmem:[#allocation11 + $0xc78] sm:$0xff] }
 0x116   : > { %1477 = vmatpush.msrb.mxu2 %v1377_v44  ;;  %1497 = vmatpush.msrb.mxu3 %v1409_v45  ;;  %v1556_v43 = vld [vmem:[#allocation11 + $0xd78] sm:$0xff]  ;;  %v1521_v44 = vld [vmem:[#allocation11 + $0xc60] sm:$0xff] }
 0x117   : > { %1438 = vmatpush.msrb.mxu0 %v1374_v46  ;;  %1458 = vmatpush.msrb.mxu1 %v1406_v47  ;;  %v1553_v45 = vld [vmem:[#allocation11 + $0xd60] sm:$0xff]  ;;  %v1522_v46 = vld [vmem:[#allocation11 + $0xc68] sm:$0xff] }
 0x118   : > { %1478 = vmatpush.msrb.mxu2 %v1375_v48  ;;  %1498 = vmatpush.msrb.mxu3 %v1407_v49  ;;  %v1554_v47 = vld [vmem:[#allocation11 + $0xd68] sm:$0xff]  ;;  %v1519_v48 = vld [vmem:[#allocation11 + $0xc50] sm:$0xff] }
 0x119   : > { %1439 = vmatpush.msrb.mxu0 %v1372_v50  ;;  %1459 = vmatpush.msrb.mxu1 %v1404_v51  ;;  %v1551_v49 = vld [vmem:[#allocation11 + $0xd50] sm:$0xff]  ;;  %v1520_v50 = vld [vmem:[#allocation11 + $0xc58] sm:$0xff] }
 0x11a   : > { %1479 = vmatpush.msrb.mxu2 %v1373_v52  ;;  %1499 = vmatpush.msrb.mxu3 %v1405_v53  ;;  %v1552_v51 = vld [vmem:[#allocation11 + $0xd58] sm:$0xff]  ;;  %v1517_v52 = vld [vmem:[#allocation11 + $0xc40] sm:$0xff] }
 0x11b   : > { %1440 = vmatpush.msrb.mxu0 %v1370_v54  ;;  %1460 = vmatpush.msrb.mxu1 %v1402_v55  ;;  %v1549_v53 = vld [vmem:[#allocation11 + $0xd40] sm:$0xff]  ;;  %v1518_v54 = vld [vmem:[#allocation11 + $0xc48] sm:$0xff] }
 0x11c   : > { %1480 = vmatpush.msrb.mxu2 %v1371_v56  ;;  %1500 = vmatpush.msrb.mxu3 %v1403_v57  ;;  %v1550_v55 = vld [vmem:[#allocation11 + $0xd48] sm:$0xff]  ;;  %v1515_v56 = vld [vmem:[#allocation11 + $0xc30] sm:$0xff] }
 0x11d   : > { %1441 = vmatpush.msrb.mxu0 %v1368_v58  ;;  %1461 = vmatpush.msrb.mxu1 %v1400_v59  ;;  %v1547_v57 = vld [vmem:[#allocation11 + $0xd30] sm:$0xff]  ;;  %v1516_v58 = vld [vmem:[#allocation11 + $0xc38] sm:$0xff] }
 0x11e   : > { %1481 = vmatpush.msrb.mxu2 %v1369_v60  ;;  %1501 = vmatpush.msrb.mxu3 %v1401_v61  ;;  %v1548_v59 = vld [vmem:[#allocation11 + $0xd38] sm:$0xff]  ;;  %v1513_v60 = vld [vmem:[#allocation11 + $0xc20] sm:$0xff] }
 0x11f   : > { %1442 = vmatpush.msrb.mxu0 %v1366_v62  ;;  %1462 = vmatpush.msrb.mxu1 %v1398_v63  ;;  %v1545_v61 = vld [vmem:[#allocation11 + $0xd20] sm:$0xff]  ;;  %v1514_v62 = vld [vmem:[#allocation11 + $0xc28] sm:$0xff] }
 0x120   : > { %1482 = vmatpush.msrb.mxu2 %v1367_v2  ;;  %1502 = vmatpush.msrb.mxu3 %v1399_v3  ;;  %v1546_v63 = vld [vmem:[#allocation11 + $0xd28] sm:$0xff]  ;;  %v1511_v2 = vld [vmem:[#allocation11 + $0xc10] sm:$0xff] }
 0x121   : > { %1443 = vmatpush.msrb.mxu0 %v1364_v4  ;;  %1463 = vmatpush.msrb.mxu1 %v1396_v5  ;;  %v1543_v3 = vld [vmem:[#allocation11 + $0xd10] sm:$0xff]  ;;  %v1512_v4 = vld [vmem:[#allocation11 + $0xc18] sm:$0xff] }
 0x122   : > { %1483 = vmatpush.msrb.mxu2 %v1365_v6  ;;  %1503 = vmatpush.msrb.mxu3 %v1397_v7  ;;  %v1544_v5 = vld [vmem:[#allocation11 + $0xd18] sm:$0xff]  ;;  %v1509_v6 = vld [vmem:[#allocation11 + $0xc00] sm:$0xff] }
 0x123   : > { %1299 = vmatmul.f32.vlgmr.msra.gmra.mxu0 %v4990_v10  ;;  %1319 = vmatmul.f32.vlgmr.msra.gmra.mxu1 %v4994_v11  ;;  %v1541_v7 = vld [vmem:[#allocation11 + $0xd00] sm:$0xff] }
 0x124   : > { %1339 = vmatmul.f32.vlgmr.msra.gmra.mxu2 %v4990_v10  ;;  %1359 = vmatmul.f32.vlgmr.msra.gmra.mxu3 %v4994_v11 }
 0x125   : > { %1573 = vmatpush.msra.mxu0 %v1539_v8  ;;  %1593 = vmatpush.msra.mxu1 %v1571_v9  ;;  %v1510_v8 = vld [vmem:[#allocation11 + $0xc08] sm:$0xff] }
 0x126   : > { %1613 = vmatpush.msra.mxu2 %v1540_v12  ;;  %1633 = vmatpush.msra.mxu3 %v1572_v13  ;;  %v1542_v9 = vld [vmem:[#allocation11 + $0xd08] sm:$0xff]  ;;  %v1684_v12 = vld [vmem:[#allocation11 + $0xef0] sm:$0xff] }
 0x127   : > { %1574 = vmatpush.msra.mxu0 %v1537_v14  ;;  %1594 = vmatpush.msra.mxu1 %v1569_v15  ;;  %v1716_v13 = vld [vmem:[#allocation11 + $0xff0] sm:$0xff]  ;;  %v1685_v14 = vld [vmem:[#allocation11 + $0xef8] sm:$0xff] }
 0x128   : > { %1614 = vmatpush.msra.mxu2 %v1538_v16  ;;  %1634 = vmatpush.msra.mxu3 %v1570_v17  ;;  %v1717_v15 = vld [vmem:[#allocation11 + $0xff8] sm:$0xff]  ;;  %v1682_v16 = vld [vmem:[#allocation11 + $0xee0] sm:$0xff] }
 0x129   : > { %1575 = vmatpush.msra.mxu0 %v1535_v18  ;;  %1595 = vmatpush.msra.mxu1 %v1567_v19  ;;  %v1714_v17 = vld [vmem:[#allocation11 + $0xfe0] sm:$0xff]  ;;  %v1683_v18 = vld [vmem:[#allocation11 + $0xee8] sm:$0xff] }
 0x12a   : > { %1615 = vmatpush.msra.mxu2 %v1536_v20  ;;  %1635 = vmatpush.msra.mxu3 %v1568_v0  ;;  %v1715_v19 = vld [vmem:[#allocation11 + $0xfe8] sm:$0xff]  ;;  %v1680_v20 = vld [vmem:[#allocation11 + $0xed0] sm:$0xff] }
 0x12b   : > { %1576 = vmatpush.msra.mxu0 %v1533_v1  ;;  %1596 = vmatpush.msra.mxu1 %v1565_v21  ;;  %v1712_v0 = vld [vmem:[#allocation11 + $0xfd0] sm:$0xff]  ;;  %v1681_v1 = vld [vmem:[#allocation11 + $0xed8] sm:$0xff] }
 0x12c   : > { %1616 = vmatpush.msra.mxu2 %v1534_v22  ;;  %1636 = vmatpush.msra.mxu3 %v1566_v23  ;;  %v1713_v21 = vld [vmem:[#allocation11 + $0xfd8] sm:$0xff]  ;;  %v1678_v22 = vld [vmem:[#allocation11 + $0xec0] sm:$0xff] }
 0x12d   : > { %1577 = vmatpush.msra.mxu0 %v1531_v24  ;;  %1597 = vmatpush.msra.mxu1 %v1563_v25  ;;  %v1710_v23 = vld [vmem:[#allocation11 + $0xfc0] sm:$0xff]  ;;  %v1679_v24 = vld [vmem:[#allocation11 + $0xec8] sm:$0xff] }
 0x12e   : > { %1617 = vmatpush.msra.mxu2 %v1532_v26  ;;  %1637 = vmatpush.msra.mxu3 %v1564_v27  ;;  %v1711_v25 = vld [vmem:[#allocation11 + $0xfc8] sm:$0xff]  ;;  %v1676_v26 = vld [vmem:[#allocation11 + $0xeb0] sm:$0xff] }
 0x12f   : > { %1578 = vmatpush.msra.mxu0 %v1529_v28  ;;  %1598 = vmatpush.msra.mxu1 %v1561_v29  ;;  %v1708_v27 = vld [vmem:[#allocation11 + $0xfb0] sm:$0xff]  ;;  %v1677_v28 = vld [vmem:[#allocation11 + $0xeb8] sm:$0xff] }
 0x130   : > { %1618 = vmatpush.msra.mxu2 %v1530_v30  ;;  %1638 = vmatpush.msra.mxu3 %v1562_v31  ;;  %v1709_v29 = vld [vmem:[#allocation11 + $0xfb8] sm:$0xff]  ;;  %v1674_v30 = vld [vmem:[#allocation11 + $0xea0] sm:$0xff] }
 0x131   : > { %1579 = vmatpush.msra.mxu0 %v1527_v32  ;;  %1599 = vmatpush.msra.mxu1 %v1559_v33  ;;  %v1706_v31 = vld [vmem:[#allocation11 + $0xfa0] sm:$0xff]  ;;  %v1675_v32 = vld [vmem:[#allocation11 + $0xea8] sm:$0xff] }
 0x132   : > { %1619 = vmatpush.msra.mxu2 %v1528_v34  ;;  %1639 = vmatpush.msra.mxu3 %v1560_v35  ;;  %v1707_v33 = vld [vmem:[#allocation11 + $0xfa8] sm:$0xff]  ;;  %v1672_v34 = vld [vmem:[#allocation11 + $0xe90] sm:$0xff] }
 0x133   : > { %1580 = vmatpush.msra.mxu0 %v1525_v36  ;;  %1600 = vmatpush.msra.mxu1 %v1557_v37  ;;  %v1704_v35 = vld [vmem:[#allocation11 + $0xf90] sm:$0xff]  ;;  %v1673_v36 = vld [vmem:[#allocation11 + $0xe98] sm:$0xff] }
 0x134   : > { %1620 = vmatpush.msra.mxu2 %v1526_v38  ;;  %1640 = vmatpush.msra.mxu3 %v1558_v39  ;;  %v1705_v37 = vld [vmem:[#allocation11 + $0xf98] sm:$0xff]  ;;  %v1670_v38 = vld [vmem:[#allocation11 + $0xe80] sm:$0xff] }
 0x135   : > { %1581 = vmatpush.msra.mxu0 %v1523_v40  ;;  %1601 = vmatpush.msra.mxu1 %v1555_v41  ;;  %v1702_v39 = vld [vmem:[#allocation11 + $0xf80] sm:$0xff]  ;;  %v1671_v40 = vld [vmem:[#allocation11 + $0xe88] sm:$0xff] }
 0x136   : > { %1621 = vmatpush.msra.mxu2 %v1524_v42  ;;  %1641 = vmatpush.msra.mxu3 %v1556_v43  ;;  %v1703_v41 = vld [vmem:[#allocation11 + $0xf88] sm:$0xff]  ;;  %v1668_v42 = vld [vmem:[#allocation11 + $0xe70] sm:$0xff] }
 0x137   : > { %1582 = vmatpush.msra.mxu0 %v1521_v44  ;;  %1602 = vmatpush.msra.mxu1 %v1553_v45  ;;  %v1700_v43 = vld [vmem:[#allocation11 + $0xf70] sm:$0xff]  ;;  %v1669_v44 = vld [vmem:[#allocation11 + $0xe78] sm:$0xff] }
 0x138   : > { %1622 = vmatpush.msra.mxu2 %v1522_v46  ;;  %1642 = vmatpush.msra.mxu3 %v1554_v47  ;;  %v1701_v45 = vld [vmem:[#allocation11 + $0xf78] sm:$0xff]  ;;  %v1666_v46 = vld [vmem:[#allocation11 + $0xe60] sm:$0xff] }
 0x139   : > { %1583 = vmatpush.msra.mxu0 %v1519_v48  ;;  %1603 = vmatpush.msra.mxu1 %v1551_v49  ;;  %v1698_v47 = vld [vmem:[#allocation11 + $0xf60] sm:$0xff]  ;;  %v1667_v48 = vld [vmem:[#allocation11 + $0xe68] sm:$0xff] }
 0x13a   : > { %1623 = vmatpush.msra.mxu2 %v1520_v50  ;;  %1643 = vmatpush.msra.mxu3 %v1552_v51  ;;  %v1699_v49 = vld [vmem:[#allocation11 + $0xf68] sm:$0xff]  ;;  %v1664_v50 = vld [vmem:[#allocation11 + $0xe50] sm:$0xff] }
 0x13b   : > { %1584 = vmatpush.msra.mxu0 %v1517_v52  ;;  %1604 = vmatpush.msra.mxu1 %v1549_v53  ;;  %v1696_v51 = vld [vmem:[#allocation11 + $0xf50] sm:$0xff]  ;;  %v1665_v52 = vld [vmem:[#allocation11 + $0xe58] sm:$0xff] }
 0x13c   : > { %1624 = vmatpush.msra.mxu2 %v1518_v54  ;;  %1644 = vmatpush.msra.mxu3 %v1550_v55  ;;  %v1697_v53 = vld [vmem:[#allocation11 + $0xf58] sm:$0xff]  ;;  %v1662_v54 = vld [vmem:[#allocation11 + $0xe40] sm:$0xff] }
 0x13d   : > { %1585 = vmatpush.msra.mxu0 %v1515_v56  ;;  %1605 = vmatpush.msra.mxu1 %v1547_v57  ;;  %v1694_v55 = vld [vmem:[#allocation11 + $0xf40] sm:$0xff]  ;;  %v1663_v56 = vld [vmem:[#allocation11 + $0xe48] sm:$0xff] }
 0x13e   : > { %1625 = vmatpush.msra.mxu2 %v1516_v58  ;;  %1645 = vmatpush.msra.mxu3 %v1548_v59  ;;  %v1695_v57 = vld [vmem:[#allocation11 + $0xf48] sm:$0xff]  ;;  %v1660_v58 = vld [vmem:[#allocation11 + $0xe30] sm:$0xff] }
 0x13f   : > { %1586 = vmatpush.msra.mxu0 %v1513_v60  ;;  %1606 = vmatpush.msra.mxu1 %v1545_v61  ;;  %v1692_v59 = vld [vmem:[#allocation11 + $0xf30] sm:$0xff]  ;;  %v1661_v60 = vld [vmem:[#allocation11 + $0xe38] sm:$0xff] }
 0x140   : > { %1626 = vmatpush.msra.mxu2 %v1514_v62  ;;  %1646 = vmatpush.msra.mxu3 %v1546_v63  ;;  %v1693_v61 = vld [vmem:[#allocation11 + $0xf38] sm:$0xff]  ;;  %v1658_v62 = vld [vmem:[#allocation11 + $0xe20] sm:$0xff] }
 0x141   : > { %1587 = vmatpush.msra.mxu0 %v1511_v2  ;;  %1607 = vmatpush.msra.mxu1 %v1543_v3  ;;  %v1690_v63 = vld [vmem:[#allocation11 + $0xf20] sm:$0xff]  ;;  %v1659_v2 = vld [vmem:[#allocation11 + $0xe28] sm:$0xff] }
 0x142   : > { %1627 = vmatpush.msra.mxu2 %v1512_v4  ;;  %1647 = vmatpush.msra.mxu3 %v1544_v5  ;;  %v1691_v3 = vld [vmem:[#allocation11 + $0xf28] sm:$0xff]  ;;  %v1656_v4 = vld [vmem:[#allocation11 + $0xe10] sm:$0xff] }
 0x143   : > { %1588 = vmatpush.msra.mxu0 %v1509_v6  ;;  %1608 = vmatpush.msra.mxu1 %v1541_v7  ;;  %v1688_v5 = vld [vmem:[#allocation11 + $0xf10] sm:$0xff]  ;;  %v1657_v6 = vld [vmem:[#allocation11 + $0xe18] sm:$0xff] }
 0x144   : > { %1628 = vmatpush.msra.mxu2 %v1510_v8  ;;  %1648 = vmatpush.msra.mxu3 %v1542_v9  ;;  %v1689_v7 = vld [vmem:[#allocation11 + $0xf18] sm:$0xff]  ;;  %v1654_v8 = vld [vmem:[#allocation11 + $0xe00] sm:$0xff] }
 0x145   : > { %1444 = vmatmul.f32.vlgmr.msrb.gmra.mxu0 %v4990_v10  ;;  %1464 = vmatmul.f32.vlgmr.msrb.gmra.mxu1 %v4994_v11  ;;  %v1686_v9 = vld [vmem:[#allocation11 + $0xf00] sm:$0xff] }
 0x146   : > { %1484 = vmatmul.f32.vlgmr.msrb.gmra.mxu2 %v4990_v10  ;;  %1504 = vmatmul.f32.vlgmr.msrb.gmra.mxu3 %v4994_v11 }
 0x147   : > { %1718 = vmatpush.msrb.mxu0 %v1684_v12  ;;  %1738 = vmatpush.msrb.mxu1 %v1716_v13  ;;  %v1655_v12 = vld [vmem:[#allocation11 + $0xe08] sm:$0xff] }
 0x148   : > { %1758 = vmatpush.msrb.mxu2 %v1685_v14  ;;  %1778 = vmatpush.msrb.mxu3 %v1717_v15  ;;  %v1687_v13 = vld [vmem:[#allocation11 + $0xf08] sm:$0xff]  ;;  %v1829_v14 = vld [vmem:[#allocation11 + $0x10f0] sm:$0xff] }
 0x149   : > { %1719 = vmatpush.msrb.mxu0 %v1682_v16  ;;  %1739 = vmatpush.msrb.mxu1 %v1714_v17  ;;  %v1861_v15 = vld [vmem:[#allocation11 + $0x11f0] sm:$0xff]  ;;  %v1830_v16 = vld [vmem:[#allocation11 + $0x10f8] sm:$0xff] }
 0x14a   : > { %1759 = vmatpush.msrb.mxu2 %v1683_v18  ;;  %1779 = vmatpush.msrb.mxu3 %v1715_v19  ;;  %v1862_v17 = vld [vmem:[#allocation11 + $0x11f8] sm:$0xff]  ;;  %v1827_v18 = vld [vmem:[#allocation11 + $0x10e0] sm:$0xff] }
 0x14b   : > { %1720 = vmatpush.msrb.mxu0 %v1680_v20  ;;  %1740 = vmatpush.msrb.mxu1 %v1712_v0  ;;  %v1859_v19 = vld [vmem:[#allocation11 + $0x11e0] sm:$0xff]  ;;  %v1828_v20 = vld [vmem:[#allocation11 + $0x10e8] sm:$0xff] }
 0x14c   : > { %1760 = vmatpush.msrb.mxu2 %v1681_v1  ;;  %1780 = vmatpush.msrb.mxu3 %v1713_v21  ;;  %v1860_v0 = vld [vmem:[#allocation11 + $0x11e8] sm:$0xff]  ;;  %v1825_v1 = vld [vmem:[#allocation11 + $0x10d0] sm:$0xff] }
 0x14d   : > { %1721 = vmatpush.msrb.mxu0 %v1678_v22  ;;  %1741 = vmatpush.msrb.mxu1 %v1710_v23  ;;  %v1857_v21 = vld [vmem:[#allocation11 + $0x11d0] sm:$0xff]  ;;  %v1826_v22 = vld [vmem:[#allocation11 + $0x10d8] sm:$0xff] }
 0x14e   : > { %1761 = vmatpush.msrb.mxu2 %v1679_v24  ;;  %1781 = vmatpush.msrb.mxu3 %v1711_v25  ;;  %v1858_v23 = vld [vmem:[#allocation11 + $0x11d8] sm:$0xff]  ;;  %v1823_v24 = vld [vmem:[#allocation11 + $0x10c0] sm:$0xff] }
 0x14f   : > { %1722 = vmatpush.msrb.mxu0 %v1676_v26  ;;  %1742 = vmatpush.msrb.mxu1 %v1708_v27  ;;  %v1855_v25 = vld [vmem:[#allocation11 + $0x11c0] sm:$0xff]  ;;  %v1824_v26 = vld [vmem:[#allocation11 + $0x10c8] sm:$0xff] }
 0x150   : > { %1762 = vmatpush.msrb.mxu2 %v1677_v28  ;;  %1782 = vmatpush.msrb.mxu3 %v1709_v29  ;;  %v1856_v27 = vld [vmem:[#allocation11 + $0x11c8] sm:$0xff]  ;;  %v1821_v28 = vld [vmem:[#allocation11 + $0x10b0] sm:$0xff] }
 0x151   : > { %1723 = vmatpush.msrb.mxu0 %v1674_v30  ;;  %1743 = vmatpush.msrb.mxu1 %v1706_v31  ;;  %v1853_v29 = vld [vmem:[#allocation11 + $0x11b0] sm:$0xff]  ;;  %v1822_v30 = vld [vmem:[#allocation11 + $0x10b8] sm:$0xff] }
 0x152   : > { %1763 = vmatpush.msrb.mxu2 %v1675_v32  ;;  %1783 = vmatpush.msrb.mxu3 %v1707_v33  ;;  %v1854_v31 = vld [vmem:[#allocation11 + $0x11b8] sm:$0xff]  ;;  %v1819_v32 = vld [vmem:[#allocation11 + $0x10a0] sm:$0xff] }
 0x153   : > { %1724 = vmatpush.msrb.mxu0 %v1672_v34  ;;  %1744 = vmatpush.msrb.mxu1 %v1704_v35  ;;  %v1851_v33 = vld [vmem:[#allocation11 + $0x11a0] sm:$0xff]  ;;  %v1820_v34 = vld [vmem:[#allocation11 + $0x10a8] sm:$0xff] }
 0x154   : > { %1764 = vmatpush.msrb.mxu2 %v1673_v36  ;;  %1784 = vmatpush.msrb.mxu3 %v1705_v37  ;;  %v1852_v35 = vld [vmem:[#allocation11 + $0x11a8] sm:$0xff]  ;;  %v1817_v36 = vld [vmem:[#allocation11 + $0x1090] sm:$0xff] }
 0x155   : > { %1725 = vmatpush.msrb.mxu0 %v1670_v38  ;;  %1745 = vmatpush.msrb.mxu1 %v1702_v39  ;;  %v1849_v37 = vld [vmem:[#allocation11 + $0x1190] sm:$0xff]  ;;  %v1818_v38 = vld [vmem:[#allocation11 + $0x1098] sm:$0xff] }
 0x156   : > { %1765 = vmatpush.msrb.mxu2 %v1671_v40  ;;  %1785 = vmatpush.msrb.mxu3 %v1703_v41  ;;  %v1850_v39 = vld [vmem:[#allocation11 + $0x1198] sm:$0xff]  ;;  %v1815_v40 = vld [vmem:[#allocation11 + $0x1080] sm:$0xff] }
 0x157   : > { %1726 = vmatpush.msrb.mxu0 %v1668_v42  ;;  %1746 = vmatpush.msrb.mxu1 %v1700_v43  ;;  %v1847_v41 = vld [vmem:[#allocation11 + $0x1180] sm:$0xff]  ;;  %v1816_v42 = vld [vmem:[#allocation11 + $0x1088] sm:$0xff] }
 0x158   : > { %1766 = vmatpush.msrb.mxu2 %v1669_v44  ;;  %1786 = vmatpush.msrb.mxu3 %v1701_v45  ;;  %v1848_v43 = vld [vmem:[#allocation11 + $0x1188] sm:$0xff]  ;;  %v1813_v44 = vld [vmem:[#allocation11 + $0x1070] sm:$0xff] }
 0x159   : > { %1727 = vmatpush.msrb.mxu0 %v1666_v46  ;;  %1747 = vmatpush.msrb.mxu1 %v1698_v47  ;;  %v1845_v45 = vld [vmem:[#allocation11 + $0x1170] sm:$0xff]  ;;  %v1814_v46 = vld [vmem:[#allocation11 + $0x1078] sm:$0xff] }
 0x15a   : > { %1767 = vmatpush.msrb.mxu2 %v1667_v48  ;;  %1787 = vmatpush.msrb.mxu3 %v1699_v49  ;;  %v1846_v47 = vld [vmem:[#allocation11 + $0x1178] sm:$0xff]  ;;  %v1811_v48 = vld [vmem:[#allocation11 + $0x1060] sm:$0xff] }
 0x15b   : > { %1728 = vmatpush.msrb.mxu0 %v1664_v50  ;;  %1748 = vmatpush.msrb.mxu1 %v1696_v51  ;;  %v1843_v49 = vld [vmem:[#allocation11 + $0x1160] sm:$0xff]  ;;  %v1812_v50 = vld [vmem:[#allocation11 + $0x1068] sm:$0xff] }
 0x15c   : > { %1768 = vmatpush.msrb.mxu2 %v1665_v52  ;;  %1788 = vmatpush.msrb.mxu3 %v1697_v53  ;;  %v1844_v51 = vld [vmem:[#allocation11 + $0x1168] sm:$0xff]  ;;  %v1809_v52 = vld [vmem:[#allocation11 + $0x1050] sm:$0xff] }
 0x15d   : > { %1729 = vmatpush.msrb.mxu0 %v1662_v54  ;;  %1749 = vmatpush.msrb.mxu1 %v1694_v55  ;;  %v1841_v53 = vld [vmem:[#allocation11 + $0x1150] sm:$0xff]  ;;  %v1810_v54 = vld [vmem:[#allocation11 + $0x1058] sm:$0xff] }
 0x15e   : > { %1769 = vmatpush.msrb.mxu2 %v1663_v56  ;;  %1789 = vmatpush.msrb.mxu3 %v1695_v57  ;;  %v1842_v55 = vld [vmem:[#allocation11 + $0x1158] sm:$0xff]  ;;  %v1807_v56 = vld [vmem:[#allocation11 + $0x1040] sm:$0xff] }
 0x15f   : > { %1730 = vmatpush.msrb.mxu0 %v1660_v58  ;;  %1750 = vmatpush.msrb.mxu1 %v1692_v59  ;;  %v1839_v57 = vld [vmem:[#allocation11 + $0x1140] sm:$0xff]  ;;  %v1808_v58 = vld [vmem:[#allocation11 + $0x1048] sm:$0xff] }
 0x160   : > { %1770 = vmatpush.msrb.mxu2 %v1661_v60  ;;  %1790 = vmatpush.msrb.mxu3 %v1693_v61  ;;  %v1840_v59 = vld [vmem:[#allocation11 + $0x1148] sm:$0xff]  ;;  %v1805_v60 = vld [vmem:[#allocation11 + $0x1030] sm:$0xff] }
 0x161   : > { %1731 = vmatpush.msrb.mxu0 %v1658_v62  ;;  %1751 = vmatpush.msrb.mxu1 %v1690_v63  ;;  %v1837_v61 = vld [vmem:[#allocation11 + $0x1130] sm:$0xff]  ;;  %v1806_v62 = vld [vmem:[#allocation11 + $0x1038] sm:$0xff] }
 0x162   : > { %1771 = vmatpush.msrb.mxu2 %v1659_v2  ;;  %1791 = vmatpush.msrb.mxu3 %v1691_v3  ;;  %v1838_v63 = vld [vmem:[#allocation11 + $0x1138] sm:$0xff]  ;;  %v1803_v2 = vld [vmem:[#allocation11 + $0x1020] sm:$0xff] }
 0x163   : > { %1732 = vmatpush.msrb.mxu0 %v1656_v4  ;;  %1752 = vmatpush.msrb.mxu1 %v1688_v5  ;;  %v1835_v3 = vld [vmem:[#allocation11 + $0x1120] sm:$0xff]  ;;  %v1804_v4 = vld [vmem:[#allocation11 + $0x1028] sm:$0xff] }
 0x164   : > { %1772 = vmatpush.msrb.mxu2 %v1657_v6  ;;  %1792 = vmatpush.msrb.mxu3 %v1689_v7  ;;  %v1836_v5 = vld [vmem:[#allocation11 + $0x1128] sm:$0xff]  ;;  %v1801_v6 = vld [vmem:[#allocation11 + $0x1010] sm:$0xff] }
 0x165   : > { %1733 = vmatpush.msrb.mxu0 %v1654_v8  ;;  %1753 = vmatpush.msrb.mxu1 %v1686_v9  ;;  %v1833_v7 = vld [vmem:[#allocation11 + $0x1110] sm:$0xff]  ;;  %v1802_v8 = vld [vmem:[#allocation11 + $0x1018] sm:$0xff] }
 0x166   : > { %1773 = vmatpush.msrb.mxu2 %v1655_v12  ;;  %1793 = vmatpush.msrb.mxu3 %v1687_v13  ;;  %v1834_v9 = vld [vmem:[#allocation11 + $0x1118] sm:$0xff]  ;;  %v1799_v12 = vld [vmem:[#allocation11 + $0x1000] sm:$0xff] }
 0x167   : > { %1589 = vmatmul.f32.vlgmr.msra.gmra.mxu0 %v4990_v10  ;;  %1609 = vmatmul.f32.vlgmr.msra.gmra.mxu1 %v4994_v11  ;;  %v1831_v13 = vld [vmem:[#allocation11 + $0x1100] sm:$0xff] }
 0x168   : > { %1629 = vmatmul.f32.vlgmr.msra.gmra.mxu2 %v4990_v10  ;;  %1649 = vmatmul.f32.vlgmr.msra.gmra.mxu3 %v4994_v11 }
 0x169   : > { %1863 = vmatpush.msra.mxu0 %v1829_v14  ;;  %1883 = vmatpush.msra.mxu1 %v1861_v15  ;;  %v1800_v14 = vld [vmem:[#allocation11 + $0x1008] sm:$0xff] }
 0x16a   : > { %1903 = vmatpush.msra.mxu2 %v1830_v16  ;;  %1923 = vmatpush.msra.mxu3 %v1862_v17  ;;  %v1832_v15 = vld [vmem:[#allocation11 + $0x1108] sm:$0xff]  ;;  %v5015_v16 = vpop.f32.mrf.mxu0  ;;  %v5017_v17 = vpop.f32.mrf.mxu1 }
 0x16b   : > { %1864 = vmatpush.msra.mxu0 %v1827_v18  ;;  %1884 = vmatpush.msra.mxu1 %v1859_v19  ;;  %v5019_v18 = vpop.f32.mrf.mxu2  ;;  %v5021_v19 = vpop.f32.mrf.mxu3 }
 0x16c   : > { %1904 = vmatpush.msra.mxu2 %v1828_v20  ;;  %1924 = vmatpush.msra.mxu3 %v1860_v0 }
 0x16d   : > { %1865 = vmatpush.msra.mxu0 %v1825_v1  ;;  %1885 = vmatpush.msra.mxu1 %v1857_v21 }
 0x16e   : > { %1905 = vmatpush.msra.mxu2 %v1826_v22  ;;  %1925 = vmatpush.msra.mxu3 %v1858_v23 }
 0x16f   : > { %1866 = vmatpush.msra.mxu0 %v1823_v24  ;;  %1886 = vmatpush.msra.mxu1 %v1855_v25 }
 0x170   : > { %1906 = vmatpush.msra.mxu2 %v1824_v26  ;;  %1926 = vmatpush.msra.mxu3 %v1856_v27 }
 0x171   : > { %1867 = vmatpush.msra.mxu0 %v1821_v28  ;;  %1887 = vmatpush.msra.mxu1 %v1853_v29 }
 0x172   : > { %1907 = vmatpush.msra.mxu2 %v1822_v30  ;;  %1927 = vmatpush.msra.mxu3 %v1854_v31  ;;  %v5023_v20 = vpop.f32.mrf.mxu0  ;;  %v5025_v0 = vpop.f32.mrf.mxu1 }
 0x173   : > { %1868 = vmatpush.msra.mxu0 %v1819_v32  ;;  %1888 = vmatpush.msra.mxu1 %v1851_v33  ;;  %v5027_v1 = vpop.f32.mrf.mxu2  ;;  %v5029_v21 = vpop.f32.mrf.mxu3 }
 0x174   : > { %1908 = vmatpush.msra.mxu2 %v1820_v34  ;;  %1928 = vmatpush.msra.mxu3 %v1852_v35  ;;  %v4718_v34 = vmov 0   ;;  %v1999_v35 = vld [vmem:[%s7246_s2 + $0x8] sm:$0xff] }
 0x175   : > { %1869 = vmatpush.msra.mxu0 %v1817_v36  ;;  %1889 = vmatpush.msra.mxu1 %v1849_v37  ;;  %v2015_v36 = vld [vmem:[%s7247_s3 + $0x8] sm:$0xff] }
 0x176   : > { %1909 = vmatpush.msra.mxu2 %v1818_v38  ;;  %1929 = vmatpush.msra.mxu3 %v1850_v39 }
 0x177   : > { %1870 = vmatpush.msra.mxu0 %v1815_v40  ;;  %1890 = vmatpush.msra.mxu1 %v1847_v41  ;;  %v1998_v41 = vld [vmem:[%s7246_s2] sm:$0xff] }
 0x178   : > { %1910 = vmatpush.msra.mxu2 %v1816_v42  ;;  %1930 = vmatpush.msra.mxu3 %v1848_v43  ;;  %v2014_v42 = vld [vmem:[%s7247_s3] sm:$0xff] }
 0x179   : > { %1871 = vmatpush.msra.mxu0 %v1813_v44  ;;  %1891 = vmatpush.msra.mxu1 %v1845_v45 }
 0x17a   : > { %1911 = vmatpush.msra.mxu2 %v1814_v46  ;;  %1931 = vmatpush.msra.mxu3 %v1846_v47  ;;  %v5031_v22 = vpop.f32.mrf.mxu0  ;;  %v2784_v47 = vld [vmem:[%s7252_s8] sm:$0xff] }
 0x17b   : > { %1872 = vmatpush.msra.mxu0 %v1811_v48  ;;  %1892 = vmatpush.msra.mxu1 %v1843_v49  ;;  %v5037_v23 = vpop.f32.mrf.mxu3  ;;  %v2798_v48 = vld [vmem:[%s7253_s9] sm:$0xff] }
 0x17c   : > { %1912 = vmatpush.msra.mxu2 %v1812_v50  ;;  %1932 = vmatpush.msra.mxu3 %v1844_v51  ;;  %v2799_v51 = vld [vmem:[%s7253_s9 + $0x8] sm:$0xff] }
 0x17d   : > { %1873 = vmatpush.msra.mxu0 %v1809_v52  ;;  %1893 = vmatpush.msra.mxu1 %v1841_v53  ;;  %v3680_v52 = vld [vmem:[%s7255_s11] sm:$0xff] }
 0x17e   : > { %1913 = vmatpush.msra.mxu2 %v1810_v54  ;;  %1933 = vmatpush.msra.mxu3 %v1842_v55 }
 0x17f   : > { %1874 = vmatpush.msra.mxu0 %v1807_v56  ;;  %1894 = vmatpush.msra.mxu1 %v1839_v57 }
 0x180   : > { %1914 = vmatpush.msra.mxu2 %v1808_v58  ;;  %1934 = vmatpush.msra.mxu3 %v1840_v59  ;;  %v3694_v58 = vld [vmem:[%s7406_s27] sm:$0xff]  ;;  %v3695_v59 = vld [vmem:[%s7406_s27 + $0x8] sm:$0xff] }
 0x181   : > { %1734 = vmatmul.f32.vlgmr.msrb.gmra.mxu0 %v4990_v10  ;;  %1754 = vmatmul.f32.vlgmr.msrb.gmra.mxu1 %v4994_v11 }
 0x182   : > { %1774 = vmatmul.f32.vlgmr.msrb.gmra.mxu2 %v4990_v10  ;;  %1794 = vmatmul.f32.vlgmr.msrb.gmra.mxu3 %v4994_v11  ;;  %v1155_v24 = vpop.f32.mrf.mxu0 }
 0x183   : > { %1875 = vmatpush.msra.mxu0 %v1805_v60  ;;  %1895 = vmatpush.msra.mxu1 %v1837_v61 }
 0x184   : > { %1915 = vmatpush.msra.mxu2 %v1806_v62  ;;  %1935 = vmatpush.msra.mxu3 %v1838_v63 }
 0x185   : > { %1876 = vmatpush.msra.mxu0 %v1803_v2  ;;  %1896 = vmatpush.msra.mxu1 %v1835_v3  ;;  %v5041_v27 = vpop.f32.mrf.mxu3 }
 0x186   : > { %1916 = vmatpush.msra.mxu2 %v1804_v4  ;;  %1936 = vmatpush.msra.mxu3 %v1836_v5 }
 0x187   : > { %1877 = vmatpush.msra.mxu0 %v1801_v6  ;;  %1897 = vmatpush.msra.mxu1 %v1833_v7 }
 0x188   : > { %1917 = vmatpush.msra.mxu2 %v1802_v8  ;;  %1937 = vmatpush.msra.mxu3 %v1834_v9  ;;  %v886_v8 = vadd.f32 %v5025_v0, %v5023_v20  ;;  %v926_v20 = vadd.f32 %v5029_v21, %v5027_v1  ;;  %v2079_v0 = vld [vmem:[%s7407_s5] sm:$0xff]  ;;  %v3900_v1 = vld [vmem:[%s7408_s25 + $0x178] sm:$0xff]  ;;  %v3898_v21 = vld [vmem:[%s7408_s25 + $0x168] sm:$0xff]  ;;  %s3725_s5 = sshll.u32 %s636_s13, 4  ;;  %s3726_s5 = int_to_ptr.vmem [resolvable:$true] %s3725_s5 }
 0x189   : > { %1878 = vmatpush.msra.mxu0 %v1799_v12  ;;  %1898 = vmatpush.msra.mxu1 %v1831_v13  ;;  %v741_v12 = vadd.f32 %v5017_v17, %v5015_v16  ;;  %v1943_v13 = vld [vmem:[#allocation5] sm:$0xff]  ;;  %v781_v16 = vadd.f32 %v5021_v19, %v5019_v18  ;;  %v1944_v17 = vld [vmem:[#allocation5 + $0x8] sm:$0xff]  ;;  %v3899_v18 = vld [vmem:[%s7408_s25 + $0x170] sm:$0xff] }
 0x18a   : > { %1918 = vmatpush.msra.mxu2 %v1800_v14  ;;  %1938 = vmatpush.msra.mxu3 %v1832_v15 }
 0x18b   : > { %1879 = vmatmul.f32.vlgmr.msra.gmra.mxu0 %v4990_v10  ;;  %1899 = vmatmul.f32.vlgmr.msra.gmra.mxu1 %v4994_v11 }
 0x18c   : > { %1919 = vmatmul.f32.vlgmr.msra.gmra.mxu2 %v4990_v10  ;;  %1939 = vmatmul.f32.vlgmr.msra.gmra.mxu3 %v4994_v11  ;;  %v5033_v10 = vpop.f32.mrf.mxu1  ;;  %v5035_v11 = vpop.f32.mrf.mxu2 }
 0x18d   : > { %4304 = vset.pattern.permute.xlu0 %v4718_v34  ;;  %4305 = vset.pattern.permute.xlu1 %v4718_v34  ;;  %v1031_v6 = vadd.f32 %v5033_v10, %v5031_v22  ;;  %v1071_v15 = vadd.f32 %v5037_v23, %v5035_v11  ;;  %v3916_v22 = vld [vmem:[%s7408_s25 + $0x1f8] sm:$0xff]  ;;  %v3897_v10 = vld [vmem:[%s7408_s25 + $0x160] sm:$0xff]  ;;  %v3915_v11 = vld [vmem:[%s7408_s25 + $0x1f0] sm:$0xff] }
 0x18e   : > { %4306 = vset.pattern.permute.xlu2 %v4718_v34  ;;  %2007 = vperm.xlu0 %4304, %v1999_v35   ;;  %v2087_v23 = vld [vmem:[%s7409_s10] sm:$0xff]  ;;  %s4642_s10 = scalar_lea.hbm %s4641_s20, 16 }
 0x18f   : > { %2023 = vperm.xlu1 %4305, %v2015_v36   ;;  %2082 = vperm.xlu2 %4306, %v2079_v0   ;;  %v3893_v34 = vld [vmem:[%s7408_s25 + $0x140] sm:$0xff]  ;;  %p4643_p1 = scmp.ne.s32.totalorder %s4641_s20, %s4642_s10  ;;  %p4648_p7 = scmp.lt.s32.totalorder %s4646_s15, %s4642_s10 }
 0x190   : > { %v2125_v0 = vld [vmem:[%s7408_s25 + $0xe0] sm:$0xff] }
 0x191   : > { %p4644_p3 = pnand %p4643_p1, %p4912_p4  ;;  %p4649_p8 = por %p4648_p7, %p4647_p12 }
 0x193   : > { %p4645_p5 = pneg %p4644_p3 }
 0x194   : > { %v1175_v25 = vpop.f32.mrf.mxu1  ;;  %v5039_v26 = vpop.f32.mrf.mxu2 }
 0x195   : > { %v1176_v4 = vadd.f32 %v1175_v25, %v1155_v24  ;;  %v1216_v14 = vadd.f32 %v5041_v27, %v5039_v26  ;;  %v3896_v26 = vld [vmem:[%s7408_s25 + $0x158] sm:$0xff]  ;;  %v3914_v27 = vld [vmem:[%s7408_s25 + $0x1e8] sm:$0xff]  ;;  %p4650_p9 = pnand %p4649_p8, %p4645_p5 }
 0x196   : > { %2002 = vperm.xlu0 %4304, %v1998_v41  }
 0x197   : > { %2018 = vperm.xlu1 %4305, %v2014_v42   ;;  %2090 = vperm.xlu2 %4306, %v2087_v23   ;;  %v3909_v42 = vld [vmem:[%s7408_s25 + $0x1c0] sm:$0xff] }
 0x198   : > { %v2121_v23 = vld [vmem:[%s7408_s25 + $0xc0] sm:$0xff] }
 0x19e   : > { %2788 = vperm.xlu0 %4304, %v2784_v47   ;;  %v3908_v47 = vld [vmem:[%s7408_s25 + $0x1b8] sm:$0xff] }
 0x19f   : > { %2802 = vperm.xlu1 %4305, %v2798_v48   ;;  %v3890_v48 = vld [vmem:[%s7408_s25 + $0x128] sm:$0xff] }
 0x1a0   : > { %v1300_v28 = vpop.f32.mrf.mxu0  ;;  %v1320_v29 = vpop.f32.mrf.mxu1 }
 0x1a1   : > { %v1321_v2 = vadd.f32 %v1320_v29, %v1300_v28  ;;  %v3913_v28 = vld [vmem:[%s7408_s25 + $0x1e0] sm:$0xff]  ;;  %v3895_v29 = vld [vmem:[%s7408_s25 + $0x150] sm:$0xff] }
 0x1a6   : > { %2807 = vperm.xlu0 %4304, %v2799_v51  }
 0x1a7   : > { %v5043_v30 = vpop.f32.mrf.mxu2  ;;  %v5045_v31 = vpop.f32.mrf.mxu3  ;;  %3684 = vperm.xlu1 %4305, %v3680_v52   ;;  %v3889_v52 = vld [vmem:[%s7408_s25 + $0x120] sm:$0xff] }
 0x1a8   : > { %v1361_v9 = vadd.f32 %v5045_v31, %v5043_v30  ;;  %v3912_v30 = vld [vmem:[%s7408_s25 + $0x1d8] sm:$0xff]  ;;  %v3894_v31 = vld [vmem:[%s7408_s25 + $0x148] sm:$0xff] }
 0x1ae   : > { %3698 = vperm.xlu0 %4304, %v3694_v58   ;;  %v2112_v58 = vld [vmem:[%s7408_s25 + $0x78] sm:$0xff] }
 0x1af   : > { %3703 = vperm.xlu1 %4305, %v3695_v59   ;;  %v3888_v59 = vld [vmem:[%s7408_s25 + $0x118] sm:$0xff] }
 0x1c2   : > { %v1445_v32 = vpop.f32.mrf.mxu0  ;;  %v1465_v33 = vpop.f32.mrf.mxu1 }
 0x1c3   : > { %v1466_v60 = vadd.f32 %v1465_v33, %v1445_v32  ;;  %v3911_v32 = vld [vmem:[%s7408_s25 + $0x1d0] sm:$0xff] }
 0x1c9   : > { %v1485_v37 = vpop.f32.mrf.mxu2  ;;  %v1505_v38 = vpop.f32.mrf.mxu3 }
 0x1ca   : > { %v1506_v7 = vadd.f32 %v1505_v38, %v1485_v37  ;;  %v2785_v37 = vld [vmem:[%s7252_s8 + $0x8] sm:$0xff] }
 0x1cb   : > { %v3910_v38 = vld [vmem:[%s7408_s25 + $0x1c8] sm:$0xff]  ;;  %2793 = vperm.xlu2 %4306, %v2785_v37   ;;  %v3903_v37 = vld [vmem:[%s7408_s25 + $0x190] sm:$0xff] }
 0x1e4   : > { %v1590_v39 = vpop.f32.mrf.mxu0  ;;  %v1610_v40 = vpop.f32.mrf.mxu1 }
 0x1e5   : > { %v1611_v57 = vadd.f32 %v1610_v40, %v1590_v39  ;;  %v3892_v40 = vld [vmem:[%s7408_s25 + $0x138] sm:$0xff] }
 0x1eb   : > { %v1630_v43 = vpop.f32.mrf.mxu2  ;;  %v1650_v44 = vpop.f32.mrf.mxu3 }
 0x1ec   : > { %v1651_v5 = vadd.f32 %v1650_v44, %v1630_v43  ;;  %v3891_v44 = vld [vmem:[%s7408_s25 + $0x130] sm:$0xff] }
 0x1fe   : > { %v1735_v45 = vpop.f32.mrf.mxu0  ;;  %v1755_v46 = vpop.f32.mrf.mxu1 }
 0x1ff   : > { %v1756_v56 = vadd.f32 %v1755_v46, %v1735_v45 }
 0x200   : > { %v2008_v19 = vpop.permute.xlu0 %2007 }
 0x201   : > { %v2024_v24 = vpop.permute.xlu1 %2023 }
 0x205   : > { %v1775_v49 = vpop.f32.mrf.mxu2  ;;  %v1795_v50 = vpop.f32.mrf.mxu3 }
 0x206   : > { %v1796_v3 = vadd.f32 %v1795_v50, %v1775_v49  ;;  %v3907_v50 = vld [vmem:[%s7408_s25 + $0x1b0] sm:$0xff] }
 0x208   : > { %v1880_v53 = vpop.f32.mrf.mxu0  ;;  %v1900_v54 = vpop.f32.mrf.mxu1 }
 0x209   : > { %v1901_v55 = vadd.f32 %v1900_v54, %v1880_v53  ;;  %v2003_v33 = vpop.permute.xlu0 %2002  ;;  %v2019_v43 = vpop.permute.xlu1 %2018 }
 0x20b   : > { %1959 = vmatpush.msrb.mxu0 %v1901_v55  ;;  %v2034_v55 = vld [vmem:[#allocation7] sm:$0xff] }
 0x20d   : > { %1960 = vmatpush.msrb.mxu0 %v1756_v56  ;;  %v3681_v56 = vld [vmem:[%s7255_s11 + $0x8] sm:$0xff] }
 0x20e   : > { %3689 = vperm.xlu2 %4306, %v3681_v56   ;;  %v5408_v56 = vld [vmem:[%s7408_s25 + $0x250] sm:$0xff] }
 0x20f   : > { %v1920_v61 = vpop.f32.mrf.mxu2  ;;  %v1940_v62 = vpop.f32.mrf.mxu3  ;;  %1961 = vmatpush.msrb.mxu0 %v1611_v57 }
 0x210   : > { %v1941_v63 = vadd.f32 %v1940_v62, %v1920_v61 }
 0x211   : > { %1962 = vmatpush.msrb.mxu0 %v1466_v60  ;;  %v3906_v60 = vld [vmem:[%s7408_s25 + $0x1a8] sm:$0xff] }
 0x212   : > { %1982 = vmatpush.msrb.mxu1 %v1941_v63  ;;  %v2111_v63 = vld [vmem:[%s7408_s25 + $0x70] sm:$0xff] }
 0x213   : > { %1963 = vmatpush.msrb.mxu0 %v1321_v2  ;;  %v3887_v2 = vld [vmem:[%s7408_s25 + $0x110] sm:$0xff] }
 0x214   : > { %1983 = vmatpush.msrb.mxu1 %v1796_v3  ;;  %v3905_v3 = vld [vmem:[%s7408_s25 + $0x1a0] sm:$0xff] }
 0x215   : > { %1964 = vmatpush.msrb.mxu0 %v1176_v4 }
 0x216   : > { %1984 = vmatpush.msrb.mxu1 %v1651_v5  ;;  %v2110_v5 = vld [vmem:[%s7408_s25 + $0x68] sm:$0xff] }
 0x217   : > { %1965 = vmatpush.msrb.mxu0 %v1031_v6  ;;  %v3886_v6 = vld [vmem:[%s7408_s25 + $0x108] sm:$0xff] }
 0x218   : > { %1985 = vmatpush.msrb.mxu1 %v1506_v7  ;;  %v3904_v7 = vld [vmem:[%s7408_s25 + $0x198] sm:$0xff] }
 0x219   : > { %1966 = vmatpush.msrb.mxu0 %v886_v8 }
 0x21a   : > { %1986 = vmatpush.msrb.mxu1 %v1361_v9  ;;  %v5217_v9 = vld [vmem:[%s7408_s25 + $0x60] sm:$0xff] }
 0x21b   : > { %1967 = vmatpush.msrb.mxu0 %v741_v12  ;;  %v2128_v12 = vld [vmem:[%s7408_s25 + $0xf8] sm:$0xff] }
 0x21c   : > { %1987 = vmatpush.msrb.mxu1 %v1216_v14  ;;  %3879 = vmatmul.msk.f32.vlgmr.msrb.gmra.mxu0 %vm1945_vm0, %v1943_v13  ;;  %v5229_v14 = vld [vmem:[%s7408_s25 + $0x58] sm:$0xff] }
 0x21d   : > { %2202 = vmatpush.msra.mxu0 %v3900_v1  ;;  %v5257_v1 = vld [vmem:[%s7408_s25 + $0x40] sm:$0xff] }
 0x21e   : > { %1988 = vmatpush.msrb.mxu1 %v1071_v15  ;;  %v2127_v15 = vld [vmem:[%s7408_s25 + $0xf0] sm:$0xff] }
 0x21f   : > { %2203 = vmatpush.msra.mxu0 %v3899_v18  ;;  %v2124_v18 = vld [vmem:[%s7408_s25 + $0xd8] sm:$0xff] }
 0x220   : > { %1989 = vmatpush.msrb.mxu1 %v926_v20  ;;  %v5239_v20 = vld [vmem:[%s7408_s25 + $0x50] sm:$0xff] }
 0x221   : > { %2204 = vmatpush.msra.mxu0 %v3898_v21  ;;  %v2123_v21 = vld [vmem:[%s7408_s25 + $0xd0] sm:$0xff] }
 0x222   : > { %1990 = vmatpush.msrb.mxu1 %v781_v16  ;;  %v2126_v16 = vld [vmem:[%s7408_s25 + $0xe8] sm:$0xff] }
 0x223   : > { %3881 = vmatmul.msk.f32.vlgmr.msrb.gmra.mxu1 %vm1945_vm0, %v1943_v13  ;;  %2205 = vmatpush.msra.mxu0 %v3897_v10  ;;  %v3885_v13 = vld [vmem:[%s7408_s25 + $0x100] sm:$0xff]  ;;  %v2122_v10 = vld [vmem:[%s7408_s25 + $0xc8] sm:$0xff] }
 0x224   : > { %3880 = vmatmul.msk.f32.gmra.mxu0 %vm1945_vm0, %v1944_v17  ;;  %2222 = vmatpush.msra.mxu1 %v3916_v22  ;;  %v5275_v22 = vld [vmem:[%s7408_s25 + $0x30] sm:$0xff] }
 0x225   : > { %2206 = vmatpush.msra.mxu0 %v3896_v26  ;;  %v5302_v26 = vld [vmem:[%s7408_s25 + $0x18] sm:$0xff] }
 0x226   : > { %2223 = vmatpush.msra.mxu1 %v3915_v11  ;;  %v5284_v11 = vld [vmem:[%s7408_s25 + $0x28] sm:$0xff] }
 0x227   : > { %2207 = vmatpush.msra.mxu0 %v3895_v29  ;;  %v2118_v29 = vld [vmem:[%s7408_s25 + $0xa8] sm:$0xff] }
 0x228   : > { %2224 = vmatpush.msra.mxu1 %v3914_v27  ;;  %v2119_v27 = vld [vmem:[%s7408_s25 + $0xb0] sm:$0xff] }
 0x229   : > { %2208 = vmatpush.msra.mxu0 %v3894_v31  ;;  %v2117_v31 = vld [vmem:[%s7408_s25 + $0xa0] sm:$0xff] }
 0x22a   : > { %2225 = vmatpush.msra.mxu1 %v3913_v28  ;;  %v2099_v28 = vld [vmem:[%s7408_s25 + $0x10] sm:$0xff] }
 0x22b   : > { %3882 = vmatmul.msk.f32.gmra.mxu1 %vm1945_vm0, %v1944_v17  ;;  %2209 = vmatpush.msra.mxu0 %v3893_v34  ;;  %v5248_v17 = vld [vmem:[%s7408_s25 + $0x48] sm:$0xff]  ;;  %v5333_v34 = vld [vmem:[%s7408_s25 + $0x278] sm:$0xff] }
 0x22c   : > { %2226 = vmatpush.msra.mxu1 %v3912_v30  ;;  %v2098_v30 = vld [vmem:[%s7408_s25 + $0x8] sm:$0xff] }
 0x22d   : > { %2210 = vmatpush.msra.mxu0 %v3892_v40  ;;  %v2114_v40 = vld [vmem:[%s7408_s25 + $0x88] sm:$0xff] }
 0x22e   : > { %2227 = vmatpush.msra.mxu1 %v3911_v32  ;;  %v5324_v32 = vld [vmem:[%s7408_s25] sm:$0xff] }
 0x22f   : > { %2211 = vmatpush.msra.mxu0 %v3891_v44  ;;  %v2113_v44 = vld [vmem:[%s7408_s25 + $0x80] sm:$0xff] }
 0x230   : > { %2228 = vmatpush.msra.mxu1 %v3910_v38  ;;  %v5348_v38 = vld [vmem:[%s7408_s25 + $0x270] sm:$0xff] }
 0x231   : > { %2212 = vmatpush.msra.mxu0 %v3890_v48  ;;  %v3961_v48 = vld [vmem:[%s7408_s25 + $0x360] sm:$0xff] }
 0x232   : > { %2229 = vmatpush.msra.mxu1 %v3909_v42  ;;  %v5362_v42 = vld [vmem:[%s7408_s25 + $0x268] sm:$0xff] }
 0x233   : > { %2213 = vmatpush.msra.mxu0 %v3889_v52  ;;  %v3947_v52 = vld [vmem:[%s7408_s25 + $0x2f0] sm:$0xff] }
 0x234   : > { %2230 = vmatpush.msra.mxu1 %v3908_v47  ;;  %v3948_v47 = vld [vmem:[%s7408_s25 + $0x2f8] sm:$0xff] }
 0x235   : > { %2214 = vmatpush.msra.mxu0 %v3888_v59  ;;  %v3978_v59 = vld [vmem:[%s7408_s25 + $0x3e8] sm:$0xff] }
 0x236   : > { %2231 = vmatpush.msra.mxu1 %v3907_v50  ;;  %v3980_v50 = vld [vmem:[%s7408_s25 + $0x3f8] sm:$0xff] }
 0x237   : > { %2215 = vmatpush.msra.mxu0 %v3887_v2  ;;  %v5437_v2 = vld [vmem:[%s7408_s25 + $0x240] sm:$0xff] }
 0x238   : > { %2232 = vmatpush.msra.mxu1 %v3906_v60  ;;  %v5422_v60 = vld [vmem:[%s7408_s25 + $0x248] sm:$0xff] }
 0x239   : > { %2216 = vmatpush.msra.mxu0 %v3886_v6  ;;  %v3976_v6 = vld [vmem:[%s7408_s25 + $0x3d8] sm:$0xff] }
 0x23a   : > { %2233 = vmatpush.msra.mxu1 %v3905_v3  ;;  %v3944_v3 = vld [vmem:[%s7408_s25 + $0x2d8] sm:$0xff] }
 0x23b   : > { %2217 = vmatpush.msra.mxu0 %v3885_v13  ;;  %v3956_v13 = vld [vmem:[%s7408_s25 + $0x338] sm:$0xff] }
 0x23c   : > { %2234 = vmatpush.msra.mxu1 %v3904_v7  ;;  %v5453_v7 = vld [vmem:[%s7408_s25 + $0x238] sm:$0xff] }
 0x23e   : > { %2235 = vmatpush.msra.mxu1 %v3903_v37  ;;  %v5548_v37 = vld [vmem:[%s7408_s25 + $0x3b0] sm:$0xff] }
 0x299   : > { %v1969_v25 = vpop.f32.mrf.mxu0 }
 0x29a   : > { %v2010_v35 = vmul.f32 %v2003_v33, %v1969_v25  ;;  %v2120_v25 = vld [vmem:[%s7408_s25 + $0xb8] sm:$0xff] }
 0x29c   : > { %v2026_v45 = vadd.f32 %v2019_v43, %v2010_v35  ;;  %v3964_v35 = vld [vmem:[%s7408_s25 + $0x378] sm:$0xff] }
 0x29d   : > { %2348 = vmatpush.msrb.mxu0 %v3964_v35  ;;  %v3939_v35 = vld [vmem:[%s7408_s25 + $0x2b0] sm:$0xff] }
 0x29e   : > { %v5174_v53 = vmax.f32 %v2026_v45, 0.0  ;;  %v3901_v45 = vld [vmem:[%s7408_s25 + $0x180] sm:$0xff] }
 0x2a0   : > { %v1992_v36 = vpop.f32.mrf.mxu1 }
 0x2a1   : > { %v1972_v39 = vpop.f32.mrf.mxu0  ;;  %v2011_v51 = vmul.f32 %v2003_v33, %v1992_v36  ;;  %v2116_v33 = vld [vmem:[%s7408_s25 + $0x98] sm:$0xff]  ;;  %v2115_v36 = vld [vmem:[%s7408_s25 + $0x90] sm:$0xff] }
 0x2a2   : > { %v2012_v41 = vmul.f32 %v2008_v19, %v1972_v39  ;;  %v3963_v39 = vld [vmem:[%s7408_s25 + $0x370] sm:$0xff] }
 0x2a3   : > { %v2027_v61 = vadd.f32 %v2019_v43, %v2011_v51  ;;  %2349 = vmatpush.msrb.mxu0 %v3963_v39  ;;  %v3962_v43 = vld [vmem:[%s7408_s25 + $0x368] sm:$0xff]  ;;  %v5393_v51 = vld [vmem:[%s7408_s25 + $0x258] sm:$0xff]  ;;  %v5555_v39 = vld [vmem:[%s7408_s25 + $0x210] sm:$0xff] }
 0x2a4   : > { %v2028_v46 = vadd.f32 %v2024_v24, %v2012_v41  ;;  %v3902_v41 = vld [vmem:[%s7408_s25 + $0x188] sm:$0xff] }
 0x2a5   : > { %v5211_v8 = vmax.f32 %v2027_v61, 0.0  ;;  %2236 = vmatpush.msra.mxu1 %v3902_v41  ;;  %2350 = vmatpush.msrb.mxu0 %v3962_v43  ;;  %v3945_v61 = vld [vmem:[%s7408_s25 + $0x2e0] sm:$0xff]  ;;  %v5563_v41 = vld [vmem:[%s7408_s25 + $0x310] sm:$0xff]  ;;  %v5569_v43 = vld [vmem:[%s7408_s25 + $0x3a8] sm:$0xff] }
 0x2a6   : > { %v5166_v49 = vmax.f32 %v2028_v46, 0.0  ;;  %v5377_v46 = vld [vmem:[%s7408_s25 + $0x260] sm:$0xff] }
 0x2a7   : > { %2237 = vmatpush.msra.mxu1 %v3901_v45  ;;  %2351 = vmatpush.msrb.mxu0 %v3961_v48  ;;  %v3937_v45 = vld [vmem:[%s7408_s25 + $0x2a0] sm:$0xff] }
 0x2a8   : > { %v1995_v54 = vpop.f32.mrf.mxu1  ;;  %2053 = vmatpush.msrb.mxu2 %v5166_v49  ;;  %v5590_v48 = vld [vmem:[%s7408_s25 + $0x3a0] sm:$0xff] }
 0x2a9   : > { %v2013_v57 = vmul.f32 %v2008_v19, %v1995_v54  ;;  %v5266_v19 = vld [vmem:[%s7408_s25 + $0x38] sm:$0xff]  ;;  %2368 = vmatpush.msrb.mxu1 %v3980_v50  ;;  %7411 = vst [vmem:[#allocation21_spill] sm:$0xff] %v5590_v48  ;;  %v5597_v50 = vld [vmem:[%s7408_s25 + $0x200] sm:$0xff] }
 0x2aa   : > { %2054 = vmatpush.msrb.mxu2 %v5174_v53  ;;  %v3960_v54 = vld [vmem:[%s7408_s25 + $0x358] sm:$0xff] }
 0x2ab   : > { %v2029_v62 = vadd.f32 %v2024_v24, %v2013_v57  ;;  %3883 = vmatmul.msk.f32.vlgmr.msrb.gmra.mxu2 %vm2035_vm1, %v2034_v55  ;;  %v5293_v24 = vld [vmem:[%s7408_s25 + $0x20] sm:$0xff]  ;;  %v3946_v57 = vld [vmem:[%s7408_s25 + $0x2e8] sm:$0xff]  ;;  %2352 = vmatpush.msrb.mxu0 %v3960_v54 }
 0x2ac   : > { %2129 = vmatpush.msra.mxu2 %v2112_v58  ;;  %v3959_v58 = vld [vmem:[%s7408_s25 + $0x350] sm:$0xff]  ;;  %v5605_v54 = vld [vmem:[%s7408_s25 + $0x300] sm:$0xff] }
 0x2ad   : > { %v5200_v4 = vmax.f32 %v2029_v62, 0.0  ;;  %v3958_v62 = vld [vmem:[%s7408_s25 + $0x348] sm:$0xff]  ;;  %2353 = vmatpush.msrb.mxu0 %v3959_v58  ;;  %7412 = vst [vmem:[#allocation22_spill] sm:$0xff] %v5605_v54  ;;  %v5621_v58 = vld [vmem:[%s7408_s25 + $0x390] sm:$0xff] }
 0x2ae   : > { %2130 = vmatpush.msra.mxu2 %v2111_v63  ;;  %v3977_v63 = vld [vmem:[%s7408_s25 + $0x3e0] sm:$0xff]  ;;  %7414 = vst [vmem:[#allocation24_spill] sm:$0xff] %v5621_v58 }
 0x2af   : > { %2073 = vmatpush.msrb.mxu3 %v5200_v4  ;;  %2354 = vmatpush.msrb.mxu0 %v3958_v62  ;;  %v3933_v62 = vld [vmem:[%s7408_s25 + $0x280] sm:$0xff] }
 0x2b0   : > { %2131 = vmatpush.msra.mxu2 %v2110_v5  ;;  %v3957_v5 = vld [vmem:[%s7408_s25 + $0x340] sm:$0xff] }
 0x2b1   : > { %2074 = vmatpush.msrb.mxu3 %v5211_v8  ;;  %2355 = vmatpush.msrb.mxu0 %v3957_v5 }
 0x2b2   : > { %3884 = vmatmul.msk.f32.vlgmr.msrb.gmra.mxu3 %vm2035_vm1, %v2034_v55  ;;  %2132 = vmatpush.msra.mxu2 %v5217_v9  ;;  %v3979_v55 = vld [vmem:[%s7408_s25 + $0x3f0] sm:$0xff] }
 0x2b3   : > { %2149 = vmatpush.msra.mxu3 %v2128_v12  ;;  %2369 = vmatpush.msrb.mxu1 %v3979_v55  ;;  %v3943_v12 = vld [vmem:[%s7408_s25 + $0x2d0] sm:$0xff]  ;;  %v5611_v55 = vld [vmem:[%s7408_s25 + $0x398] sm:$0xff] }
 0x2b4   : > { %2133 = vmatpush.msra.mxu2 %v5229_v14  ;;  %2356 = vmatpush.msrb.mxu0 %v3956_v13  ;;  %7413 = vst [vmem:[#allocation23_spill] sm:$0xff] %v5611_v55 }
 0x2b5   : > { %2150 = vmatpush.msra.mxu3 %v2127_v15  ;;  %2370 = vmatpush.msrb.mxu1 %v3978_v59  ;;  %v5465_v15 = vld [vmem:[%s7408_s25 + $0x3d0] sm:$0xff]  ;;  %v3934_v59 = vld [vmem:[%s7408_s25 + $0x288] sm:$0xff] }
 0x2b6   : > { %2134 = vmatpush.msra.mxu2 %v5239_v20 }
 0x2b7   : > { %2151 = vmatpush.msra.mxu3 %v2126_v16  ;;  %2371 = vmatpush.msrb.mxu1 %v3977_v63  ;;  %v5470_v16 = vld [vmem:[%s7408_s25 + $0x230] sm:$0xff]  ;;  %v5639_v63 = vld [vmem:[%s7408_s25 + $0x380] sm:$0xff] }
 0x2b8   : > { %2135 = vmatpush.msra.mxu2 %v5248_v17  ;;  %7416 = vst [vmem:[#allocation26_spill] sm:$0xff] %v5639_v63 }
 0x2b9   : > { %2152 = vmatpush.msra.mxu3 %v2125_v0  ;;  %2372 = vmatpush.msrb.mxu1 %v3976_v6  ;;  %v3942_v0 = vld [vmem:[%s7408_s25 + $0x2c8] sm:$0xff] }
 0x2ba   : > { %2136 = vmatpush.msra.mxu2 %v5257_v1 }
 0x2bb   : > { %2153 = vmatpush.msra.mxu3 %v2124_v18  ;;  %2373 = vmatpush.msrb.mxu1 %v5465_v15  ;;  %v5479_v18 = vld [vmem:[%s7408_s25 + $0x330] sm:$0xff] }
 0x2bc   : > { %2137 = vmatpush.msra.mxu2 %v5266_v19  ;;  %2357 = vmatpush.msrb.mxu0 %v5479_v18 }
 0x2bd   : > { %2154 = vmatpush.msra.mxu3 %v2123_v21  ;;  %v5484_v21 = vld [vmem:[%s7408_s25 + $0x3c8] sm:$0xff] }
 0x2be   : > { %2138 = vmatpush.msra.mxu2 %v5275_v22  ;;  %2374 = vmatpush.msrb.mxu1 %v5484_v21 }
 0x2bf   : > { %2155 = vmatpush.msra.mxu3 %v2122_v10  ;;  %v5489_v10 = vld [vmem:[%s7408_s25 + $0x228] sm:$0xff] }
 0x2c0   : > { %2139 = vmatpush.msra.mxu2 %v5284_v11 }
 0x2c1   : > { %2156 = vmatpush.msra.mxu3 %v2121_v23  ;;  %v3941_v23 = vld [vmem:[%s7408_s25 + $0x2c0] sm:$0xff] }
 0x2c2   : > { %2140 = vmatpush.msra.mxu2 %v5293_v24 }
 0x2c3   : > { %2157 = vmatpush.msra.mxu3 %v2120_v25  ;;  %v5498_v25 = vld [vmem:[%s7408_s25 + $0x328] sm:$0xff] }
 0x2c4   : > { %2141 = vmatpush.msra.mxu2 %v5302_v26  ;;  %2358 = vmatpush.msrb.mxu0 %v5498_v25 }
 0x2c5   : > { %2158 = vmatpush.msra.mxu3 %v2119_v27  ;;  %v5503_v27 = vld [vmem:[%s7408_s25 + $0x3c0] sm:$0xff] }
 0x2c6   : > { %2142 = vmatpush.msra.mxu2 %v2099_v28  ;;  %v5510_v28 = vld [vmem:[%s7408_s25 + $0x220] sm:$0xff]  ;;  %2375 = vmatpush.msrb.mxu1 %v5503_v27 }
 0x2c7   : > { %2159 = vmatpush.msra.mxu3 %v2118_v29  ;;  %v3940_v29 = vld [vmem:[%s7408_s25 + $0x2b8] sm:$0xff] }
 0x2c8   : > { %2143 = vmatpush.msra.mxu2 %v2098_v30  ;;  %v5519_v30 = vld [vmem:[%s7408_s25 + $0x320] sm:$0xff] }
 0x2c9   : > { %2160 = vmatpush.msra.mxu3 %v2117_v31  ;;  %v5524_v31 = vld [vmem:[%s7408_s25 + $0x3b8] sm:$0xff]  ;;  %2359 = vmatpush.msrb.mxu0 %v5519_v30 }
 0x2ca   : > { %2144 = vmatpush.msra.mxu2 %v5324_v32  ;;  %2376 = vmatpush.msrb.mxu1 %v5524_v31 }
 0x2cb   : > { %2161 = vmatpush.msra.mxu3 %v2116_v33  ;;  %v5534_v33 = vld [vmem:[%s7408_s25 + $0x218] sm:$0xff] }
 0x2cc   : > { %2275 = vmatpush.msrb.mxu2 %v5333_v34  ;;  %2377 = vmatpush.msrb.mxu1 %v5548_v37 }
 0x2cd   : > { %2162 = vmatpush.msra.mxu3 %v2115_v36  ;;  %v5542_v36 = vld [vmem:[%s7408_s25 + $0x318] sm:$0xff] }
 0x2ce   : > { %2276 = vmatpush.msrb.mxu2 %v5348_v38  ;;  %2360 = vmatpush.msrb.mxu0 %v5542_v36 }
 0x2cf   : > { %2163 = vmatpush.msra.mxu3 %v2114_v40  ;;  %v3938_v40 = vld [vmem:[%s7408_s25 + $0x2a8] sm:$0xff]  ;;  %2378 = vmatpush.msrb.mxu1 %v5569_v43 }
 0x2d0   : > { %2277 = vmatpush.msrb.mxu2 %v5362_v42  ;;  %2361 = vmatpush.msrb.mxu0 %v5563_v41 }
 0x2d1   : > { %2164 = vmatpush.msra.mxu3 %v2113_v44  ;;  %v5576_v44 = vld [vmem:[%s7408_s25 + $0x208] sm:$0xff]  ;;  %2379 = vmatpush.msrb.mxu1 %v5590_v48  ;;  %v5867_v48 = vld [vmem:[%s7408_s25 + $0x520] sm:$0xff] }
 0x2d2   : > { %2278 = vmatpush.msrb.mxu2 %v5377_v46  ;;  %7437 = vst [vmem:[#allocation47_spill] sm:$0xff] %v5867_v48 }
 0x2d3   : > { %2295 = vmatpush.msrb.mxu3 %v3948_v47  ;;  %v5584_v47 = vld [vmem:[%s7408_s25 + $0x308] sm:$0xff]  ;;  %2380 = vmatpush.msrb.mxu1 %v5611_v55  ;;  %v5825_v55 = vld [vmem:[%s7408_s25 + $0x530] sm:$0xff] }
 0x2d4   : > { %2279 = vmatpush.msrb.mxu2 %v5393_v51  ;;  %7410 = vst [vmem:[#allocation20_spill] sm:$0xff] %v5584_v47  ;;  %2362 = vmatpush.msrb.mxu0 %v5584_v47  ;;  %v5888_v47 = vld [vmem:[%s7408_s25 + $0x518] sm:$0xff] }
 0x2d5   : > { %2296 = vmatpush.msrb.mxu3 %v3947_v52  ;;  %v3936_v52 = vld [vmem:[%s7408_s25 + $0x298] sm:$0xff]  ;;  %2381 = vmatpush.msrb.mxu1 %v5621_v58  ;;  %v5809_v58 = vld [vmem:[%s7408_s25 + $0x5d0] sm:$0xff]  ;;  %7432 = vst [vmem:[#allocation42_spill] sm:$0xff] %v5825_v55 }
 0x2d6   : > { %2280 = vmatpush.msrb.mxu2 %v5408_v56  ;;  %2363 = vmatpush.msrb.mxu0 %v5605_v54  ;;  %7431 = vst [vmem:[#allocation41_spill] sm:$0xff] %v5809_v58  ;;  %v5846_v54 = vld [vmem:[%s7408_s25 + $0x528] sm:$0xff] }
 0x2d7   : > { %2297 = vmatpush.msrb.mxu3 %v3946_v57  ;;  %v3935_v57 = vld [vmem:[%s7408_s25 + $0x290] sm:$0xff]  ;;  %7434 = vst [vmem:[#allocation44_spill] sm:$0xff] %v5846_v54 }
 0x2d8   : > { %2281 = vmatpush.msrb.mxu2 %v5422_v60  ;;  %7440 = vst [vmem:[#allocation50_spill] sm:$0xff] %v5888_v47 }
 0x2d9   : > { %2298 = vmatpush.msrb.mxu3 %v3945_v61  ;;  %v5630_v61 = vld [vmem:[%s7408_s25 + $0x388] sm:$0xff] }
 0x2da   : > { %2282 = vmatpush.msrb.mxu2 %v5437_v2  ;;  %7415 = vst [vmem:[#allocation25_spill] sm:$0xff] %v5630_v61  ;;  %2382 = vmatpush.msrb.mxu1 %v5630_v61  ;;  %v5751_v61 = vld [vmem:[%s7408_s25 + $0x448] sm:$0xff] }
 0x2db   : > { %2299 = vmatpush.msrb.mxu3 %v3944_v3  ;;  %v2083_v3 = vpop.permute.xlu2 %2082 }
 0x2dc   : > { %2283 = vmatpush.msrb.mxu2 %v5453_v7  ;;  %2383 = vmatpush.msrb.mxu1 %v5639_v63  ;;  %v5739_v63 = vld [vmem:[%s7408_s25 + $0x550] sm:$0xff] }
 0x2dd   : > { %2300 = vmatpush.msrb.mxu3 %v3943_v12  ;;  %7424 = vst [vmem:[#allocation34_spill] sm:$0xff] %v5739_v63 }
 0x2de   : > { %2284 = vmatpush.msrb.mxu2 %v5470_v16 }
 0x2df   : > { %2301 = vmatpush.msrb.mxu3 %v3942_v0 }
 0x2e0   : > { %2285 = vmatpush.msrb.mxu2 %v5489_v10 }
 0x2e1   : > { %2302 = vmatpush.msrb.mxu3 %v3941_v23  ;;  %v5647_v23 = vld [vmem:[%s7408_s25 + $0x478] sm:$0xff] }
 0x2e2   : > { %2286 = vmatpush.msrb.mxu2 %v5510_v28 }
 0x2e3   : > { %2303 = vmatpush.msrb.mxu3 %v3940_v29  ;;  %v2091_v12 = vpop.permute.xlu2 %2090  ;;  %v5652_v29 = vld [vmem:[%s7408_s25 + $0x578] sm:$0xff] }
 0x2e4   : > { %2287 = vmatpush.msrb.mxu2 %v5534_v33  ;;  %7417 = vst [vmem:[#allocation27_spill] sm:$0xff] %v5652_v29 }
 0x2e5   : > { %2304 = vmatpush.msrb.mxu3 %v3939_v35 }
 0x2e6   : > { %2288 = vmatpush.msrb.mxu2 %v5555_v39 }
 0x2e7   : > { %2305 = vmatpush.msrb.mxu3 %v3938_v40  ;;  %v5659_v40 = vld [vmem:[%s7408_s25 + $0x470] sm:$0xff] }
 0x2e8   : > { %2289 = vmatpush.msrb.mxu2 %v5576_v44 }
 0x2e9   : > { %2306 = vmatpush.msrb.mxu3 %v3937_v45  ;;  %v5664_v45 = vld [vmem:[%s7408_s25 + $0x570] sm:$0xff] }
 0x2ea   : > { %2290 = vmatpush.msrb.mxu2 %v5597_v50  ;;  %7418 = vst [vmem:[#allocation28_spill] sm:$0xff] %v5664_v45 }
 0x2eb   : > { %2307 = vmatpush.msrb.mxu3 %v3936_v52 }
 0x2ed   : > { %2308 = vmatpush.msrb.mxu3 %v3935_v57  ;;  %v5671_v57 = vld [vmem:[%s7408_s25 + $0x468] sm:$0xff] }
 0x2ef   : > { %2309 = vmatpush.msrb.mxu3 %v3934_v59  ;;  %v5676_v59 = vld [vmem:[%s7408_s25 + $0x568] sm:$0xff] }
 0x2f0   : > { %7419 = vst [vmem:[#allocation29_spill] sm:$0xff] %v5676_v59 }
 0x2f1   : > { %2310 = vmatpush.msrb.mxu3 %v3933_v62 }
 0x32e   : > { %v2056_v5 = vpop.f32.mrf.mxu2 }
 0x32f   : > { %v2085_v6 = vmul.f32 %v2083_v3, %v2056_v5  ;;  %v5687_v5 = vld [vmem:[%s7408_s25 + $0x460] sm:$0xff] }
 0x331   : > { %v2093_v13 = vadd.f32 %v2091_v12, %v2085_v6  ;;  %v4012_v6 = vld [vmem:[%s7408_s25 + $0x4f8] sm:$0xff] }
 0x333   : > { %v5642_v0 = vmax.f32 %v2093_v13, 0.0  ;;  %v5700_v13 = vld [vmem:[%s7408_s25 + $0x5f8] sm:$0xff] }
 0x334   : > { %7421 = vst [vmem:[#allocation31_spill] sm:$0xff] %v5700_v13 }
 0x335   : > { %v2076_v35 = vpop.f32.mrf.mxu3  ;;  %2145 = vmatmul.f32.vlgmr.msra.gmra.mxu2 %v5642_v0  ;;  %2218 = vmatmul.f32.vlgmr.msra.gmra.mxu0 %v5642_v0 }
 0x336   : > { %v2086_v52 = vmul.f32 %v2083_v3, %v2076_v35  ;;  %2421 = vmatpush.msra.mxu2 %v5647_v23  ;;  %2494 = vmatpush.msra.mxu0 %v5652_v29  ;;  %v5708_v35 = vld [vmem:[%s7408_s25 + $0x458] sm:$0xff]  ;;  %v5816_v29 = vld [vmem:[%s7408_s25 + $0x430] sm:$0xff] }
 0x338   : > { %v2094_v62 = vadd.f32 %v2091_v12, %v2086_v52  ;;  %2422 = vmatpush.msra.mxu2 %v5659_v40  ;;  %2495 = vmatpush.msra.mxu0 %v5664_v45  ;;  %v5695_v12 = vld [vmem:[%s7408_s25 + $0x560] sm:$0xff]  ;;  %v4011_v52 = vld [vmem:[%s7408_s25 + $0x4f0] sm:$0xff]  ;;  %v5760_v45 = vld [vmem:[%s7408_s25 + $0x548] sm:$0xff] }
 0x339   : > { %7420 = vst [vmem:[#allocation30_spill] sm:$0xff] %v5695_v12 }
 0x33a   : > { %v5680_v3 = vmax.f32 %v2094_v62, 0.0  ;;  %2423 = vmatpush.msra.mxu2 %v5671_v57  ;;  %2496 = vmatpush.msra.mxu0 %v5676_v59  ;;  %v5718_v62 = vld [vmem:[%s7408_s25 + $0x558] sm:$0xff]  ;;  %v5744_v59 = vld [vmem:[%s7408_s25 + $0x5e8] sm:$0xff]  ;;  %7426 = vst [vmem:[#allocation36_spill] sm:$0xff] %v5760_v45 }
 0x33b   : > { %7422 = vst [vmem:[#allocation32_spill] sm:$0xff] %v5718_v62 }
 0x33c   : > { %2165 = vmatmul.f32.vlgmr.msra.gmra.mxu3 %v5680_v3  ;;  %2238 = vmatmul.f32.vlgmr.msra.gmra.mxu1 %v5680_v3  ;;  %7425 = vst [vmem:[#allocation35_spill] sm:$0xff] %v5744_v59 }
 0x33d   : > { %2424 = vmatpush.msra.mxu2 %v5687_v5  ;;  %2441 = vmatpush.msra.mxu3 %v4012_v6  ;;  %v5723_v6 = vld [vmem:[%s7408_s25 + $0x5f0] sm:$0xff] }
 0x33e   : > { %2497 = vmatpush.msra.mxu0 %v5695_v12  ;;  %2514 = vmatpush.msra.mxu1 %v5700_v13  ;;  %7423 = vst [vmem:[#allocation33_spill] sm:$0xff] %v5723_v6  ;;  %v5730_v12 = vld [vmem:[%s7408_s25 + $0x450] sm:$0xff]  ;;  %v4010_v13 = vld [vmem:[%s7408_s25 + $0x4e8] sm:$0xff] }
 0x33f   : > { %2291 = vmatmul.f32.vlgmr.msrb.gmra.mxu2 %v5642_v0  ;;  %2364 = vmatmul.f32.vlgmr.msrb.gmra.mxu0 %v5642_v0 }
 0x340   : > { %2425 = vmatpush.msra.mxu2 %v5708_v35  ;;  %2442 = vmatpush.msra.mxu3 %v4011_v52  ;;  %v4009_v52 = vld [vmem:[%s7408_s25 + $0x4e0] sm:$0xff] }
 0x341   : > { %2498 = vmatpush.msra.mxu0 %v5718_v62  ;;  %2515 = vmatpush.msra.mxu1 %v5723_v6  ;;  %v5765_v6 = vld [vmem:[%s7408_s25 + $0x5e0] sm:$0xff]  ;;  %v4008_v62 = vld [vmem:[%s7408_s25 + $0x4d8] sm:$0xff] }
 0x342   : > { %2426 = vmatpush.msra.mxu2 %v5730_v12  ;;  %2443 = vmatpush.msra.mxu3 %v4010_v13  ;;  %7427 = vst [vmem:[#allocation37_spill] sm:$0xff] %v5765_v6  ;;  %v5773_v13 = vld [vmem:[%s7408_s25 + $0x440] sm:$0xff] }
 0x343   : > { %2499 = vmatpush.msra.mxu0 %v5739_v63  ;;  %2516 = vmatpush.msra.mxu1 %v5744_v59  ;;  %v5783_v59 = vld [vmem:[%s7408_s25 + $0x540] sm:$0xff]  ;;  %v5804_v63 = vld [vmem:[%s7408_s25 + $0x538] sm:$0xff] }
 0x344   : > { %2427 = vmatpush.msra.mxu2 %v5751_v61  ;;  %2444 = vmatpush.msra.mxu3 %v4009_v52  ;;  %7428 = vst [vmem:[#allocation38_spill] sm:$0xff] %v5783_v59  ;;  %v5788_v52 = vld [vmem:[%s7408_s25 + $0x5d8] sm:$0xff] }
 0x345   : > { %2500 = vmatpush.msra.mxu0 %v5760_v45  ;;  %2517 = vmatpush.msra.mxu1 %v5765_v6  ;;  %7429 = vst [vmem:[#allocation39_spill] sm:$0xff] %v5788_v52  ;;  %v5795_v45 = vld [vmem:[%s7408_s25 + $0x438] sm:$0xff]  ;;  %v4007_v6 = vld [vmem:[%s7408_s25 + $0x4d0] sm:$0xff] }
 0x346   : > { %2311 = vmatmul.f32.vlgmr.msrb.gmra.mxu3 %v5680_v3  ;;  %2384 = vmatmul.f32.vlgmr.msrb.gmra.mxu1 %v5680_v3  ;;  %7430 = vst [vmem:[#allocation40_spill] sm:$0xff] %v5804_v63 }
 0x347   : > { %2428 = vmatpush.msra.mxu2 %v5773_v13  ;;  %2445 = vmatpush.msra.mxu3 %v4008_v62  ;;  %v4006_v62 = vld [vmem:[%s7408_s25 + $0x4c8] sm:$0xff] }
 0x348   : > { %2501 = vmatpush.msra.mxu0 %v5783_v59  ;;  %2518 = vmatpush.msra.mxu1 %v5788_v52  ;;  %v5830_v52 = vld [vmem:[%s7408_s25 + $0x5c8] sm:$0xff] }
 0x349   : > { %2429 = vmatpush.msra.mxu2 %v5795_v45  ;;  %2446 = vmatpush.msra.mxu3 %v4007_v6  ;;  %7433 = vst [vmem:[#allocation43_spill] sm:$0xff] %v5830_v52  ;;  %v5837_v59 = vld [vmem:[%s7408_s25 + $0x428] sm:$0xff]  ;;  %v4005_v6 = vld [vmem:[%s7408_s25 + $0x4c0] sm:$0xff] }
 0x34a   : > { %2502 = vmatpush.msra.mxu0 %v5804_v63  ;;  %2519 = vmatpush.msra.mxu1 %v5809_v58  ;;  %v5851_v58 = vld [vmem:[%s7408_s25 + $0x5c0] sm:$0xff] }
 0x34b   : > { %2430 = vmatpush.msra.mxu2 %v5816_v29  ;;  %2447 = vmatpush.msra.mxu3 %v4006_v62  ;;  %7435 = vst [vmem:[#allocation45_spill] sm:$0xff] %v5851_v58  ;;  %v5858_v63 = vld [vmem:[%s7408_s25 + $0x420] sm:$0xff]  ;;  %v4004_v62 = vld [vmem:[%s7408_s25 + $0x4b8] sm:$0xff] }
 0x34c   : > { %2503 = vmatpush.msra.mxu0 %v5825_v55  ;;  %2520 = vmatpush.msra.mxu1 %v5830_v52  ;;  %7436 = vst [vmem:[#allocation46_spill] sm:$0xff] %v5858_v63  ;;  %v5872_v52 = vld [vmem:[%s7408_s25 + $0x5b8] sm:$0xff] }
 0x34d   : > { %2431 = vmatpush.msra.mxu2 %v5837_v59  ;;  %2448 = vmatpush.msra.mxu3 %v4005_v6  ;;  %7438 = vst [vmem:[#allocation48_spill] sm:$0xff] %v5872_v52  ;;  %v5879_v55 = vld [vmem:[%s7408_s25 + $0x418] sm:$0xff]  ;;  %v4003_v6 = vld [vmem:[%s7408_s25 + $0x4b0] sm:$0xff] }
 0x34e   : > { %2504 = vmatpush.msra.mxu0 %v5846_v54  ;;  %2521 = vmatpush.msra.mxu1 %v5851_v58  ;;  %7439 = vst [vmem:[#allocation49_spill] sm:$0xff] %v5879_v55  ;;  %v5893_v58 = vld [vmem:[%s7408_s25 + $0x5b0] sm:$0xff] }
 0x34f   : > { %2432 = vmatpush.msra.mxu2 %v5858_v63  ;;  %2449 = vmatpush.msra.mxu3 %v4004_v62  ;;  %7441 = vst [vmem:[#allocation51_spill] sm:$0xff] %v5893_v58  ;;  %v5900_v54 = vld [vmem:[%s7408_s25 + $0x410] sm:$0xff]  ;;  %v4002_v62 = vld [vmem:[%s7408_s25 + $0x4a8] sm:$0xff] }
 0x350   : > { %2505 = vmatpush.msra.mxu0 %v5867_v48  ;;  %2522 = vmatpush.msra.mxu1 %v5872_v52  ;;  %7442 = vst [vmem:[#allocation52_spill] sm:$0xff] %v5900_v54  ;;  %v5909_v63 = vld [vmem:[%s7408_s25 + $0x510] sm:$0xff]  ;;  %v5914_v52 = vld [vmem:[%s7408_s25 + $0x5a8] sm:$0xff] }
 0x351   : > { %2433 = vmatpush.msra.mxu2 %v5879_v55  ;;  %2450 = vmatpush.msra.mxu3 %v4003_v6  ;;  %7443 = vst [vmem:[#allocation53_spill] sm:$0xff] %v5909_v63  ;;  %v5921_v48 = vld [vmem:[%s7408_s25 + $0x408] sm:$0xff]  ;;  %v4001_v6 = vld [vmem:[%s7408_s25 + $0x4a0] sm:$0xff] }
 0x352   : > { %7444 = vst [vmem:[#allocation54_spill] sm:$0xff] %v5914_v52  ;;  %2506 = vmatpush.msra.mxu0 %v5888_v47  ;;  %2523 = vmatpush.msra.mxu1 %v5893_v58  ;;  %v5930_v55 = vld [vmem:[%s7408_s25 + $0x508] sm:$0xff]  ;;  %v5935_v58 = vld [vmem:[%s7408_s25 + $0x5a0] sm:$0xff] }
 0x353   : > { %7445 = vst [vmem:[#allocation55_spill] sm:$0xff] %v5921_v48  ;;  %2434 = vmatpush.msra.mxu2 %v5900_v54  ;;  %2451 = vmatpush.msra.mxu3 %v4002_v62  ;;  %v5942_v47 = vld [vmem:[%s7408_s25 + $0x400] sm:$0xff]  ;;  %v4000_v62 = vld [vmem:[%s7408_s25 + $0x498] sm:$0xff] }
 0x354   : > { %7446 = vst [vmem:[#allocation56_spill] sm:$0xff] %v5930_v55  ;;  %2507 = vmatpush.msra.mxu0 %v5909_v63  ;;  %2524 = vmatpush.msra.mxu1 %v5914_v52  ;;  %v5951_v54 = vld [vmem:[%s7408_s25 + $0x500] sm:$0xff]  ;;  %v5956_v52 = vld [vmem:[%s7408_s25 + $0x598] sm:$0xff] }
 0x355   : > { %7447 = vst [vmem:[#allocation57_spill] sm:$0xff] %v5935_v58  ;;  %2435 = vmatpush.msra.mxu2 %v5921_v48  ;;  %2452 = vmatpush.msra.mxu3 %v4001_v6  ;;  %v5964_v6 = vld [vmem:[%s7408_s25 + $0x678] sm:$0xff]  ;;  %v6007_v48 = vld [vmem:[%s7408_s25 + $0x668] sm:$0xff] }
 0x356   : > { %7448 = vst [vmem:[#allocation58_spill] sm:$0xff] %v5942_v47  ;;  %2508 = vmatpush.msra.mxu0 %v5930_v55  ;;  %2525 = vmatpush.msra.mxu1 %v5935_v58  ;;  %v5969_v63 = vld [vmem:[%s7408_s25 + $0x778] sm:$0xff]  ;;  %v3999_v58 = vld [vmem:[%s7408_s25 + $0x490] sm:$0xff] }
 0x357   : > { %7449 = vst [vmem:[#allocation59_spill] sm:$0xff] %v5951_v54  ;;  %2436 = vmatpush.msra.mxu2 %v5942_v47  ;;  %2453 = vmatpush.msra.mxu3 %v4000_v62  ;;  %v5979_v62 = vld [vmem:[%s7408_s25 + $0x590] sm:$0xff]  ;;  %v6001_v47 = vld [vmem:[%s7408_s25 + $0x588] sm:$0xff] }
 0x358   : > { %7450 = vst [vmem:[#allocation60_spill] sm:$0xff] %v5956_v52  ;;  %2509 = vmatpush.msra.mxu0 %v5951_v54  ;;  %2526 = vmatpush.msra.mxu1 %v5956_v52  ;;  %v5986_v55 = vld [vmem:[%s7408_s25 + $0x670] sm:$0xff]  ;;  %v3998_v54 = vld [vmem:[%s7408_s25 + $0x488] sm:$0xff] }
 0x359   : > { %7451 = vst [vmem:[#allocation61_spill] sm:$0xff] %v5964_v6  ;;  %2437 = vmatmul.f32.vlgmr.msra.gmra.mxu2 %v5642_v0  ;;  %2510 = vmatmul.f32.vlgmr.msra.gmra.mxu0 %v5642_v0  ;;  %v5991_v52 = vld [vmem:[%s7408_s25 + $0x770] sm:$0xff] }
 0x35a   : > { %7452 = vst [vmem:[#allocation62_spill] sm:$0xff] %v5969_v63  ;;  %2567 = vmatpush.msrb.mxu2 %v5964_v6  ;;  %2640 = vmatpush.msrb.mxu0 %v5969_v63  ;;  %v6012_v63 = vld [vmem:[%s7408_s25 + $0x768] sm:$0xff]  ;;  %v6072_v6 = vld [vmem:[%s7408_s25 + $0x650] sm:$0xff] }
 0x35b   : > { %7453 = vst [vmem:[#allocation63_spill] sm:$0xff] %v5979_v62  ;;  %2454 = vmatpush.msra.mxu3 %v3999_v58  ;;  %2527 = vmatpush.msra.mxu1 %v5979_v62  ;;  %v3997_v58 = vld [vmem:[%s7408_s25 + $0x480] sm:$0xff] }
 0x35c   : > { %7454 = vst [vmem:[#allocation64_spill] sm:$0xff] %v5986_v55  ;;  %2568 = vmatpush.msrb.mxu2 %v5986_v55  ;;  %2641 = vmatpush.msrb.mxu0 %v5991_v52  ;;  %v6022_v62 = vld [vmem:[%s7408_s25 + $0x580] sm:$0xff]  ;;  %v4076_v55 = vld [vmem:[%s7408_s25 + $0x6f8] sm:$0xff] }
 0x35d   : > { %7455 = vst [vmem:[#allocation65_spill] sm:$0xff] %v5991_v52  ;;  %2455 = vmatpush.msra.mxu3 %v3998_v54  ;;  %2528 = vmatpush.msra.mxu1 %v6001_v47  ;;  %v6030_v52 = vld [vmem:[%s7408_s25 + $0x660] sm:$0xff] }
 0x35e   : > { %7456 = vst [vmem:[#allocation66_spill] sm:$0xff] %v6001_v47  ;;  %2569 = vmatpush.msrb.mxu2 %v6007_v48  ;;  %2642 = vmatpush.msrb.mxu0 %v6012_v63  ;;  %v6039_v54 = vld [vmem:[%s7408_s25 + $0x760] sm:$0xff]  ;;  %v6060_v47 = vld [vmem:[%s7408_s25 + $0x758] sm:$0xff] }
 0x35f   : > { %7457 = vst [vmem:[#allocation67_spill] sm:$0xff] %v6007_v48  ;;  %2456 = vmatpush.msra.mxu3 %v3997_v58  ;;  %2529 = vmatpush.msra.mxu1 %v6022_v62  ;;  %v6051_v58 = vld [vmem:[%s7408_s25 + $0x658] sm:$0xff]  ;;  %v6065_v48 = vld [vmem:[%s7408_s25 + $0x7f0] sm:$0xff] }
 0x360   : > { %7458 = vst [vmem:[#allocation68_spill] sm:$0xff] %v6012_v63  ;;  %v6044_v63 = vld [vmem:[%s7408_s25 + $0x7f8] sm:$0xff]  ;;  %2457 = vmatmul.f32.vlgmr.msra.gmra.mxu3 %v5680_v3  ;;  %2530 = vmatmul.f32.vlgmr.msra.gmra.mxu1 %v5680_v3 }
 0x361   : > { %7459 = vst [vmem:[#allocation69_spill] sm:$0xff] %v6022_v62  ;;  %v4075_v62 = vld [vmem:[%s7408_s25 + $0x6f0] sm:$0xff]  ;;  %2570 = vmatpush.msrb.mxu2 %v6030_v52  ;;  %2587 = vmatpush.msrb.mxu3 %v4076_v55  ;;  %v4074_v55 = vld [vmem:[%s7408_s25 + $0x6e8] sm:$0xff] }
 0x362   : > { %7460 = vst [vmem:[#allocation70_spill] sm:$0xff] %v6030_v52  ;;  %2643 = vmatpush.msrb.mxu0 %v6039_v54  ;;  %2660 = vmatpush.msrb.mxu1 %v6044_v63  ;;  %v6081_v52 = vld [vmem:[%s7408_s25 + $0x750] sm:$0xff] }
 0x363   : > { %7461 = vst [vmem:[#allocation71_spill] sm:$0xff] %v6039_v54  ;;  %2571 = vmatpush.msrb.mxu2 %v6051_v58  ;;  %2588 = vmatpush.msrb.mxu3 %v4075_v62  ;;  %v6093_v54 = vld [vmem:[%s7408_s25 + $0x648] sm:$0xff]  ;;  %v4073_v62 = vld [vmem:[%s7408_s25 + $0x6e0] sm:$0xff] }
 0x364   : > { %7462 = vst [vmem:[#allocation72_spill] sm:$0xff] %v6044_v63  ;;  %v6086_v63 = vld [vmem:[%s7408_s25 + $0x7e8] sm:$0xff]  ;;  %2644 = vmatpush.msrb.mxu0 %v6060_v47  ;;  %2661 = vmatpush.msrb.mxu1 %v6065_v48 }
 0x365   : > { %7463 = vst [vmem:[#allocation73_spill] sm:$0xff] %v6051_v58  ;;  %2572 = vmatpush.msrb.mxu2 %v6072_v6  ;;  %2589 = vmatpush.msrb.mxu3 %v4074_v55  ;;  %v6102_v58 = vld [vmem:[%s7408_s25 + $0x748] sm:$0xff]  ;;  %v4072_v55 = vld [vmem:[%s7408_s25 + $0x6d8] sm:$0xff] }
 0x366   : > { %7464 = vst [vmem:[#allocation74_spill] sm:$0xff] %v6060_v47  ;;  %2645 = vmatpush.msrb.mxu0 %v6081_v52  ;;  %2662 = vmatpush.msrb.mxu1 %v6086_v63  ;;  %v6114_v47 = vld [vmem:[%s7408_s25 + $0x640] sm:$0xff] }
 0x367   : > { %7465 = vst [vmem:[#allocation75_spill] sm:$0xff] %v6065_v48  ;;  %v6107_v48 = vld [vmem:[%s7408_s25 + $0x7e0] sm:$0xff]  ;;  %2573 = vmatpush.msrb.mxu2 %v6093_v54  ;;  %2590 = vmatpush.msrb.mxu3 %v4073_v62  ;;  %v4071_v62 = vld [vmem:[%s7408_s25 + $0x6d0] sm:$0xff] }
 0x368   : > { %7466 = vst [vmem:[#allocation76_spill] sm:$0xff] %v6072_v6  ;;  %v6123_v6 = vld [vmem:[%s7408_s25 + $0x740] sm:$0xff]  ;;  %2646 = vmatpush.msrb.mxu0 %v6102_v58  ;;  %2663 = vmatpush.msrb.mxu1 %v6107_v48 }
 0x369   : > { %7467 = vst [vmem:[#allocation77_spill] sm:$0xff] %v6081_v52  ;;  %v6135_v52 = vld [vmem:[%s7408_s25 + $0x638] sm:$0xff]  ;;  %2574 = vmatpush.msrb.mxu2 %v6114_v47  ;;  %2591 = vmatpush.msrb.mxu3 %v4072_v55  ;;  %v4070_v55 = vld [vmem:[%s7408_s25 + $0x6c8] sm:$0xff] }
 0x36a   : > { %7468 = vst [vmem:[#allocation78_spill] sm:$0xff] %v6086_v63  ;;  %v6128_v63 = vld [vmem:[%s7408_s25 + $0x7d8] sm:$0xff]  ;;  %2647 = vmatpush.msrb.mxu0 %v6123_v6 }
 0x36b   : > { %7469 = vst [vmem:[#allocation79_spill] sm:$0xff] %v6093_v54  ;;  %v6144_v54 = vld [vmem:[%s7408_s25 + $0x738] sm:$0xff]  ;;  %2664 = vmatpush.msrb.mxu1 %v6128_v63  ;;  %2575 = vmatpush.msrb.mxu2 %v6135_v52 }
 0x36c   : > { %7470 = vst [vmem:[#allocation80_spill] sm:$0xff] %v6102_v58  ;;  %v6156_v58 = vld [vmem:[%s7408_s25 + $0x630] sm:$0xff]  ;;  %2592 = vmatpush.msrb.mxu3 %v4071_v62  ;;  %2648 = vmatpush.msrb.mxu0 %v6144_v54  ;;  %v4069_v62 = vld [vmem:[%s7408_s25 + $0x6c0] sm:$0xff] }
 0x36d   : > { %7471 = vst [vmem:[#allocation81_spill] sm:$0xff] %v6107_v48  ;;  %v6149_v48 = vld [vmem:[%s7408_s25 + $0x7d0] sm:$0xff]  ;;  %2576 = vmatpush.msrb.mxu2 %v6156_v58 }
 0x36e   : > { %7472 = vst [vmem:[#allocation82_spill] sm:$0xff] %v6114_v47  ;;  %v6165_v47 = vld [vmem:[%s7408_s25 + $0x730] sm:$0xff]  ;;  %2665 = vmatpush.msrb.mxu1 %v6149_v48  ;;  %2593 = vmatpush.msrb.mxu3 %v4070_v55  ;;  %v6203_v55 = vld [vmem:[%s7408_s25 + $0x6b8] sm:$0xff] }
 0x36f   : > { %7473 = vst [vmem:[#allocation83_spill] sm:$0xff] %v6123_v6  ;;  %v6177_v6 = vld [vmem:[%s7408_s25 + $0x628] sm:$0xff]  ;;  %2649 = vmatpush.msrb.mxu0 %v6165_v47 }
 0x370   : > { %7474 = vst [vmem:[#allocation84_spill] sm:$0xff] %v6128_v63  ;;  %v6170_v63 = vld [vmem:[%s7408_s25 + $0x7c8] sm:$0xff]  ;;  %2577 = vmatpush.msrb.mxu2 %v6177_v6  ;;  %2594 = vmatpush.msrb.mxu3 %v4069_v62  ;;  %v6226_v62 = vld [vmem:[%s7408_s25 + $0x6b0] sm:$0xff] }
 0x371   : > { %7475 = vst [vmem:[#allocation85_spill] sm:$0xff] %v6135_v52  ;;  %v6186_v52 = vld [vmem:[%s7408_s25 + $0x728] sm:$0xff]  ;;  %2666 = vmatpush.msrb.mxu1 %v6170_v63 }
 0x372   : > { %7476 = vst [vmem:[#allocation86_spill] sm:$0xff] %v6144_v54  ;;  %v6198_v54 = vld [vmem:[%s7408_s25 + $0x620] sm:$0xff]  ;;  %2650 = vmatpush.msrb.mxu0 %v6186_v52  ;;  %2595 = vmatpush.msrb.mxu3 %v6203_v55 }
 0x373   : > { %7477 = vst [vmem:[#allocation87_spill] sm:$0xff] %v6149_v48  ;;  %v6191_v48 = vld [vmem:[%s7408_s25 + $0x7c0] sm:$0xff]  ;;  %2578 = vmatpush.msrb.mxu2 %v6198_v54 }
 0x374   : > { %7478 = vst [vmem:[#allocation88_spill] sm:$0xff] %v6156_v58  ;;  %v6209_v58 = vld [vmem:[%s7408_s25 + $0x720] sm:$0xff]  ;;  %2667 = vmatpush.msrb.mxu1 %v6191_v48  ;;  %2596 = vmatpush.msrb.mxu3 %v6226_v62 }
 0x375   : > { %7479 = vst [vmem:[#allocation89_spill] sm:$0xff] %v6165_v47  ;;  %v6221_v47 = vld [vmem:[%s7408_s25 + $0x618] sm:$0xff]  ;;  %2651 = vmatpush.msrb.mxu0 %v6209_v58 }
 0x376   : > { %7480 = vst [vmem:[#allocation90_spill] sm:$0xff] %v6170_v63  ;;  %v6214_v63 = vld [vmem:[%s7408_s25 + $0x7b8] sm:$0xff]  ;;  %2579 = vmatpush.msrb.mxu2 %v6221_v47 }
 0x377   : > { %7481 = vst [vmem:[#allocation91_spill] sm:$0xff] %v6186_v52  ;;  %v6233_v52 = vld [vmem:[%s7408_s25 + $0x718] sm:$0xff]  ;;  %2668 = vmatpush.msrb.mxu1 %v6214_v63 }
 0x378   : > { %7482 = vst [vmem:[#allocation92_spill] sm:$0xff] %v6191_v48  ;;  %v6238_v48 = vld [vmem:[%s7408_s25 + $0x7b0] sm:$0xff]  ;;  %2652 = vmatpush.msrb.mxu0 %v6233_v52 }
 0x379   : > { %7483 = vst [vmem:[#allocation93_spill] sm:$0xff] %v6198_v54  ;;  %v6245_v54 = vld [vmem:[%s7408_s25 + $0x610] sm:$0xff]  ;;  %2669 = vmatpush.msrb.mxu1 %v6238_v48 }
 0x37a   : > { %7484 = vst [vmem:[#allocation94_spill] sm:$0xff] %v6203_v55  ;;  %v6250_v55 = vld [vmem:[%s7408_s25 + $0x6a8] sm:$0xff]  ;;  %2580 = vmatpush.msrb.mxu2 %v6245_v54 }
 0x37b   : > { %7485 = vst [vmem:[#allocation95_spill] sm:$0xff] %v6209_v58  ;;  %v6257_v58 = vld [vmem:[%s7408_s25 + $0x710] sm:$0xff]  ;;  %2597 = vmatpush.msrb.mxu3 %v6250_v55 }
 0x37c   : > { %7486 = vst [vmem:[#allocation96_spill] sm:$0xff] %v6214_v63  ;;  %v6262_v63 = vld [vmem:[%s7408_s25 + $0x7a8] sm:$0xff]  ;;  %2653 = vmatpush.msrb.mxu0 %v6257_v58 }
 0x37d   : > { %7487 = vst [vmem:[#allocation97_spill] sm:$0xff] %v6221_v47  ;;  %v6269_v47 = vld [vmem:[%s7408_s25 + $0x608] sm:$0xff]  ;;  %2670 = vmatpush.msrb.mxu1 %v6262_v63 }
 0x37e   : > { %7488 = vst [vmem:[#allocation98_spill] sm:$0xff] %v6226_v62  ;;  %v6274_v62 = vld [vmem:[%s7408_s25 + $0x6a0] sm:$0xff]  ;;  %2581 = vmatpush.msrb.mxu2 %v6269_v47 }
 0x37f   : > { %7489 = vst [vmem:[#allocation99_spill] sm:$0xff] %v6233_v52  ;;  %v6281_v52 = vld [vmem:[%s7408_s25 + $0x708] sm:$0xff]  ;;  %2598 = vmatpush.msrb.mxu3 %v6274_v62 }
 0x380   : > { %7490 = vst [vmem:[#allocation100_spill] sm:$0xff] %v6238_v48  ;;  %v6286_v48 = vld [vmem:[%s7408_s25 + $0x7a0] sm:$0xff]  ;;  %2654 = vmatpush.msrb.mxu0 %v6281_v52 }
 0x381   : > { %7491 = vst [vmem:[#allocation101_spill] sm:$0xff] %v6245_v54  ;;  %v6293_v54 = vld [vmem:[%s7408_s25 + $0x600] sm:$0xff]  ;;  %2671 = vmatpush.msrb.mxu1 %v6286_v48 }
 0x382   : > { %7492 = vst [vmem:[#allocation102_spill] sm:$0xff] %v6250_v55  ;;  %v6298_v55 = vld [vmem:[%s7408_s25 + $0x698] sm:$0xff]  ;;  %2582 = vmatpush.msrb.mxu2 %v6293_v54 }
 0x383   : > { %7493 = vst [vmem:[#allocation103_spill] sm:$0xff] %v6257_v58  ;;  %v6305_v58 = vld [vmem:[%s7408_s25 + $0x700] sm:$0xff]  ;;  %2599 = vmatpush.msrb.mxu3 %v6298_v55  ;;  %2583 = vmatmul.f32.vlgmr.msrb.gmra.mxu2 %v5642_v0 }
 0x384   : > { %7494 = vst [vmem:[#allocation104_spill] sm:$0xff] %v6262_v63  ;;  %v6310_v63 = vld [vmem:[%s7408_s25 + $0x798] sm:$0xff]  ;;  %2655 = vmatpush.msrb.mxu0 %v6305_v58 }
 0x385   : > { %7495 = vst [vmem:[#allocation105_spill] sm:$0xff] %v6269_v47  ;;  %v6324_v47 = vld [vmem:[%s7408_s25 + $0x690] sm:$0xff]  ;;  %2672 = vmatpush.msrb.mxu1 %v6310_v63  ;;  %2656 = vmatmul.f32.vlgmr.msrb.gmra.mxu0 %v5642_v0 }
 0x386   : > { %7496 = vst [vmem:[#allocation106_spill] sm:$0xff] %v6274_v62  ;;  %v6319_v62 = vld [vmem:[%s7408_s25 + $0x878] sm:$0xff]  ;;  %2600 = vmatpush.msrb.mxu3 %v6324_v47 }
 0x387   : > { %7497 = vst [vmem:[#allocation107_spill] sm:$0xff] %v6281_v52  ;;  %2713 = vmatpush.msra.mxu2 %v6319_v62  ;;  %v6356_v52 = vld [vmem:[%s7408_s25 + $0x868] sm:$0xff] }
 0x388   : > { %7498 = vst [vmem:[#allocation108_spill] sm:$0xff] %v6286_v48  ;;  %v6331_v48 = vld [vmem:[%s7408_s25 + $0x790] sm:$0xff] }
 0x389   : > { %7499 = vst [vmem:[#allocation109_spill] sm:$0xff] %v6293_v54  ;;  %2673 = vmatpush.msrb.mxu1 %v6331_v48  ;;  %v6361_v54 = vld [vmem:[%s7408_s25 + $0x680] sm:$0xff] }
 0x38a   : > { %7500 = vst [vmem:[#allocation110_spill] sm:$0xff] %v6298_v55  ;;  %v6338_v55 = vld [vmem:[%s7408_s25 + $0x870] sm:$0xff] }
 0x38b   : > { %7501 = vst [vmem:[#allocation111_spill] sm:$0xff] %v6305_v58  ;;  %v6343_v58 = vld [vmem:[%s7408_s25 + $0x688] sm:$0xff]  ;;  %2714 = vmatpush.msra.mxu2 %v6338_v55 }
 0x38c   : > { %7502 = vst [vmem:[#allocation112_spill] sm:$0xff] %v6310_v63  ;;  %v6350_v63 = vld [vmem:[%s7408_s25 + $0x788] sm:$0xff]  ;;  %2601 = vmatpush.msrb.mxu3 %v6343_v58 }
 0x38d   : > { %7503 = vst [vmem:[#allocation113_spill] sm:$0xff] %v6324_v47  ;;  %v6368_v47 = vld [vmem:[%s7408_s25 + $0x780] sm:$0xff]  ;;  %2674 = vmatpush.msrb.mxu1 %v6350_v63  ;;  %2715 = vmatpush.msra.mxu2 %v6356_v52 }
 0x38e   : > { %7504 = vst [vmem:[#allocation114_spill] sm:$0xff] %v6331_v48  ;;  %v6374_v48 = vld [vmem:[%s7408_s25 + $0x860] sm:$0xff]  ;;  %2602 = vmatpush.msrb.mxu3 %v6361_v54 }
 0x38f   : > { %7505 = vst [vmem:[#allocation115_spill] sm:$0xff] %v6343_v58  ;;  %v6381_v58 = vld [vmem:[%s7408_s25 + $0x8f8] sm:$0xff]  ;;  %2675 = vmatpush.msrb.mxu1 %v6368_v47  ;;  %2603 = vmatmul.f32.vlgmr.msrb.gmra.mxu3 %v5680_v3 }
 0x390   : > { %7506 = vst [vmem:[#allocation116_spill] sm:$0xff] %v6350_v63  ;;  %v6388_v63 = vld [vmem:[%s7408_s25 + $0x858] sm:$0xff]  ;;  %2676 = vmatmul.f32.vlgmr.msrb.gmra.mxu1 %v5680_v3  ;;  %2716 = vmatpush.msra.mxu2 %v6374_v48 }
 0x391   : > { %7507 = vst [vmem:[#allocation117_spill] sm:$0xff] %v6356_v52  ;;  %2733 = vmatpush.msra.mxu3 %v6381_v58  ;;  %v6404_v52 = vld [vmem:[%s7408_s25 + $0x850] sm:$0xff] }
 0x392   : > { %7508 = vst [vmem:[#allocation118_spill] sm:$0xff] %v6361_v54  ;;  %v6395_v54 = vld [vmem:[%s7408_s25 + $0x8f0] sm:$0xff]  ;;  %2717 = vmatpush.msra.mxu2 %v6388_v63 }
 0x393   : > { %7509 = vst [vmem:[#allocation119_spill] sm:$0xff] %v6368_v47  ;;  %v4309_v47 = vld [vmem:[%s7408_s25 + $0x78] sm:$0xff]  ;;  %2734 = vmatpush.msra.mxu3 %v6395_v54 }
 0x394   : > { %7510 = vst [vmem:[#allocation120_spill] sm:$0xff] %v6374_v48  ;;  %2814 = vmatpush.msra.mxu1 %v4309_v47  ;;  %v6410_v48 = vld [vmem:[%s7408_s25 + $0x8e8] sm:$0xff]  ;;  %2718 = vmatpush.msra.mxu2 %v6404_v52 }
 0x395   : > { %7511 = vst [vmem:[#allocation121_spill] sm:$0xff] %v6381_v58  ;;  %v4310_v58 = vld [vmem:[%s7408_s25 + $0x70] sm:$0xff]  ;;  %v6419_v47 = vld [vmem:[%s7408_s25 + $0x848] sm:$0xff]  ;;  %2735 = vmatpush.msra.mxu3 %v6410_v48 }
 0x396   : > { %7512 = vst [vmem:[#allocation122_spill] sm:$0xff] %v6388_v63  ;;  %2815 = vmatpush.msra.mxu1 %v4310_v58  ;;  %v6425_v63 = vld [vmem:[%s7408_s25 + $0x8e0] sm:$0xff]  ;;  %2719 = vmatpush.msra.mxu2 %v6419_v47 }
 0x397   : > { %7513 = vst [vmem:[#allocation123_spill] sm:$0xff] %v6395_v54  ;;  %v4311_v54 = vld [vmem:[%s7408_s25 + $0x68] sm:$0xff]  ;;  %v6434_v58 = vld [vmem:[%s7408_s25 + $0x840] sm:$0xff]  ;;  %2736 = vmatpush.msra.mxu3 %v6425_v63 }
 0x398   : > { %7514 = vst [vmem:[#allocation124_spill] sm:$0xff] %v6404_v52  ;;  %2816 = vmatpush.msra.mxu1 %v4311_v54  ;;  %v6440_v52 = vld [vmem:[%s7408_s25 + $0x8d8] sm:$0xff]  ;;  %2720 = vmatpush.msra.mxu2 %v6434_v58 }
 0x399   : > { %7515 = vst [vmem:[#allocation125_spill] sm:$0xff] %v6410_v48  ;;  %v6447_v54 = vld [vmem:[%s7408_s25 + $0x838] sm:$0xff]  ;;  %v6453_v48 = vld [vmem:[%s7408_s25 + $0x8d0] sm:$0xff]  ;;  %2737 = vmatpush.msra.mxu3 %v6440_v52 }
 0x39a   : > { %7516 = vst [vmem:[#allocation126_spill] sm:$0xff] %v6425_v63  ;;  %2817 = vmatpush.msra.mxu1 %v5217_v9  ;;  %v6460_v9 = vld [vmem:[%s7408_s25 + $0x830] sm:$0xff]  ;;  %2721 = vmatpush.msra.mxu2 %v6447_v54  ;;  %v6466_v63 = vld [vmem:[%s7408_s25 + $0x8c8] sm:$0xff] }
 0x39b   : > { %7517 = vst [vmem:[#allocation127_spill] sm:$0xff] %v6440_v52  ;;  %2738 = vmatpush.msra.mxu3 %v6453_v48  ;;  %v6479_v52 = vld [vmem:[%s7408_s25 + $0x8c0] sm:$0xff] }
 0x39c   : > { %7518 = vst [vmem:[#allocation128_spill] sm:$0xff] %v6453_v48  ;;  %2818 = vmatpush.msra.mxu1 %v5229_v14  ;;  %v6473_v14 = vld [vmem:[%s7408_s25 + $0x828] sm:$0xff]  ;;  %2722 = vmatpush.msra.mxu2 %v6460_v9  ;;  %v6492_v48 = vld [vmem:[%s7408_s25 + $0x8b8] sm:$0xff] }
 0x39d   : > { %7519 = vst [vmem:[#allocation129_spill] sm:$0xff] %v6466_v63  ;;  %2739 = vmatpush.msra.mxu3 %v6466_v63  ;;  %v6505_v63 = vld [vmem:[%s7408_s25 + $0x8b0] sm:$0xff] }
 0x39e   : > { %2819 = vmatpush.msra.mxu1 %v5239_v20  ;;  %7520 = vst [vmem:[#allocation130_spill] sm:$0xff] %v6479_v52  ;;  %v6486_v20 = vld [vmem:[%s7408_s25 + $0x820] sm:$0xff]  ;;  %2723 = vmatpush.msra.mxu2 %v6473_v14 }
 0x39f   : > { %7521 = vst [vmem:[#allocation131_spill] sm:$0xff] %v6492_v48  ;;  %2740 = vmatpush.msra.mxu3 %v6479_v52  ;;  %v6518_v52 = vld [vmem:[%s7408_s25 + $0x8a8] sm:$0xff] }
 0x3a0   : > { %2820 = vmatpush.msra.mxu1 %v5248_v17  ;;  %v6499_v17 = vld [vmem:[%s7408_s25 + $0x818] sm:$0xff]  ;;  %2724 = vmatpush.msra.mxu2 %v6486_v20  ;;  %7522 = vst [vmem:[#allocation132_spill] sm:$0xff] %v6505_v63 }
 0x3a1   : > { %2741 = vmatpush.msra.mxu3 %v6492_v48  ;;  %7523 = vst [vmem:[#allocation133_spill] sm:$0xff] %v6518_v52  ;;  %v6531_v48 = vld [vmem:[%s7408_s25 + $0x8a0] sm:$0xff] }
 0x3a2   : > { %2821 = vmatpush.msra.mxu1 %v5257_v1  ;;  %v6512_v1 = vld [vmem:[%s7408_s25 + $0x810] sm:$0xff]  ;;  %2725 = vmatpush.msra.mxu2 %v6499_v17 }
 0x3a3   : > { %2742 = vmatpush.msra.mxu3 %v6505_v63  ;;  %v6544_v63 = vld [vmem:[%s7408_s25 + $0x898] sm:$0xff] }
 0x3a4   : > { %2822 = vmatpush.msra.mxu1 %v5266_v19  ;;  %v6525_v19 = vld [vmem:[%s7408_s25 + $0x808] sm:$0xff]  ;;  %2726 = vmatpush.msra.mxu2 %v6512_v1  ;;  %7524 = vst [vmem:[#allocation134_spill] sm:$0xff] %v6544_v63 }
 0x3a5   : > { %2743 = vmatpush.msra.mxu3 %v6518_v52  ;;  %v6560_v52 = vld [vmem:[%s7408_s25 + $0x888] sm:$0xff] }
 0x3a6   : > { %2823 = vmatpush.msra.mxu1 %v5275_v22  ;;  %v6538_v22 = vld [vmem:[%s7408_s25 + $0x800] sm:$0xff]  ;;  %2727 = vmatpush.msra.mxu2 %v6525_v19 }
 0x3a7   : > { %2744 = vmatpush.msra.mxu3 %v6531_v48 }
 0x3a8   : > { %2824 = vmatpush.msra.mxu1 %v5284_v11  ;;  %2728 = vmatpush.msra.mxu2 %v6538_v22  ;;  %v6552_v11 = vld [vmem:[%s7408_s25 + $0x890] sm:$0xff] }
 0x3a9   : > { %2745 = vmatpush.msra.mxu3 %v6544_v63  ;;  %2729 = vmatmul.f32.vlgmr.msra.gmra.mxu2 %v5642_v0  ;;  %v4313_v63 = vld [vmem:[%s7408_s25 + $0x10] sm:$0xff] }
 0x3aa   : > { %2825 = vmatpush.msra.mxu1 %v5293_v24  ;;  %v4312_v24 = vld [vmem:[%s7408_s25 + $0x178] sm:$0xff]  ;;  %v4314_v0 = vld [vmem:[%s7408_s25 + $0x170] sm:$0xff] }
 0x3ab   : > { %2860 = vmatpush.msrb.mxu2 %v4312_v24  ;;  %2746 = vmatpush.msra.mxu3 %v6552_v11  ;;  %v4315_v24 = vld [vmem:[%s7408_s25 + $0x8] sm:$0xff] }
 0x3ac   : > { %2826 = vmatpush.msra.mxu1 %v5302_v26  ;;  %v6572_v26 = vld [vmem:[%s7408_s25 + $0x880] sm:$0xff] }
 0x3ad   : > { %2861 = vmatpush.msrb.mxu2 %v4314_v0  ;;  %2747 = vmatpush.msra.mxu3 %v6560_v52  ;;  %v4317_v0 = vld [vmem:[%s7408_s25 + $0x160] sm:$0xff] }
 0x3ae   : > { %2827 = vmatpush.msra.mxu1 %v4313_v63  ;;  %v4316_v63 = vld [vmem:[%s7408_s25 + $0x168] sm:$0xff] }
 0x3af   : > { %2862 = vmatpush.msrb.mxu2 %v4316_v63  ;;  %2748 = vmatpush.msra.mxu3 %v6572_v26  ;;  %v4321_v63 = vld [vmem:[%s7408_s25 + $0x150] sm:$0xff] }
 0x3b0   : > { %2828 = vmatpush.msra.mxu1 %v4315_v24  ;;  %2749 = vmatmul.f32.vlgmr.msra.gmra.mxu3 %v5680_v3  ;;  %v4318_v24 = vld [vmem:[%s7408_s25 + $0x1f8] sm:$0xff]  ;;  %v4320_v3 = vld [vmem:[%s7408_s25 + $0x1f0] sm:$0xff] }
 0x3b1   : > { %2863 = vmatpush.msrb.mxu2 %v4317_v0  ;;  %2883 = vmatpush.msrb.mxu3 %v4318_v24  ;;  %v4323_v0 = vld [vmem:[%s7408_s25 + $0x148] sm:$0xff]  ;;  %v4325_v24 = vld [vmem:[%s7408_s25 + $0x140] sm:$0xff] }
 0x3b2   : > { %2829 = vmatpush.msra.mxu1 %v5324_v32  ;;  %v4319_v32 = vld [vmem:[%s7408_s25 + $0x158] sm:$0xff] }
 0x3b3   : > { %2830 = vmatmul.f32.vlgmr.msra.gmra.mxu1 %v5174_v53  ;;  %2864 = vmatpush.msrb.mxu2 %v4319_v32  ;;  %v4327_v32 = vld [vmem:[%s7408_s25 + $0x138] sm:$0xff] }
 0x3b4   : > { %2908 = vmatpush.msrb.mxu1 %v5333_v34  ;;  %2884 = vmatpush.msrb.mxu3 %v4320_v3  ;;  %v4322_v34 = vld [vmem:[%s7408_s25 + $0x1e8] sm:$0xff]  ;;  %v4329_v3 = vld [vmem:[%s7408_s25 + $0x130] sm:$0xff] }
 0x3b5   : > { %2865 = vmatpush.msrb.mxu2 %v4321_v63  ;;  %v4331_v63 = vld [vmem:[%s7408_s25 + $0x128] sm:$0xff] }
 0x3b6   : > { %2909 = vmatpush.msrb.mxu1 %v5348_v38  ;;  %2885 = vmatpush.msrb.mxu3 %v4322_v34  ;;  %v4324_v38 = vld [vmem:[%s7408_s25 + $0x1e0] sm:$0xff] }
 0x3b7   : > { %2866 = vmatpush.msrb.mxu2 %v4323_v0  ;;  %v4333_v34 = vld [vmem:[%s7408_s25 + $0x120] sm:$0xff]  ;;  %v4335_v0 = vld [vmem:[%s7408_s25 + $0x118] sm:$0xff] }
 0x3b8   : > { %2910 = vmatpush.msrb.mxu1 %v5362_v42  ;;  %2886 = vmatpush.msrb.mxu3 %v4324_v38  ;;  %v4326_v42 = vld [vmem:[%s7408_s25 + $0x1d8] sm:$0xff]  ;;  %v4337_v38 = vld [vmem:[%s7408_s25 + $0x110] sm:$0xff] }
 0x3b9   : > { %2867 = vmatpush.msrb.mxu2 %v4325_v24  ;;  %v4339_v24 = vld [vmem:[%s7408_s25 + $0x108] sm:$0xff] }
 0x3ba   : > { %2911 = vmatpush.msrb.mxu1 %v5377_v46  ;;  %2887 = vmatpush.msrb.mxu3 %v4326_v42  ;;  %v4328_v46 = vld [vmem:[%s7408_s25 + $0x1d0] sm:$0xff]  ;;  %v4341_v42 = vld [vmem:[%s7408_s25 + $0x100] sm:$0xff] }
 0x3bb   : > { %2833 = vmatmul.f32.gmra.mxu1 %v5166_v49  ;;  %2868 = vmatpush.msrb.mxu2 %v4327_v32  ;;  %v4343_v32 = vld [vmem:[%s7408_s25 + $0x378] sm:$0xff] }
 0x3bc   : > { %2912 = vmatpush.msrb.mxu1 %v5393_v51  ;;  %2888 = vmatpush.msrb.mxu3 %v4328_v46  ;;  %v4330_v51 = vld [vmem:[%s7408_s25 + $0x1c8] sm:$0xff]  ;;  %v4345_v46 = vld [vmem:[%s7408_s25 + $0x370] sm:$0xff] }
 0x3bd   : > { %2869 = vmatpush.msrb.mxu2 %v4329_v3  ;;  %v4347_v3 = vld [vmem:[%s7408_s25 + $0x368] sm:$0xff] }
 0x3be   : > { %2913 = vmatpush.msrb.mxu1 %v5408_v56  ;;  %2889 = vmatpush.msrb.mxu3 %v4330_v51  ;;  %v4332_v56 = vld [vmem:[%s7408_s25 + $0x1c0] sm:$0xff]  ;;  %v4350_v51 = vld [vmem:[%s7408_s25 + $0x3f8] sm:$0xff] }
 0x3bf   : > { %2870 = vmatpush.msrb.mxu2 %v4331_v63  ;;  %v4352_v63 = vld [vmem:[%s7408_s25 + $0x3f0] sm:$0xff] }
 0x3c0   : > { %2914 = vmatpush.msrb.mxu1 %v5422_v60  ;;  %2890 = vmatpush.msrb.mxu3 %v4332_v56  ;;  %v4334_v60 = vld [vmem:[%s7408_s25 + $0x1b8] sm:$0xff]  ;;  %v4353_v56 = vld [vmem:[%s7408_s25 + $0x350] sm:$0xff] }
 0x3c1   : > { %2871 = vmatpush.msrb.mxu2 %v4333_v34  ;;  %v4355_v34 = vld [vmem:[%s7408_s25 + $0x348] sm:$0xff] }
 0x3c2   : > { %2915 = vmatpush.msrb.mxu1 %v5437_v2  ;;  %2891 = vmatpush.msrb.mxu3 %v4334_v60  ;;  %v4336_v2 = vld [vmem:[%s7408_s25 + $0x1b0] sm:$0xff]  ;;  %v4358_v60 = vld [vmem:[%s7408_s25 + $0x3d8] sm:$0xff] }
 0x3c3   : > { %2872 = vmatpush.msrb.mxu2 %v4335_v0  ;;  %v7543_v0 = vld [vmem:[#allocation32_spill] sm:$0xff] }
 0x3c4   : > { %2916 = vmatpush.msrb.mxu1 %v5453_v7  ;;  %2892 = vmatpush.msrb.mxu3 %v4336_v2  ;;  %v4338_v7 = vld [vmem:[%s7408_s25 + $0x1a8] sm:$0xff]  ;;  %v7544_v2 = vld [vmem:[#allocation33_spill] sm:$0xff] }
 0x3c5   : > { %2873 = vmatpush.msrb.mxu2 %v4337_v38  ;;  %v7545_v38 = vld [vmem:[#allocation64_spill] sm:$0xff] }
 0x3c6   : > { %2917 = vmatpush.msrb.mxu1 %v5470_v16  ;;  %2893 = vmatpush.msrb.mxu3 %v4338_v7  ;;  %v4340_v16 = vld [vmem:[%s7408_s25 + $0x1a0] sm:$0xff]  ;;  %v7546_v7 = vld [vmem:[#allocation34_spill] sm:$0xff] }
 0x3c7   : > { %2874 = vmatpush.msrb.mxu2 %v4339_v24  ;;  %v7547_v24 = vld [vmem:[#allocation35_spill] sm:$0xff] }
 0x3c8   : > { %2918 = vmatpush.msrb.mxu1 %v5489_v10  ;;  %2894 = vmatpush.msrb.mxu3 %v4340_v16  ;;  %v4342_v10 = vld [vmem:[%s7408_s25 + $0x198] sm:$0xff]  ;;  %v7548_v16 = vld [vmem:[#allocation67_spill] sm:$0xff] }
 0x3c9   : > { %2875 = vmatpush.msrb.mxu2 %v4341_v42  ;;  %v7549_v42 = vld [vmem:[#allocation36_spill] sm:$0xff] }
 0x3ca   : > { %2919 = vmatpush.msrb.mxu1 %v5510_v28  ;;  %2895 = vmatpush.msrb.mxu3 %v4342_v10  ;;  %v4344_v28 = vld [vmem:[%s7408_s25 + $0x190] sm:$0xff]  ;;  %v7550_v10 = vld [vmem:[#allocation37_spill] sm:$0xff] }
 0x3cb   : > { %2876 = vmatmul.f32.vlgmr.msrb.gmra.mxu2 %v5174_v53 }
 0x3cc   : > { %2920 = vmatpush.msrb.mxu1 %v5534_v33  ;;  %2956 = vmatpush.msra.mxu2 %v4343_v32  ;;  %v4346_v33 = vld [vmem:[%s7408_s25 + $0x188] sm:$0xff] }
 0x3cd   : > { %2896 = vmatpush.msrb.mxu3 %v4344_v28  ;;  %v7551_v32 = vld [vmem:[#allocation70_spill] sm:$0xff] }
 0x3ce   : > { %2921 = vmatpush.msrb.mxu1 %v5555_v39  ;;  %2957 = vmatpush.msra.mxu2 %v4345_v46  ;;  %v4348_v39 = vld [vmem:[%s7408_s25 + $0x180] sm:$0xff]  ;;  %v7552_v28 = vld [vmem:[#allocation38_spill] sm:$0xff]  ;;  %v7553_v46 = vld [vmem:[#allocation39_spill] sm:$0xff] }
 0x3cf   : > { %2897 = vmatpush.msrb.mxu3 %v4346_v33  ;;  %v7554_v33 = vld [vmem:[#allocation73_spill] sm:$0xff] }
 0x3d0   : > { %2922 = vmatpush.msrb.mxu1 %v5576_v44  ;;  %2958 = vmatpush.msra.mxu2 %v4347_v3  ;;  %v4349_v44 = vld [vmem:[%s7408_s25 + $0x360] sm:$0xff]  ;;  %v7555_v3 = vld [vmem:[#allocation40_spill] sm:$0xff] }
 0x3d1   : > { %2898 = vmatpush.msrb.mxu3 %v4348_v39  ;;  %v7556_v39 = vld [vmem:[#allocation41_spill] sm:$0xff] }
 0x3d2   : > { %2923 = vmatpush.msrb.mxu1 %v5597_v50  ;;  %2899 = vmatmul.f32.vlgmr.msrb.gmra.mxu3 %v5211_v8  ;;  %v4351_v50 = vld [vmem:[%s7408_s25 + $0x358] sm:$0xff] }
 0x3d3   : > { %2924 = vmatmul.f32.vlgmr.msrb.gmra.mxu1 %v5174_v53  ;;  %2959 = vmatpush.msra.mxu2 %v4349_v44  ;;  %v7557_v44 = vld [vmem:[#allocation76_spill] sm:$0xff] }
 0x3d4   : > { %2979 = vmatpush.msra.mxu3 %v4350_v51  ;;  %3004 = vmatpush.msra.mxu1 %v5647_v23  ;;  %v4354_v23 = vld [vmem:[%s7408_s25 + $0x3e8] sm:$0xff] }
 0x3d5   : > { %2879 = vmatmul.f32.gmra.mxu2 %v5166_v49  ;;  %v7558_v51 = vld [vmem:[#allocation42_spill] sm:$0xff] }
 0x3d6   : > { %2960 = vmatpush.msra.mxu2 %v4351_v50  ;;  %2980 = vmatpush.msra.mxu3 %v4352_v63  ;;  %v7559_v50 = vld [vmem:[#allocation43_spill] sm:$0xff] }
 0x3d7   : > { %3005 = vmatpush.msra.mxu1 %v5659_v40  ;;  %v4356_v40 = vld [vmem:[%s7408_s25 + $0x3e0] sm:$0xff]  ;;  %v7560_v63 = vld [vmem:[#allocation79_spill] sm:$0xff] }
 0x3d8   : > { %2961 = vmatpush.msra.mxu2 %v4353_v56  ;;  %2981 = vmatpush.msra.mxu3 %v4354_v23  ;;  %v7561_v56 = vld [vmem:[#allocation44_spill] sm:$0xff]  ;;  %v7562_v23 = vld [vmem:[#allocation45_spill] sm:$0xff] }
 0x3d9   : > { %3006 = vmatpush.msra.mxu1 %v5671_v57  ;;  %v4357_v57 = vld [vmem:[%s7408_s25 + $0x340] sm:$0xff] }
 0x3da   : > { %2962 = vmatpush.msra.mxu2 %v4355_v34  ;;  %2982 = vmatpush.msra.mxu3 %v4356_v40  ;;  %v7563_v34 = vld [vmem:[#allocation82_spill] sm:$0xff]  ;;  %v7564_v40 = vld [vmem:[#allocation47_spill] sm:$0xff] }
 0x3db   : > { %3007 = vmatpush.msra.mxu1 %v5687_v5  ;;  %2902 = vmatmul.f32.gmra.mxu3 %v5200_v4  ;;  %v4359_v5 = vld [vmem:[%s7408_s25 + $0x338] sm:$0xff] }
 0x3dc   : > { %2927 = vmatmul.f32.gmra.mxu1 %v5166_v49  ;;  %2963 = vmatpush.msra.mxu2 %v4357_v57  ;;  %v7565_v57 = vld [vmem:[#allocation48_spill] sm:$0xff] }
 0x3dd   : > { %2983 = vmatpush.msra.mxu3 %v4358_v60  ;;  %3008 = vmatpush.msra.mxu1 %v5708_v35  ;;  %v7541_v35 = vld [vmem:[#allocation31_spill] sm:$0xff]  ;;  %v7566_v60 = vld [vmem:[#allocation85_spill] sm:$0xff] }
 0x3de   : > { %2964 = vmatpush.msra.mxu2 %v4359_v5  ;;  %v7567_v5 = vld [vmem:[#allocation50_spill] sm:$0xff] }
 0x3df   : > { %2984 = vmatpush.msra.mxu3 %v5465_v15  ;;  %3009 = vmatpush.msra.mxu1 %v5730_v12  ;;  %v7525_v15 = vld [vmem:[#allocation20_spill] sm:$0xff]  ;;  %v7540_v12 = vld [vmem:[#allocation30_spill] sm:$0xff] }
 0x3e0   : > { %2965 = vmatpush.msra.mxu2 %v5479_v18  ;;  %v7526_v18 = vld [vmem:[#allocation21_spill] sm:$0xff] }
 0x3e1   : > { %2985 = vmatpush.msra.mxu3 %v5484_v21  ;;  %3010 = vmatpush.msra.mxu1 %v5751_v61  ;;  %v7527_v21 = vld [vmem:[#allocation46_spill] sm:$0xff]  ;;  %v7536_v61 = vld [vmem:[#allocation55_spill] sm:$0xff] }
 0x3e2   : > { %2966 = vmatpush.msra.mxu2 %v5498_v25  ;;  %v7528_v25 = vld [vmem:[#allocation22_spill] sm:$0xff] }
 0x3e3   : > { %2986 = vmatpush.msra.mxu3 %v5503_v27  ;;  %3011 = vmatpush.msra.mxu1 %v5773_v13  ;;  %v7529_v27 = vld [vmem:[#allocation23_spill] sm:$0xff]  ;;  %v7542_v13 = vld [vmem:[#allocation61_spill] sm:$0xff] }
 0x3e4   : > { %2967 = vmatpush.msra.mxu2 %v5519_v30  ;;  %v7530_v30 = vld [vmem:[#allocation49_spill] sm:$0xff] }
 0x3e5   : > { %2987 = vmatpush.msra.mxu3 %v5524_v31  ;;  %3012 = vmatpush.msra.mxu1 %v5795_v45  ;;  %v7531_v31 = vld [vmem:[#allocation27_spill] sm:$0xff]  ;;  %v7538_v45 = vld [vmem:[#allocation26_spill] sm:$0xff] }
 0x3e6   : > { %2968 = vmatpush.msra.mxu2 %v5542_v36  ;;  %v7532_v36 = vld [vmem:[#allocation24_spill] sm:$0xff] }
 0x3e7   : > { %2988 = vmatpush.msra.mxu3 %v5548_v37  ;;  %3013 = vmatpush.msra.mxu1 %v5816_v29  ;;  %v7533_v37 = vld [vmem:[#allocation52_spill] sm:$0xff]  ;;  %v7537_v29 = vld [vmem:[#allocation29_spill] sm:$0xff] }
 0x3e8   : > { %2969 = vmatpush.msra.mxu2 %v5563_v41  ;;  %v7534_v41 = vld [vmem:[#allocation28_spill] sm:$0xff] }
 0x3e9   : > { %2989 = vmatpush.msra.mxu3 %v5569_v43  ;;  %3014 = vmatpush.msra.mxu1 %v5837_v59  ;;  %v7535_v43 = vld [vmem:[#allocation25_spill] sm:$0xff]  ;;  %v7539_v59 = vld [vmem:[#allocation58_spill] sm:$0xff] }
 0x3ea   : > { %2970 = vmatpush.msra.mxu2 %v7525_v15  ;;  %v7568_v15 = vld [vmem:[#allocation51_spill] sm:$0xff] }
 0x3eb   : > { %2990 = vmatpush.msra.mxu3 %v7526_v18  ;;  %3015 = vmatpush.msra.mxu1 %v7527_v21  ;;  %v7569_v18 = vld [vmem:[#allocation88_spill] sm:$0xff]  ;;  %v7570_v21 = vld [vmem:[#allocation53_spill] sm:$0xff] }
 0x3ec   : > { %2971 = vmatpush.msra.mxu2 %v7528_v25  ;;  %v7571_v25 = vld [vmem:[#allocation54_spill] sm:$0xff] }
 0x3ed   : > { %2991 = vmatpush.msra.mxu3 %v7529_v27  ;;  %3016 = vmatpush.msra.mxu1 %v7530_v30  ;;  %v7572_v27 = vld [vmem:[#allocation56_spill] sm:$0xff]  ;;  %v7573_v30 = vld [vmem:[#allocation57_spill] sm:$0xff] }
 0x3ee   : > { %2972 = vmatmul.f32.vlgmr.msra.gmra.mxu2 %v5174_v53 }
 0x3ef   : > { %3052 = vmatpush.msrb.mxu2 %v7531_v31  ;;  %2992 = vmatpush.msra.mxu3 %v7532_v36  ;;  %v7574_v31 = vld [vmem:[#allocation93_spill] sm:$0xff]  ;;  %v7575_v36 = vld [vmem:[#allocation59_spill] sm:$0xff] }
 0x3f0   : > { %3017 = vmatpush.msra.mxu1 %v7533_v37  ;;  %v7576_v37 = vld [vmem:[#allocation60_spill] sm:$0xff] }
 0x3f1   : > { %3053 = vmatpush.msrb.mxu2 %v7534_v41  ;;  %2993 = vmatpush.msra.mxu3 %v7535_v43  ;;  %v7577_v41 = vld [vmem:[#allocation97_spill] sm:$0xff]  ;;  %v7578_v43 = vld [vmem:[#allocation62_spill] sm:$0xff] }
 0x3f2   : > { %3018 = vmatpush.msra.mxu1 %v7536_v61  ;;  %v7579_v61 = vld [vmem:[#allocation63_spill] sm:$0xff] }
 0x3f3   : > { %3054 = vmatpush.msrb.mxu2 %v7537_v29  ;;  %2994 = vmatpush.msra.mxu3 %v7538_v45  ;;  %v6825_v29 = vpop.f32.mrf.mxu2  ;;  %v7580_v45 = vld [vmem:[#allocation101_spill] sm:$0xff] }
 0x3f4   : > { %3019 = vmatpush.msra.mxu1 %v7539_v59  ;;  %2995 = vmatmul.f32.vlgmr.msra.gmra.mxu3 %v5211_v8  ;;  %v7581_v59 = vld [vmem:[#allocation65_spill] sm:$0xff] }
 0x3f5   : > { %3020 = vmatmul.f32.vlgmr.msra.gmra.mxu1 %v5174_v53  ;;  %3055 = vmatpush.msrb.mxu2 %v7540_v12  ;;  %v7582_v12 = vld [vmem:[#allocation66_spill] sm:$0xff] }
 0x3f6   : > { %3075 = vmatpush.msrb.mxu3 %v7541_v35  ;;  %3100 = vmatpush.msrb.mxu1 %v7542_v13  ;;  %v7583_v35 = vld [vmem:[#allocation105_spill] sm:$0xff]  ;;  %v7584_v13 = vld [vmem:[#allocation68_spill] sm:$0xff] }
 0x3f7   : > { %2975 = vmatmul.f32.gmra.mxu2 %v5166_v49 }
 0x3f8   : > { %3056 = vmatpush.msrb.mxu2 %v7543_v0  ;;  %3076 = vmatpush.msrb.mxu3 %v7544_v2  ;;  %v7585_v0 = vld [vmem:[#allocation69_spill] sm:$0xff] }
 0x3f9   : > { %3101 = vmatpush.msrb.mxu1 %v7545_v38  ;;  %v7586_v2 = vld [vmem:[#allocation109_spill] sm:$0xff]  ;;  %v7587_v38 = vld [vmem:[#allocation71_spill] sm:$0xff] }
 0x3fa   : > { %3057 = vmatpush.msrb.mxu2 %v7546_v7  ;;  %3077 = vmatpush.msrb.mxu3 %v7547_v24  ;;  %v7588_v7 = vld [vmem:[#allocation72_spill] sm:$0xff]  ;;  %v7589_v24 = vld [vmem:[#allocation74_spill] sm:$0xff] }
 0x3fb   : > { %3102 = vmatpush.msrb.mxu1 %v7548_v16  ;;  %v7590_v16 = vld [vmem:[#allocation75_spill] sm:$0xff] }
 0x3fc   : > { %3058 = vmatpush.msrb.mxu2 %v7549_v42  ;;  %3078 = vmatpush.msrb.mxu3 %v7550_v10  ;;  %v6844_v42 = vpop.f32.mrf.mxu1  ;;  %v6847_v10 = vpop.f32.mrf.mxu2 }
 0x3fd   : > { %3103 = vmatpush.msrb.mxu1 %v7551_v32  ;;  %2998 = vmatmul.f32.gmra.mxu3 %v5200_v4 }
 0x3fe   : > { %3023 = vmatmul.f32.gmra.mxu1 %v5166_v49  ;;  %3059 = vmatpush.msrb.mxu2 %v7552_v28  ;;  %v7591_v28 = vld [vmem:[#allocation77_spill] sm:$0xff] }
 0x3ff   : > { %3079 = vmatpush.msrb.mxu3 %v7553_v46  ;;  %3104 = vmatpush.msrb.mxu1 %v7554_v33  ;;  %v7592_v46 = vld [vmem:[#allocation78_spill] sm:$0xff]  ;;  %v7593_v33 = vld [vmem:[#allocation117_spill] sm:$0xff] }
 0x400   : > { %3060 = vmatpush.msrb.mxu2 %v7555_v3  ;;  %v7594_v3 = vld [vmem:[#allocation80_spill] sm:$0xff] }
 0x401   : > { %3080 = vmatpush.msrb.mxu3 %v7556_v39  ;;  %3105 = vmatpush.msrb.mxu1 %v7557_v44  ;;  %v7595_v39 = vld [vmem:[#allocation81_spill] sm:$0xff]  ;;  %v7596_v44 = vld [vmem:[#allocation120_spill] sm:$0xff] }
 0x402   : > { %3061 = vmatpush.msrb.mxu2 %v7558_v51  ;;  %v7598_v51 = vld [vmem:[#allocation84_spill] sm:$0xff] }
 0x403   : > { %3081 = vmatpush.msrb.mxu3 %v7559_v50  ;;  %3106 = vmatpush.msrb.mxu1 %v7560_v63  ;;  %v7599_v50 = vld [vmem:[#allocation122_spill] sm:$0xff] }
 0x404   : > { %3062 = vmatpush.msrb.mxu2 %v7561_v56  ;;  %v7600_v63 = vld [vmem:[#allocation86_spill] sm:$0xff]  ;;  %v7601_v56 = vld [vmem:[#allocation87_spill] sm:$0xff] }
 0x405   : > { %3082 = vmatpush.msrb.mxu3 %v7562_v23  ;;  %3107 = vmatpush.msrb.mxu1 %v7563_v34  ;;  %v7602_v23 = vld [vmem:[#allocation124_spill] sm:$0xff]  ;;  %v2438_v34 = vpop.f32.mrf.mxu2 }
 0x406   : > { %3063 = vmatpush.msrb.mxu2 %v7564_v40 }
 0x407   : > { %3083 = vmatpush.msrb.mxu3 %v7565_v57  ;;  %3108 = vmatpush.msrb.mxu1 %v7566_v60  ;;  %v7603_v57 = vld [vmem:[#allocation89_spill] sm:$0xff]  ;;  %v7604_v60 = vld [vmem:[#allocation90_spill] sm:$0xff] }
 0x408   : > { %3064 = vmatpush.msrb.mxu2 %v7567_v5  ;;  %v2385_v5 = vpop.f32.mrf.mxu1 }
 0x409   : > { %3084 = vmatpush.msrb.mxu3 %v7568_v15  ;;  %3109 = vmatpush.msrb.mxu1 %v7569_v18  ;;  %v7605_v15 = vld [vmem:[#allocation91_spill] sm:$0xff]  ;;  %v7606_v18 = vld [vmem:[#allocation92_spill] sm:$0xff] }
 0x40a   : > { %3065 = vmatpush.msrb.mxu2 %v7570_v21 }
 0x40b   : > { %3085 = vmatpush.msrb.mxu3 %v7571_v25  ;;  %3110 = vmatpush.msrb.mxu1 %v6177_v6  ;;  %v6827_v6 = vpop.f32.mrf.mxu3  ;;  %v7607_v25 = vld [vmem:[#allocation95_spill] sm:$0xff] }
 0x40c   : > { %3066 = vmatpush.msrb.mxu2 %v7572_v27  ;;  %v7608_v27 = vld [vmem:[#allocation96_spill] sm:$0xff] }
 0x40d   : > { %3086 = vmatpush.msrb.mxu3 %v7573_v30  ;;  %3111 = vmatpush.msrb.mxu1 %v7574_v31  ;;  %v7609_v30 = vld [vmem:[#allocation99_spill] sm:$0xff]  ;;  %v7610_v31 = vld [vmem:[#allocation100_spill] sm:$0xff] }
 0x40e   : > { %3067 = vmatpush.msrb.mxu2 %v7575_v36 }
 0x40f   : > { %3087 = vmatpush.msrb.mxu3 %v7576_v37  ;;  %3112 = vmatpush.msrb.mxu1 %v7577_v41  ;;  %v7611_v37 = vld [vmem:[#allocation103_spill] sm:$0xff]  ;;  %v7612_v41 = vld [vmem:[#allocation104_spill] sm:$0xff] }
 0x410   : > { %3068 = vmatmul.f32.vlgmr.msrb.gmra.mxu2 %v5174_v53 }
 0x411   : > { %3148 = vmatpush.msra.mxu2 %v7578_v43  ;;  %3088 = vmatpush.msrb.mxu3 %v7579_v61  ;;  %v7613_v43 = vld [vmem:[#allocation107_spill] sm:$0xff]  ;;  %v7614_v61 = vld [vmem:[#allocation108_spill] sm:$0xff] }
 0x412   : > { %3113 = vmatpush.msrb.mxu1 %v7580_v45  ;;  %v7615_v45 = vld [vmem:[#allocation111_spill] sm:$0xff] }
 0x413   : > { %3149 = vmatpush.msra.mxu2 %v7581_v59  ;;  %3089 = vmatpush.msrb.mxu3 %v7582_v12  ;;  %v6849_v32 = vpop.f32.mrf.mxu3  ;;  %v7616_v59 = vld [vmem:[#allocation112_spill] sm:$0xff] }
 0x414   : > { %3114 = vmatpush.msrb.mxu1 %v7583_v35  ;;  %v7618_v35 = vld [vmem:[#allocation116_spill] sm:$0xff] }
 0x415   : > { %3150 = vmatpush.msra.mxu2 %v7584_v13  ;;  %3090 = vmatpush.msrb.mxu3 %v7585_v0  ;;  %v7619_v0 = vld [vmem:[#allocation119_spill] sm:$0xff] }
 0x416   : > { %3115 = vmatpush.msrb.mxu1 %v7586_v2  ;;  %3091 = vmatmul.f32.vlgmr.msrb.gmra.mxu3 %v5211_v8 }
 0x417   : > { %3116 = vmatmul.f32.vlgmr.msrb.gmra.mxu1 %v5174_v53  ;;  %3151 = vmatpush.msra.mxu2 %v7587_v38 }
 0x418   : > { %3171 = vmatpush.msra.mxu3 %v7588_v7  ;;  %3196 = vmatpush.msra.mxu1 %v6319_v62  ;;  %v6854_v62 = vpop.f32.mrf.mxu0  ;;  %v2313_v7 = vadd.f32 %v6849_v32, %v6847_v10  ;;  %v4361_v10 = vld [vmem:[%s7408_s25 + $0xf0] sm:$0xff]  ;;  %v4364_v32 = vld [vmem:[%s7408_s25 + $0xd8] sm:$0xff] }
 0x419   : > { %3071 = vmatmul.f32.gmra.mxu2 %v5166_v49 }
 0x41a   : > { %3152 = vmatpush.msra.mxu2 %v7589_v24  ;;  %3172 = vmatpush.msra.mxu3 %v7590_v16  ;;  %v2167_v24 = vadd.f32 %v6827_v6, %v6825_v29  ;;  %v2753_v16 = vld [vmem:[#allocation8] sm:$0xff]  ;;  %v2754_v29 = vld [vmem:[#allocation8 + $0x8] sm:$0xff] }
 0x41b   : > { %3197 = vmatpush.msra.mxu1 %v6338_v55  ;;  %v7597_v55 = vld [vmem:[#allocation83_spill] sm:$0xff]  ;;  %v2458_v40 = vpop.f32.mrf.mxu3  ;;  %v4363_v6 = vld [vmem:[%s7408_s25 + $0xe0] sm:$0xff] }
 0x41c   : > { %3153 = vmatpush.msra.mxu2 %v7591_v28  ;;  %3173 = vmatpush.msra.mxu3 %v7592_v46  ;;  %v4365_v28 = vld [vmem:[%s7408_s25 + $0xd0] sm:$0xff]  ;;  %v4366_v46 = vld [vmem:[%s7408_s25 + $0xc8] sm:$0xff] }
 0x41d   : > { %3198 = vmatpush.msra.mxu1 %v7593_v33  ;;  %v4367_v33 = vld [vmem:[%s7408_s25 + $0xc0] sm:$0xff] }
 0x41e   : > { %3154 = vmatpush.msra.mxu2 %v7594_v3  ;;  %3174 = vmatpush.msra.mxu3 %v7595_v39  ;;  %v4369_v3 = vld [vmem:[%s7408_s25 + $0xb0] sm:$0xff]  ;;  %v4370_v39 = vld [vmem:[%s7408_s25 + $0xa8] sm:$0xff] }
 0x41f   : > { %3199 = vmatpush.msra.mxu1 %v7596_v44  ;;  %3094 = vmatmul.f32.gmra.mxu3 %v5200_v4  ;;  %v4371_v44 = vld [vmem:[%s7408_s25 + $0xa0] sm:$0xff] }
 0x420   : > { %3119 = vmatmul.f32.gmra.mxu1 %v5166_v49  ;;  %3155 = vmatpush.msra.mxu2 %v7597_v55  ;;  %v2365_v21 = vpop.f32.mrf.mxu0  ;;  %v4372_v55 = vld [vmem:[%s7408_s25 + $0x98] sm:$0xff] }
 0x421   : > { %3175 = vmatpush.msra.mxu3 %v7598_v51  ;;  %3200 = vmatpush.msra.mxu1 %v7599_v50  ;;  %v4373_v51 = vld [vmem:[%s7408_s25 + $0x90] sm:$0xff]  ;;  %v4374_v50 = vld [vmem:[%s7408_s25 + $0x88] sm:$0xff] }
 0x422   : > { %3156 = vmatpush.msra.mxu2 %v7600_v63  ;;  %v4375_v63 = vld [vmem:[%s7408_s25 + $0x80] sm:$0xff] }
 0x423   : > { %3176 = vmatpush.msra.mxu3 %v7601_v56  ;;  %3201 = vmatpush.msra.mxu1 %v7602_v23  ;;  %v2604_v36 = vpop.f32.mrf.mxu3  ;;  %v4376_v56 = vld [vmem:[%s7408_s25 + $0x2f8] sm:$0xff]  ;;  %v4377_v23 = vld [vmem:[%s7408_s25 + $0x2f0] sm:$0xff] }
 0x424   : > { %3157 = vmatpush.msra.mxu2 %v7603_v57  ;;  %v4380_v57 = vld [vmem:[%s7408_s25 + $0x2d8] sm:$0xff] }
 0x425   : > { %3177 = vmatpush.msra.mxu3 %v7604_v60  ;;  %3202 = vmatpush.msra.mxu1 %v6419_v47  ;;  %v2584_v47 = vpop.f32.mrf.mxu2  ;;  %v4381_v60 = vld [vmem:[%s7408_s25 + $0x2d0] sm:$0xff] }
 0x426   : > { %3158 = vmatpush.msra.mxu2 %v7605_v15  ;;  %v4383_v15 = vld [vmem:[%s7408_s25 + $0x2c0] sm:$0xff] }
 0x427   : > { %3178 = vmatpush.msra.mxu3 %v7606_v18  ;;  %3203 = vmatpush.msra.mxu1 %v6434_v58  ;;  %v2531_v58 = vpop.f32.mrf.mxu1  ;;  %v4384_v18 = vld [vmem:[%s7408_s25 + $0x2b8] sm:$0xff] }
 0x428   : > { %3159 = vmatpush.msra.mxu2 %v7607_v25  ;;  %v4386_v25 = vld [vmem:[%s7408_s25 + $0x2a8] sm:$0xff] }
 0x429   : > { %3179 = vmatpush.msra.mxu3 %v7608_v27  ;;  %3204 = vmatpush.msra.mxu1 %v6447_v54  ;;  %v2511_v54 = vpop.f32.mrf.mxu0  ;;  %v4387_v27 = vld [vmem:[%s7408_s25 + $0x2a0] sm:$0xff] }
 0x42a   : > { %3160 = vmatpush.msra.mxu2 %v7609_v30  ;;  %v2532_v38 = vadd.f32 %v2531_v58, %v2511_v54  ;;  %v4388_v30 = vld [vmem:[%s7408_s25 + $0x298] sm:$0xff]  ;;  %v4394_v58 = vld [vmem:[%s7408_s25 + $0x4e8] sm:$0xff]  ;;  %v4397_v54 = vld [vmem:[%s7408_s25 + $0x4d0] sm:$0xff] }
 0x42b   : > { %3180 = vmatpush.msra.mxu3 %v7610_v31  ;;  %3205 = vmatpush.msra.mxu1 %v6460_v9  ;;  %v7617_v9 = vld [vmem:[#allocation114_spill] sm:$0xff]  ;;  %v4389_v31 = vld [vmem:[%s7408_s25 + $0x290] sm:$0xff] }
 0x42c   : > { %3161 = vmatpush.msra.mxu2 %v7611_v37  ;;  %v4392_v37 = vld [vmem:[%s7408_s25 + $0x4f8] sm:$0xff] }
 0x42d   : > { %3181 = vmatpush.msra.mxu3 %v7612_v41  ;;  %3206 = vmatpush.msra.mxu1 %v6473_v14  ;;  %v2730_v14 = vpop.f32.mrf.mxu2  ;;  %v4393_v41 = vld [vmem:[%s7408_s25 + $0x4f0] sm:$0xff] }
 0x42e   : > { %3162 = vmatpush.msra.mxu2 %v7613_v43  ;;  %v4395_v43 = vld [vmem:[%s7408_s25 + $0x4e0] sm:$0xff] }
 0x42f   : > { %3182 = vmatpush.msra.mxu3 %v7614_v61  ;;  %3207 = vmatpush.msra.mxu1 %v6486_v20  ;;  %v2677_v13 = vpop.f32.mrf.mxu1  ;;  %v4396_v61 = vld [vmem:[%s7408_s25 + $0x4d8] sm:$0xff] }
 0x430   : > { %3163 = vmatpush.msra.mxu2 %v7615_v45  ;;  %v4398_v45 = vld [vmem:[%s7408_s25 + $0x4c8] sm:$0xff] }
 0x431   : > { %3183 = vmatpush.msra.mxu3 %v7616_v59  ;;  %3208 = vmatpush.msra.mxu1 %v6499_v17  ;;  %v2657_v2 = vpop.f32.mrf.mxu0  ;;  %v4399_v59 = vld [vmem:[%s7408_s25 + $0x4c0] sm:$0xff] }
 0x432   : > { %3164 = vmatmul.f32.vlgmr.msra.gmra.mxu2 %v5174_v53  ;;  %v2678_v17 = vadd.f32 %v2677_v13, %v2657_v2  ;;  %v3251_v13 = vld [vmem:[#allocation13 + $0x38] sm:$0xff] }
 0x433   : > { %3184 = vmatpush.msra.mxu3 %v7617_v9  ;;  %3209 = vmatpush.msra.mxu1 %v6512_v1  ;;  %v2750_v12 = vpop.f32.mrf.mxu3  ;;  %v2605_v1 = vadd.f32 %v2604_v36, %v2584_v47  ;;  %v4390_v47 = vld [vmem:[%s7408_s25 + $0x288] sm:$0xff]  ;;  %v4391_v36 = vld [vmem:[%s7408_s25 + $0x280] sm:$0xff]  ;;  %v4400_v9 = vld [vmem:[%s7408_s25 + $0x4b8] sm:$0xff] }
 0x434   : > { %v2751_v20 = vadd.f32 %v2750_v12, %v2730_v14  ;;  %v4401_v14 = vld [vmem:[%s7408_s25 + $0x4b0] sm:$0xff]  ;;  %v4402_v12 = vld [vmem:[%s7408_s25 + $0x4a8] sm:$0xff]  ;;  %3273 = vmatpush.msrb.mxu2 %v3251_v13 }
 0x435   : > { %3185 = vmatpush.msra.mxu3 %v7618_v35  ;;  %3210 = vmatpush.msra.mxu1 %v6525_v19  ;;  %v2459_v19 = vadd.f32 %v2458_v40, %v2438_v34  ;;  %v4378_v34 = vld [vmem:[%s7408_s25 + $0x2e8] sm:$0xff]  ;;  %v4379_v40 = vld [vmem:[%s7408_s25 + $0x2e0] sm:$0xff]  ;;  %v3340_v2 = vld [vmem:[#allocation13 + $0xb8] sm:$0xff] }
 0x436   : > { %2768 = vmatpush.msra.mxu0 %v2751_v20  ;;  %v4403_v35 = vld [vmem:[%s7408_s25 + $0x4a0] sm:$0xff]  ;;  %v4404_v20 = vld [vmem:[%s7408_s25 + $0x498] sm:$0xff]  ;;  %v7632_v13 = vld [vmem:[#allocation127_spill] sm:$0xff] }
 0x437   : > { %3186 = vmatpush.msra.mxu3 %v7619_v0  ;;  %3211 = vmatpush.msra.mxu1 %v6538_v22  ;;  %v2386_v22 = vadd.f32 %v2385_v5, %v2365_v21  ;;  %v4382_v5 = vld [vmem:[%s7408_s25 + $0x2c8] sm:$0xff]  ;;  %v4385_v21 = vld [vmem:[%s7408_s25 + $0x2b0] sm:$0xff] }
 0x438   : > { %3187 = vmatmul.f32.vlgmr.msra.gmra.mxu3 %v5211_v8  ;;  %3212 = vmatmul.f32.vlgmr.msra.gmra.mxu1 %v5174_v53  ;;  %v2240_v53 = vadd.f32 %v6844_v42, %v6854_v62  ;;  %v4362_v42 = vld [vmem:[%s7408_s25 + $0xe8] sm:$0xff]  ;;  %v4368_v62 = vld [vmem:[%s7408_s25 + $0xb8] sm:$0xff]  ;;  %v3302_v0 = vld [vmem:[#allocation13 + $0x78] sm:$0xff] }
 0x439   : > { %2769 = vmatpush.msra.mxu0 %v2678_v17  ;;  %v4405_v17 = vld [vmem:[%s7408_s25 + $0x490] sm:$0xff]  ;;  %3311 = vmatpush.msrb.mxu3 %v3302_v0 }
 0x43a   : > { %3167 = vmatmul.f32.gmra.mxu2 %v5166_v49  ;;  %3349 = vmatpush.msrb.mxu1 %v3340_v2  ;;  %v7633_v2 = vld [vmem:[#allocation128_spill] sm:$0xff] }
 0x43b   : > { %2770 = vmatpush.msra.mxu0 %v2605_v1  ;;  %v3250_v1 = vld [vmem:[#allocation13 + $0x30] sm:$0xff] }
 0x43c   : > { %3274 = vmatpush.msrb.mxu2 %v3250_v1  ;;  %v7635_v1 = vld [vmem:[#allocation130_spill] sm:$0xff] }
 0x43d   : > { %2771 = vmatpush.msra.mxu0 %v2532_v38  ;;  %v3301_v38 = vld [vmem:[#allocation13 + $0x70] sm:$0xff] }
 0x43e   : > { %3312 = vmatpush.msrb.mxu3 %v3301_v38  ;;  %v7636_v38 = vld [vmem:[#allocation131_spill] sm:$0xff] }
 0x43f   : > { %2772 = vmatpush.msra.mxu0 %v2459_v19  ;;  %v3339_v19 = vld [vmem:[#allocation13 + $0xb0] sm:$0xff] }
 0x440   : > { %3190 = vmatmul.f32.gmra.mxu3 %v5200_v4  ;;  %3215 = vmatmul.f32.gmra.mxu1 %v5166_v49  ;;  %v4360_v49 = vld [vmem:[%s7408_s25 + $0xf8] sm:$0xff] }
 0x441   : > { %2773 = vmatpush.msra.mxu0 %v2386_v22  ;;  %v4406_v22 = vld [vmem:[%s7408_s25 + $0x488] sm:$0xff]  ;;  %3350 = vmatpush.msrb.mxu1 %v3339_v19  ;;  %v7637_v19 = vld [vmem:[#allocation132_spill] sm:$0xff] }
 0x443   : > { %2774 = vmatpush.msra.mxu0 %v2313_v7  ;;  %v3249_v7 = vld [vmem:[#allocation13 + $0x28] sm:$0xff] }
 0x444   : > { %3275 = vmatpush.msrb.mxu2 %v3249_v7  ;;  %v7639_v7 = vld [vmem:[#allocation134_spill] sm:$0xff] }
 0x445   : > { %2775 = vmatpush.msra.mxu0 %v2240_v53  ;;  %v3300_v53 = vld [vmem:[#allocation13 + $0x68] sm:$0xff] }
 0x446   : > { %3313 = vmatpush.msrb.mxu3 %v3300_v53  ;;  %v3378_v53 = vld [vmem:[#allocation13 + $0xf8] sm:$0xff] }
 0x447   : > { %2776 = vmatpush.msra.mxu0 %v2167_v24  ;;  %v3338_v24 = vld [vmem:[#allocation13 + $0xa8] sm:$0xff] }
 0x448   : > { %4141 = vmatmul.msk.f32.vlgmr.msra.gmra.mxu0 %vm1945_vm0, %v2753_v16  ;;  %v4407_v16 = vld [vmem:[%s7408_s25 + $0x480] sm:$0xff]  ;;  %3351 = vmatpush.msrb.mxu1 %v3338_v24  ;;  %v3377_v24 = vld [vmem:[#allocation13 + $0xf0] sm:$0xff] }
 0x449   : > { %2837 = vmatpush.msrb.mxu0 %v4360_v49  ;;  %v3248_v49 = vld [vmem:[#allocation13 + $0x20] sm:$0xff] }
 0x44a   : > { %3276 = vmatpush.msrb.mxu2 %v3248_v49  ;;  %v3375_v49 = vld [vmem:[#allocation13 + $0xe0] sm:$0xff] }
 0x44b   : > { %2838 = vmatpush.msrb.mxu0 %v4361_v10  ;;  %v3299_v10 = vld [vmem:[#allocation13 + $0x60] sm:$0xff] }
 0x44c   : > { %3314 = vmatpush.msrb.mxu3 %v3299_v10  ;;  %v3374_v10 = vld [vmem:[#allocation13 + $0xd8] sm:$0xff] }
 0x44d   : > { %2839 = vmatpush.msrb.mxu0 %v4362_v42  ;;  %v3337_v42 = vld [vmem:[#allocation13 + $0xa0] sm:$0xff] }
 0x44e   : > { %3352 = vmatpush.msrb.mxu1 %v3337_v42 }
 0x44f   : > { %2840 = vmatpush.msrb.mxu0 %v4363_v6  ;;  %v3247_v6 = vld [vmem:[#allocation13 + $0x18] sm:$0xff] }
 0x450   : > { %4142 = vmatmul.msk.f32.gmra.mxu0 %vm1945_vm0, %v2754_v29  ;;  %v4408_v29 = vld [vmem:[%s7408_s25 + $0x6f8] sm:$0xff]  ;;  %3277 = vmatpush.msrb.mxu2 %v3247_v6  ;;  %v2877_v6 = vpop.f32.mrf.mxu2 }
 0x451   : > { %2841 = vmatpush.msrb.mxu0 %v4364_v32  ;;  %v3298_v32 = vld [vmem:[#allocation13 + $0x58] sm:$0xff] }
 0x452   : > { %3315 = vmatpush.msrb.mxu3 %v3298_v32 }
 0x453   : > { %2842 = vmatpush.msrb.mxu0 %v4365_v28  ;;  %v3336_v28 = vld [vmem:[#allocation13 + $0x98] sm:$0xff] }
 0x454   : > { %3353 = vmatpush.msrb.mxu1 %v3336_v28 }
 0x455   : > { %2843 = vmatpush.msrb.mxu0 %v4366_v46  ;;  %v4409_v46 = vld [vmem:[%s7408_s25 + $0x6f0] sm:$0xff] }
 0x457   : > { %2844 = vmatpush.msrb.mxu0 %v4367_v33  ;;  %v3246_v33 = vld [vmem:[#allocation13 + $0x10] sm:$0xff] }
 0x458   : > { %3278 = vmatpush.msrb.mxu2 %v3246_v33  ;;  %v7136_v33 = vpop.f32.mrf.mxu2 }
 0x459   : > { %2845 = vmatpush.msrb.mxu0 %v4368_v62  ;;  %v3297_v62 = vld [vmem:[#allocation13 + $0x50] sm:$0xff] }
 0x45a   : > { %3316 = vmatpush.msrb.mxu3 %v3297_v62 }
 0x45b   : > { %2846 = vmatpush.msrb.mxu0 %v4369_v3  ;;  %v3335_v3 = vld [vmem:[#allocation13 + $0x90] sm:$0xff] }
 0x45c   : > { %3354 = vmatpush.msrb.mxu1 %v3335_v3  ;;  %v3416_v3 = vld [vmem:[#allocation13 + $0x138] sm:$0xff] }
 0x45d   : > { %2847 = vmatpush.msrb.mxu0 %v4370_v39  ;;  %v4410_v39 = vld [vmem:[%s7408_s25 + $0x6e8] sm:$0xff] }
 0x45f   : > { %2848 = vmatpush.msrb.mxu0 %v4371_v44  ;;  %v3245_v44 = vld [vmem:[#allocation13 + $0x8] sm:$0xff] }
 0x460   : > { %3279 = vmatpush.msrb.mxu2 %v3245_v44 }
 0x461   : > { %2849 = vmatpush.msrb.mxu0 %v4372_v55  ;;  %v3296_v55 = vld [vmem:[#allocation13 + $0x48] sm:$0xff] }
 0x462   : > { %3317 = vmatpush.msrb.mxu3 %v3296_v55 }
 0x463   : > { %2850 = vmatpush.msrb.mxu0 %v4373_v51  ;;  %v4411_v51 = vld [vmem:[%s7408_s25 + $0x6e0] sm:$0xff] }
 0x465   : > { %2851 = vmatpush.msrb.mxu0 %v4374_v50  ;;  %v3334_v50 = vld [vmem:[#allocation13 + $0x88] sm:$0xff] }
 0x466   : > { %3355 = vmatpush.msrb.mxu1 %v3334_v50 }
 0x467   : > { %2852 = vmatpush.msrb.mxu0 %v4375_v63  ;;  %v3244_v63 = vld [vmem:[#allocation13] sm:$0xff] }
 0x468   : > { %2853 = vmatmul.f32.vlgmr.msrb.gmra.mxu0 %v5211_v8  ;;  %3280 = vmatpush.msrb.mxu2 %v3244_v63 }
 0x469   : > { %2931 = vmatpush.msra.mxu0 %v4376_v56  ;;  %v3295_v56 = vld [vmem:[#allocation13 + $0x40] sm:$0xff] }
 0x46a   : > { %3318 = vmatpush.msrb.mxu3 %v3295_v56  ;;  %3425 = vmatpush.msra.mxu2 %v3416_v3 }
 0x46b   : > { %2932 = vmatpush.msra.mxu0 %v4377_v23  ;;  %v4412_v23 = vld [vmem:[%s7408_s25 + $0x6d8] sm:$0xff] }
 0x46d   : > { %2933 = vmatpush.msra.mxu0 %v4378_v34  ;;  %v3333_v34 = vld [vmem:[#allocation13 + $0x80] sm:$0xff] }
 0x46e   : > { %3356 = vmatpush.msrb.mxu1 %v3333_v34 }
 0x46f   : > { %2934 = vmatpush.msra.mxu0 %v4379_v40  ;;  %v4413_v40 = vld [vmem:[%s7408_s25 + $0x6d0] sm:$0xff] }
 0x470   : > { %2856 = vmatmul.f32.gmra.mxu0 %v5200_v4 }
 0x471   : > { %2935 = vmatpush.msra.mxu0 %v4380_v57  ;;  %v4414_v57 = vld [vmem:[%s7408_s25 + $0x6c8] sm:$0xff]  ;;  %v2973_v55 = vpop.f32.mrf.mxu2 }
 0x473   : > { %2936 = vmatpush.msra.mxu0 %v4381_v60  ;;  %v4415_v60 = vld [vmem:[%s7408_s25 + $0x6c0] sm:$0xff] }
 0x475   : > { %2937 = vmatpush.msra.mxu0 %v4382_v5  ;;  %v7620_v5 = vld [vmem:[#allocation94_spill] sm:$0xff] }
 0x477   : > { %2938 = vmatpush.msra.mxu0 %v4383_v15  ;;  %v7621_v15 = vld [vmem:[#allocation98_spill] sm:$0xff] }
 0x479   : > { %2939 = vmatpush.msra.mxu0 %v4384_v18  ;;  %v7622_v18 = vld [vmem:[#allocation102_spill] sm:$0xff] }
 0x47a   : > { %v7144_v56 = vpop.f32.mrf.mxu2 }
 0x47b   : > { %2940 = vmatpush.msra.mxu0 %v4385_v21  ;;  %v7623_v21 = vld [vmem:[#allocation106_spill] sm:$0xff] }
 0x47d   : > { %2941 = vmatpush.msra.mxu0 %v4386_v25  ;;  %v7624_v25 = vld [vmem:[#allocation110_spill] sm:$0xff] }
 0x47f   : > { %2942 = vmatpush.msra.mxu0 %v4387_v27  ;;  %v7625_v27 = vld [vmem:[#allocation113_spill] sm:$0xff] }
 0x481   : > { %2943 = vmatpush.msra.mxu0 %v4388_v30  ;;  %v2789_v30 = vpop.permute.xlu0 %2788 }
 0x483   : > { %2944 = vmatpush.msra.mxu0 %v4389_v31  ;;  %v7626_v31 = vld [vmem:[#allocation115_spill] sm:$0xff] }
 0x485   : > { %2945 = vmatpush.msra.mxu0 %v4390_v47 }
 0x487   : > { %2946 = vmatpush.msra.mxu0 %v4391_v36 }
 0x488   : > { %2947 = vmatmul.f32.vlgmr.msra.gmra.mxu0 %v5211_v8 }
 0x489   : > { %3027 = vmatpush.msrb.mxu0 %v4392_v37  ;;  %v2803_v37 = vpop.permute.xlu1 %2802 }
 0x48b   : > { %3028 = vmatpush.msrb.mxu0 %v4393_v41  ;;  %v7627_v41 = vld [vmem:[#allocation118_spill] sm:$0xff] }
 0x48d   : > { %3029 = vmatpush.msrb.mxu0 %v4394_v58 }
 0x48f   : > { %3030 = vmatpush.msrb.mxu0 %v4395_v43  ;;  %v7628_v43 = vld [vmem:[#allocation121_spill] sm:$0xff] }
 0x490   : > { %2950 = vmatmul.f32.gmra.mxu0 %v5200_v4 }
 0x491   : > { %3031 = vmatpush.msrb.mxu0 %v4396_v61 }
 0x493   : > { %3032 = vmatpush.msrb.mxu0 %v4397_v54  ;;  %v7629_v54 = vld [vmem:[#allocation123_spill] sm:$0xff] }
 0x495   : > { %3033 = vmatpush.msrb.mxu0 %v4398_v45  ;;  %v2794_v45 = vpop.permute.xlu2 %2793 }
 0x497   : > { %3034 = vmatpush.msrb.mxu0 %v4399_v59  ;;  %v7630_v59 = vld [vmem:[#allocation125_spill] sm:$0xff] }
 0x499   : > { %3035 = vmatpush.msrb.mxu0 %v4400_v9 }
 0x49b   : > { %3036 = vmatpush.msrb.mxu0 %v4401_v14 }
 0x49d   : > { %3037 = vmatpush.msrb.mxu0 %v4402_v12  ;;  %v2808_v12 = vpop.permute.xlu0 %2807 }
 0x49f   : > { %3038 = vmatpush.msrb.mxu0 %v4403_v35  ;;  %v7631_v35 = vld [vmem:[#allocation126_spill] sm:$0xff] }
 0x4a1   : > { %3039 = vmatpush.msrb.mxu0 %v4404_v20 }
 0x4a3   : > { %3040 = vmatpush.msrb.mxu0 %v4405_v17  ;;  %v7634_v17 = vld [vmem:[#allocation129_spill] sm:$0xff] }
 0x4a5   : > { %3041 = vmatpush.msrb.mxu0 %v4406_v22  ;;  %v7638_v22 = vld [vmem:[#allocation133_spill] sm:$0xff] }
 0x4a7   : > { %3042 = vmatpush.msrb.mxu0 %v4407_v16  ;;  %v3376_v16 = vld [vmem:[#allocation13 + $0xe8] sm:$0xff] }
 0x4a8   : > { %3043 = vmatmul.f32.vlgmr.msrb.gmra.mxu0 %v5211_v8 }
 0x4a9   : > { %3123 = vmatpush.msra.mxu0 %v4408_v29 }
 0x4ab   : > { %3124 = vmatpush.msra.mxu0 %v4409_v46 }
 0x4ad   : > { %3125 = vmatpush.msra.mxu0 %v4410_v39 }
 0x4af   : > { %3126 = vmatpush.msra.mxu0 %v4411_v51 }
 0x4b0   : > { %3046 = vmatmul.f32.gmra.mxu0 %v5200_v4 }
 0x4b1   : > { %3127 = vmatpush.msra.mxu0 %v4412_v23  ;;  %v3415_v23 = vld [vmem:[#allocation13 + $0x130] sm:$0xff] }
 0x4b2   : > { %3426 = vmatpush.msra.mxu2 %v3415_v23 }
 0x4b3   : > { %3128 = vmatpush.msra.mxu0 %v4413_v40 }
 0x4b5   : > { %3129 = vmatpush.msra.mxu0 %v4414_v57  ;;  %v3414_v57 = vld [vmem:[#allocation13 + $0x128] sm:$0xff] }
 0x4b6   : > { %3427 = vmatpush.msra.mxu2 %v3414_v57 }
 0x4b7   : > { %3130 = vmatpush.msra.mxu0 %v4415_v60  ;;  %v3454_v60 = vld [vmem:[#allocation13 + $0x178] sm:$0xff] }
 0x4b8   : > { %3463 = vmatpush.msra.mxu3 %v3454_v60 }
 0x4b9   : > { %3131 = vmatpush.msra.mxu0 %v7620_v5  ;;  %v3492_v5 = vld [vmem:[#allocation13 + $0x1b8] sm:$0xff] }
 0x4ba   : > { %3501 = vmatpush.msra.mxu1 %v3492_v5 }
 0x4bb   : > { %3132 = vmatpush.msra.mxu0 %v7621_v15  ;;  %v3530_v15 = vld [vmem:[#allocation13 + $0x1f8] sm:$0xff] }
 0x4bd   : > { %3133 = vmatpush.msra.mxu0 %v7622_v18 }
 0x4bf   : > { %3134 = vmatpush.msra.mxu0 %v7623_v21  ;;  %v7152_v21 = vpop.f32.mrf.mxu2 }
 0x4c1   : > { %3135 = vmatpush.msra.mxu0 %v7624_v25 }
 0x4c3   : > { %3136 = vmatpush.msra.mxu0 %v7625_v27  ;;  %v3453_v27 = vld [vmem:[#allocation13 + $0x170] sm:$0xff] }
 0x4c4   : > { %3464 = vmatpush.msra.mxu3 %v3453_v27  ;;  %v3567_v27 = vld [vmem:[#allocation13 + $0x230] sm:$0xff] }
 0x4c5   : > { %3137 = vmatpush.msra.mxu0 %v7626_v31  ;;  %v2778_v47 = vpop.f32.mrf.mxu0  ;;  %v3529_v31 = vld [vmem:[#allocation13 + $0x1f0] sm:$0xff] }
 0x4c6   : > { %v2796_v36 = vmul.f32 %v2789_v30, %v2778_v47  ;;  %v3491_v30 = vld [vmem:[#allocation13 + $0x1b0] sm:$0xff] }
 0x4c7   : > { %3138 = vmatpush.msra.mxu0 %v7627_v41  ;;  %3502 = vmatpush.msra.mxu1 %v3491_v30  ;;  %v3490_v41 = vld [vmem:[#allocation13 + $0x1a8] sm:$0xff] }
 0x4c8   : > { %3139 = vmatmul.f32.vlgmr.msra.gmra.mxu0 %v5211_v8  ;;  %v2810_v58 = vadd.f32 %v2803_v37, %v2796_v36  ;;  %v3413_v36 = vld [vmem:[#allocation13 + $0x120] sm:$0xff]  ;;  %v3452_v37 = vld [vmem:[#allocation13 + $0x168] sm:$0xff] }
 0x4c9   : > { %3219 = vmatpush.msrb.mxu0 %v7628_v43  ;;  %3428 = vmatpush.msra.mxu2 %v3413_v36 }
 0x4ca   : > { %v7092_v61 = vmax.f32 %v2810_v58, 0.0  ;;  %3465 = vmatpush.msra.mxu3 %v3452_v37  ;;  %3503 = vmatpush.msra.mxu1 %v3490_v41 }
 0x4cb   : > { %3220 = vmatpush.msrb.mxu0 %v7629_v54  ;;  %v3528_v54 = vld [vmem:[#allocation13 + $0x1e8] sm:$0xff] }
 0x4cc   : > { %4143 = vmatmul.msk.f32.vlgmr.msrb.gmra.mxu2 %vm3252_vm2, %v7092_v61  ;;  %4147 = vmatmul.msk.f32.vlgmr.msrb.gmra.mxu3 %vm3252_vm2, %v7092_v61 }
 0x4cd   : > { %3221 = vmatpush.msrb.mxu0 %v7630_v59  ;;  %4151 = vmatmul.msk.f32.vlgmr.msrb.gmra.mxu1 %vm3252_vm2, %v7092_v61  ;;  %v2781_v9 = vpop.f32.mrf.mxu0  ;;  %v3489_v59 = vld [vmem:[#allocation13 + $0x1a0] sm:$0xff] }
 0x4ce   : > { %v2797_v14 = vmul.f32 %v2794_v45, %v2781_v9  ;;  %v3451_v45 = vld [vmem:[#allocation13 + $0x160] sm:$0xff]  ;;  %3504 = vmatpush.msra.mxu1 %v3489_v59 }
 0x4cf   : > { %3222 = vmatpush.msrb.mxu0 %v7631_v35  ;;  %3466 = vmatpush.msra.mxu3 %v3451_v45 }
 0x4d0   : > { %3142 = vmatmul.f32.gmra.mxu0 %v5200_v4  ;;  %v2811_v20 = vadd.f32 %v2808_v12, %v2797_v14  ;;  %v3527_v14 = vld [vmem:[#allocation13 + $0x1e0] sm:$0xff]  ;;  %v3412_v12 = vld [vmem:[#allocation13 + $0x118] sm:$0xff] }
 0x4d1   : > { %3223 = vmatpush.msrb.mxu0 %v7632_v13  ;;  %3429 = vmatpush.msra.mxu2 %v3412_v12  ;;  %v3488_v13 = vld [vmem:[#allocation13 + $0x198] sm:$0xff] }
 0x4d2   : > { %v7105_v0 = vmax.f32 %v2811_v20, 0.0  ;;  %v3450_v20 = vld [vmem:[#allocation13 + $0x158] sm:$0xff]  ;;  %3505 = vmatpush.msra.mxu1 %v3488_v13  ;;  %v3562_v13 = vld [vmem:[#allocation13 + $0x208] sm:$0xff] }
 0x4d3   : > { %3224 = vmatpush.msrb.mxu0 %v7633_v2  ;;  %v3526_v2 = vld [vmem:[#allocation13 + $0x1d8] sm:$0xff]  ;;  %3467 = vmatpush.msra.mxu3 %v3450_v20  ;;  %v3563_v20 = vld [vmem:[#allocation13 + $0x210] sm:$0xff] }
 0x4d4   : > { %4144 = vmatmul.msk.f32.gmra.mxu2 %vm3252_vm2, %v7105_v0  ;;  %4148 = vmatmul.msk.f32.gmra.mxu3 %vm3252_vm2, %v7105_v0 }
 0x4d5   : > { %3225 = vmatpush.msrb.mxu0 %v7634_v17  ;;  %4152 = vmatmul.msk.f32.gmra.mxu1 %vm3252_vm2, %v7105_v0  ;;  %v3411_v17 = vld [vmem:[#allocation13 + $0x110] sm:$0xff] }
 0x4d6   : > { %3430 = vmatpush.msra.mxu2 %v3411_v17 }
 0x4d7   : > { %3226 = vmatpush.msrb.mxu0 %v7635_v1 }
 0x4d9   : > { %3227 = vmatpush.msrb.mxu0 %v7636_v38  ;;  %v3449_v38 = vld [vmem:[#allocation13 + $0x150] sm:$0xff] }
 0x4da   : > { %3468 = vmatpush.msra.mxu3 %v3449_v38 }
 0x4db   : > { %3228 = vmatpush.msrb.mxu0 %v7637_v19  ;;  %v3487_v19 = vld [vmem:[#allocation13 + $0x190] sm:$0xff] }
 0x4dc   : > { %3506 = vmatpush.msra.mxu1 %v3487_v19 }
 0x4dd   : > { %3229 = vmatpush.msrb.mxu0 %v7638_v22  ;;  %v3410_v22 = vld [vmem:[#allocation13 + $0x108] sm:$0xff] }
 0x4de   : > { %3431 = vmatpush.msra.mxu2 %v3410_v22 }
 0x4df   : > { %3230 = vmatpush.msrb.mxu0 %v6531_v48  ;;  %v3373_v48 = vld [vmem:[#allocation13 + $0xd0] sm:$0xff] }
 0x4e1   : > { %3231 = vmatpush.msrb.mxu0 %v7639_v7 }
 0x4e3   : > { %3232 = vmatpush.msrb.mxu0 %v6552_v11  ;;  %v3372_v11 = vld [vmem:[#allocation13 + $0xc8] sm:$0xff] }
 0x4e5   : > { %3233 = vmatpush.msrb.mxu0 %v6560_v52  ;;  %v3371_v52 = vld [vmem:[#allocation13 + $0xc0] sm:$0xff] }
 0x4e7   : > { %3234 = vmatpush.msrb.mxu0 %v6572_v26  ;;  %v2854_v26 = vpop.f32.mrf.mxu0 }
 0x4e8   : > { %3235 = vmatmul.f32.vlgmr.msrb.gmra.mxu0 %v5211_v8  ;;  %v2831_v8 = vpop.f32.mrf.mxu1 }
 0x4e9   : > { %3387 = vmatpush.msra.mxu0 %v3378_v53  ;;  %v2855_v25 = vadd.f32 %v2854_v26, %v2831_v8  ;;  %v3525_v53 = vld [vmem:[#allocation13 + $0x1d0] sm:$0xff]  ;;  %v3524_v8 = vld [vmem:[#allocation13 + $0x1c8] sm:$0xff] }
 0x4eb   : > { %3388 = vmatpush.msra.mxu0 %v3377_v24  ;;  %v3409_v24 = vld [vmem:[#allocation13 + $0x100] sm:$0xff] }
 0x4ec   : > { %3432 = vmatpush.msra.mxu2 %v3409_v24 }
 0x4ed   : > { %3389 = vmatpush.msra.mxu0 %v3376_v16 }
 0x4ef   : > { %3390 = vmatpush.msra.mxu0 %v3375_v49  ;;  %v7132_v29 = vpop.f32.mrf.mxu0 }
 0x4f0   : > { %3238 = vmatmul.f32.gmra.mxu0 %v5200_v4  ;;  %v7130_v42 = vpop.f32.mrf.mxu1  ;;  %v2900_v4 = vpop.f32.mrf.mxu3 }
 0x4f1   : > { %3391 = vmatpush.msra.mxu0 %v3374_v10  ;;  %v2901_v58 = vadd.f32 %v2900_v4, %v2877_v6  ;;  %v2858_v49 = vadd.f32 %v7132_v29, %v7130_v42  ;;  %v3485_v42 = vld [vmem:[#allocation13 + $0x180] sm:$0xff] }
 0x4f3   : > { %3392 = vmatpush.msra.mxu0 %v3373_v48  ;;  %v2906_v35 = vmax.f32 %v2855_v25, %v2901_v58  ;;  %v3448_v48 = vld [vmem:[#allocation13 + $0x148] sm:$0xff]  ;;  %v3568_v25 = vld [vmem:[#allocation13 + $0x238] sm:$0xff] }
 0x4f4   : > { %3469 = vmatpush.msra.mxu3 %v3448_v48  ;;  %3577 = vmatpush.msrb.mxu2 %v3568_v25  ;;  %v3566_v58 = vld [vmem:[#allocation13 + $0x228] sm:$0xff] }
 0x4f5   : > { %3393 = vmatpush.msra.mxu0 %v3372_v11  ;;  %v3486_v11 = vld [vmem:[#allocation13 + $0x188] sm:$0xff] }
 0x4f6   : > { %3507 = vmatpush.msra.mxu1 %v3486_v11  ;;  %3578 = vmatpush.msrb.mxu2 %v3567_v27  ;;  %v3602_v27 = vld [vmem:[#allocation10 + $0x20] sm:$0xff] }
 0x4f7   : > { %3394 = vmatpush.msra.mxu0 %v3371_v52  ;;  %v3072_v52 = vpop.f32.mrf.mxu2 }
 0x4f8   : > { %4155 = vmatmul.msk.f32.vlgmr.msra.gmra.mxu0 %vm3252_vm2, %v7092_v61  ;;  %v2925_v32 = vpop.f32.mrf.mxu1  ;;  %v7134_v46 = vpop.f32.mrf.mxu3  ;;  %3508 = vmatpush.msra.mxu1 %v3485_v42 }
 0x4f9   : > { %3539 = vmatpush.msrb.mxu0 %v3530_v15  ;;  %v2904_v26 = vadd.f32 %v7134_v46, %v7136_v33  ;;  %3579 = vmatpush.msrb.mxu2 %v3566_v58 }
 0x4fb   : > { %3540 = vmatpush.msrb.mxu0 %v3529_v31  ;;  %v2907_v3 = vmax.f32 %v2858_v49, %v2904_v26 }
 0x4fd   : > { %3541 = vmatpush.msrb.mxu0 %v3528_v54 }
 0x4ff   : > { %3542 = vmatpush.msrb.mxu0 %v3527_v14  ;;  %v3165_v57 = vpop.f32.mrf.mxu2 }
 0x500   : > { %4156 = vmatmul.msk.f32.gmra.mxu0 %vm3252_vm2, %v7105_v0  ;;  %v7138_v62 = vpop.f32.mrf.mxu1  ;;  %v2996_v44 = vpop.f32.mrf.mxu3 }
 0x501   : > { %v2997_v16 = vadd.f32 %v2996_v44, %v2973_v55  ;;  %3543 = vmatpush.msrb.mxu0 %v3526_v2  ;;  %v3561_v2 = vld [vmem:[#allocation13 + $0x200] sm:$0xff] }
 0x503   : > { %3544 = vmatpush.msrb.mxu0 %v3525_v53 }
 0x505   : > { %v2948_v28 = vpop.f32.mrf.mxu0  ;;  %3545 = vmatpush.msrb.mxu0 %v3524_v8 }
 0x506   : > { %v2949_v43 = vadd.f32 %v2948_v28, %v2925_v32  ;;  %v3447_v32 = vld [vmem:[#allocation13 + $0x140] sm:$0xff] }
 0x507   : > { %v3523_v28 = vld [vmem:[#allocation13 + $0x1c0] sm:$0xff]  ;;  %3470 = vmatpush.msra.mxu3 %v3447_v32 }
 0x508   : > { %v3021_v51 = vpop.f32.mrf.mxu1  ;;  %v7142_v63 = vpop.f32.mrf.mxu3  ;;  %v2954_v1 = vmax.f32 %v2906_v35, %v2949_v43  ;;  %3546 = vmatpush.msrb.mxu0 %v3523_v28  ;;  %v3565_v43 = vld [vmem:[#allocation13 + $0x220] sm:$0xff]  ;;  %v3564_v35 = vld [vmem:[#allocation13 + $0x218] sm:$0xff] }
 0x509   : > { %3580 = vmatpush.msrb.mxu2 %v3565_v43 }
 0x50a   : > { %v3002_v6 = vmax.f32 %v2954_v1, %v2997_v16 }
 0x50b   : > { %3581 = vmatpush.msrb.mxu2 %v3564_v35 }
 0x50d   : > { %v7140_v39 = vpop.f32.mrf.mxu0  ;;  %3582 = vmatpush.msrb.mxu2 %v3563_v20 }
 0x50e   : > { %v2952_v4 = vadd.f32 %v7140_v39, %v7138_v62 }
 0x50f   : > { %3583 = vmatpush.msrb.mxu2 %v3562_v13 }
 0x510   : > { %v7146_v34 = vpop.f32.mrf.mxu1  ;;  %v7150_v18 = vpop.f32.mrf.mxu3  ;;  %v2955_v33 = vmax.f32 %v2907_v3, %v2952_v4 }
 0x511   : > { %v3093_v46 = vadd.f32 %v7150_v18, %v7152_v21  ;;  %3584 = vmatpush.msrb.mxu2 %v3561_v2 }
 0x518   : > { %v7154_v47 = vpop.f32.mrf.mxu1  ;;  %v3095_v7 = vpop.f32.mrf.mxu3 }
 0x519   : > { %v3096_v31 = vadd.f32 %v3095_v7, %v3072_v52 }
 0x520   : > { %v3120_v29 = vpop.f32.mrf.mxu1  ;;  %v3188_v39 = vpop.f32.mrf.mxu3 }
 0x521   : > { %v3189_v30 = vadd.f32 %v3188_v39, %v3165_v57  ;;  %v3601_v39 = vld [vmem:[#allocation10 + $0x18] sm:$0xff] }
 0x525   : > { %v3044_v50 = vpop.f32.mrf.mxu0 }
 0x526   : > { %v3045_v10 = vadd.f32 %v3044_v50, %v3021_v51  ;;  %v3000_v51 = vadd.f32 %v7142_v63, %v7144_v56 }
 0x528   : > { %v3050_v44 = vmax.f32 %v3002_v6, %v3045_v10  ;;  %v3003_v60 = vmax.f32 %v2955_v33, %v3000_v51  ;;  %v3213_v15 = vpop.f32.mrf.mxu1  ;;  %v3191_v41 = vpop.f32.mrf.mxu3 }
 0x52a   : > { %v3098_v23 = vmax.f32 %v3050_v44, %v3093_v46 }
 0x52d   : > { %v7148_v40 = vpop.f32.mrf.mxu0 }
 0x52e   : > { %v3048_v50 = vadd.f32 %v7148_v40, %v7146_v34  ;;  %v3168_v40 = vpop.f32.mrf.mxu2 }
 0x52f   : > { %v3192_v54 = vadd.f32 %v3191_v41, %v3168_v40 }
 0x530   : > { %v3051_v18 = vmax.f32 %v3003_v60, %v3048_v50  ;;  %v3216_v45 = vpop.f32.mrf.mxu1 }
 0x532   : > { %v3099_v63 = vmax.f32 %v3051_v18, %v3096_v31  ;;  %v3603_v18 = vld [vmem:[#allocation10 + $0x28] sm:$0xff] }
 0x545   : > { %v3140_v9 = vpop.f32.mrf.mxu0 }
 0x546   : > { %v3141_v62 = vadd.f32 %v3140_v9, %v7154_v47 }
 0x548   : > { %v3146_v5 = vmax.f32 %v3098_v23, %v3141_v62 }
 0x54a   : > { %v3194_v36 = vmax.f32 %v3146_v5, %v3189_v30  ;;  %v3358_v17 = vpop.f32.mrf.mxu1  ;;  %v3600_v30 = vld [vmem:[#allocation10 + $0x10] sm:$0xff] }
 0x54d   : > { %v3143_v55 = vpop.f32.mrf.mxu0 }
 0x54e   : > { %v3144_v47 = vadd.f32 %v3143_v55, %v3120_v29  ;;  %v3598_v55 = vld [vmem:[#allocation10] sm:$0xff] }
 0x54f   : > { %v3282_v38 = vpop.f32.mrf.mxu2  ;;  %v3320_v19 = vpop.f32.mrf.mxu3 }
 0x550   : > { %v3147_v34 = vmax.f32 %v3099_v63, %v3144_v47 }
 0x552   : > { %v3195_v9 = vmax.f32 %v3147_v34, %v3192_v54  ;;  %v3361_v22 = vpop.f32.mrf.mxu1  ;;  %v3699_v34 = vpop.permute.xlu0 %3698 }
 0x557   : > { %v3285_v53 = vpop.f32.mrf.mxu2  ;;  %v3323_v24 = vpop.f32.mrf.mxu3 }
 0x565   : > { %v3236_v21 = vpop.f32.mrf.mxu0 }
 0x566   : > { %v3237_v37 = vadd.f32 %v3236_v21, %v3213_v15  ;;  %v3599_v15 = vld [vmem:[#allocation10 + $0x8] sm:$0xff] }
 0x568   : > { %v3242_v56 = vmax.f32 %v3194_v36, %v3237_v37 }
 0x56a   : > { %4145 = vmatmul.msk.f32.gmra.mxu2 %vm3252_vm2, %v3242_v56  ;;  %4149 = vmatmul.msk.f32.gmra.mxu3 %vm3252_vm2, %v3242_v56 }
 0x56b   : > { %4153 = vmatmul.msk.f32.gmra.mxu1 %vm3252_vm2, %v3242_v56  ;;  %4157 = vmatmul.msk.f32.gmra.mxu0 %vm3252_vm2, %v3242_v56 }
 0x56d   : > { %v3239_v59 = vpop.f32.mrf.mxu0 }
 0x56e   : > { %v3240_v14 = vadd.f32 %v3239_v59, %v3216_v45 }
 0x570   : > { %v3243_v12 = vmax.f32 %v3195_v9, %v3240_v14  ;;  %v3690_v9 = vpop.permute.xlu2 %3689 }
 0x572   : > { %4146 = vmatmul.msk.f32.gmra.mxu2 %vm3252_vm2, %v3243_v12  ;;  %4150 = vmatmul.msk.f32.gmra.mxu3 %vm3252_vm2, %v3243_v12 }
 0x573   : > { %4154 = vmatmul.msk.f32.gmra.mxu1 %vm3252_vm2, %v3243_v12  ;;  %4158 = vmatmul.msk.f32.gmra.mxu0 %vm3252_vm2, %v3243_v12 }
 0x575   : > { %v3396_v1 = vpop.f32.mrf.mxu0 }
 0x57a   : > { %4159 = vmatmul.msk.f32.vlgmr.msra.gmra.mxu2 %vm3252_vm2, %v7092_v61  ;;  %4163 = vmatmul.msk.f32.vlgmr.msra.gmra.mxu3 %vm3252_vm2, %v7092_v61 }
 0x57b   : > { %4167 = vmatmul.msk.f32.vlgmr.msra.gmra.mxu1 %vm3252_vm2, %v7092_v61  ;;  %4171 = vmatmul.msk.f32.vlgmr.msrb.gmra.mxu0 %vm3252_vm2, %v7092_v61 }
 0x57d   : > { %v3399_v7 = vpop.f32.mrf.mxu0 }
 0x582   : > { %4160 = vmatmul.msk.f32.gmra.mxu2 %vm3252_vm2, %v7105_v0  ;;  %4164 = vmatmul.msk.f32.gmra.mxu3 %vm3252_vm2, %v7105_v0 }
 0x583   : > { %4168 = vmatmul.msk.f32.gmra.mxu1 %vm3252_vm2, %v7105_v0  ;;  %4172 = vmatmul.msk.f32.gmra.mxu0 %vm3252_vm2, %v7105_v0 }
 0x58a   : > { %4161 = vmatmul.msk.f32.gmra.mxu2 %vm3252_vm2, %v3242_v56  ;;  %4165 = vmatmul.msk.f32.gmra.mxu3 %vm3252_vm2, %v3242_v56 }
 0x58b   : > { %4169 = vmatmul.msk.f32.gmra.mxu1 %vm3252_vm2, %v3242_v56  ;;  %4173 = vmatmul.msk.f32.gmra.mxu0 %vm3252_vm2, %v3242_v56 }
 0x592   : > { %4162 = vmatmul.msk.f32.gmra.mxu2 %vm3252_vm2, %v3243_v12  ;;  %4166 = vmatmul.msk.f32.gmra.mxu3 %vm3252_vm2, %v3243_v12 }
 0x593   : > { %4170 = vmatmul.msk.f32.gmra.mxu1 %vm3252_vm2, %v3243_v12  ;;  %4174 = vmatmul.msk.f32.gmra.mxu0 %vm3252_vm2, %v3243_v12 }
 0x59a   : > { %4175 = vmatmul.msk.f32.vlgmr.msrb.gmra.mxu2 %vm3252_vm2, %v7092_v61 }
 0x5a2   : > { %4176 = vmatmul.msk.f32.gmra.mxu2 %vm3252_vm2, %v7105_v0 }
 0x5aa   : > { %4177 = vmatmul.msk.f32.gmra.mxu2 %vm3252_vm2, %v3242_v56  ;;  %v3685_v56 = vpop.permute.xlu1 %3684 }
 0x5b2   : > { %4178 = vmatmul.msk.f32.gmra.mxu2 %vm3252_vm2, %v3243_v12  ;;  %v3704_v12 = vpop.permute.xlu1 %3703 }
 0x5e8   : > { %v3364_v16 = vpop.f32.mrf.mxu1  ;;  %v3402_v49 = vpop.f32.mrf.mxu0 }
 0x5ed   : > { %v3288_v10 = vpop.f32.mrf.mxu2  ;;  %v3326_v48 = vpop.f32.mrf.mxu3 }
 0x5f0   : > { %v3367_v61 = vpop.f32.mrf.mxu1  ;;  %v3405_v11 = vpop.f32.mrf.mxu0 }
 0x5f1   : > { %3611 = vmatpush.msrb.mxu3 %v3405_v11 }
 0x5f3   : > { %3612 = vmatpush.msrb.mxu3 %v3402_v49 }
 0x5f5   : > { %3613 = vmatpush.msrb.mxu3 %v3399_v7  ;;  %v3291_v0 = vpop.f32.mrf.mxu2  ;;  %v3329_v52 = vpop.f32.mrf.mxu3 }
 0x5f7   : > { %3614 = vmatpush.msrb.mxu3 %v3396_v1 }
 0x5f8   : > { %v3548_v8 = vpop.f32.mrf.mxu0  ;;  %v3510_v26 = vpop.f32.mrf.mxu1 }
 0x5f9   : > { %3615 = vmatpush.msrb.mxu3 %v3367_v61 }
 0x5fb   : > { %3616 = vmatpush.msrb.mxu3 %v3364_v16 }
 0x5fd   : > { %3617 = vmatpush.msrb.mxu3 %v3361_v22  ;;  %v3434_v4 = vpop.f32.mrf.mxu2  ;;  %v3472_v32 = vpop.f32.mrf.mxu3 }
 0x5ff   : > { %3618 = vmatpush.msrb.mxu3 %v3358_v17 }
 0x600   : > { %v3551_v6 = vpop.f32.mrf.mxu0  ;;  %v3513_v42 = vpop.f32.mrf.mxu1 }
 0x601   : > { %3619 = vmatpush.msrb.mxu3 %v3329_v52 }
 0x603   : > { %3620 = vmatpush.msrb.mxu3 %v3326_v48 }
 0x605   : > { %3621 = vmatpush.msrb.mxu3 %v3323_v24  ;;  %v3437_v29 = vpop.f32.mrf.mxu2  ;;  %v3475_v3 = vpop.f32.mrf.mxu3 }
 0x607   : > { %3622 = vmatpush.msrb.mxu3 %v3320_v19 }
 0x608   : > { %v3554_v28 = vpop.f32.mrf.mxu0  ;;  %v3516_v46 = vpop.f32.mrf.mxu1 }
 0x609   : > { %3623 = vmatpush.msrb.mxu3 %v3291_v0 }
 0x60b   : > { %3624 = vmatpush.msrb.mxu3 %v3288_v10 }
 0x60d   : > { %3625 = vmatpush.msrb.mxu3 %v3285_v53  ;;  %v3440_v44 = vpop.f32.mrf.mxu2  ;;  %v3478_v51 = vpop.f32.mrf.mxu3 }
 0x60f   : > { %3626 = vmatpush.msrb.mxu3 %v3282_v38 }
 0x610   : > { %v3557_v33 = vpop.f32.mrf.mxu0  ;;  %3627 = vmatmul.f32.vlgmr.msrb.gmra.mxu3 %v3598_v55  ;;  %v3519_v50 = vpop.f32.mrf.mxu1 }
 0x611   : > { %3634 = vmatpush.msrb.mxu1 %v3557_v33 }
 0x613   : > { %3635 = vmatpush.msrb.mxu1 %v3554_v28 }
 0x615   : > { %3636 = vmatpush.msrb.mxu1 %v3551_v6  ;;  %v3443_v62 = vpop.f32.mrf.mxu2  ;;  %v3481_v57 = vpop.f32.mrf.mxu3 }
 0x617   : > { %3637 = vmatpush.msrb.mxu1 %v3548_v8 }
 0x618   : > { %3630 = vmatmul.f32.gmra.mxu3 %v3601_v39 }
 0x619   : > { %3638 = vmatpush.msrb.mxu1 %v3519_v50 }
 0x61b   : > { %3639 = vmatpush.msrb.mxu1 %v3516_v46 }
 0x61d   : > { %3640 = vmatpush.msrb.mxu1 %v3513_v42  ;;  %v3586_v23 = vpop.f32.mrf.mxu2 }
 0x61f   : > { %3641 = vmatpush.msrb.mxu1 %v3510_v26 }
 0x621   : > { %3642 = vmatpush.msrb.mxu1 %v3481_v57 }
 0x623   : > { %3643 = vmatpush.msrb.mxu1 %v3478_v51 }
 0x625   : > { %3644 = vmatpush.msrb.mxu1 %v3475_v3  ;;  %v3589_v60 = vpop.f32.mrf.mxu2 }
 0x627   : > { %3645 = vmatpush.msrb.mxu1 %v3472_v32 }
 0x629   : > { %3646 = vmatpush.msrb.mxu1 %v3443_v62 }
 0x62b   : > { %3647 = vmatpush.msrb.mxu1 %v3440_v44 }
 0x62d   : > { %3648 = vmatpush.msrb.mxu1 %v3437_v29  ;;  %v3592_v5 = vpop.f32.mrf.mxu2 }
 0x62f   : > { %3649 = vmatpush.msrb.mxu1 %v3434_v4 }
 0x630   : > { %3650 = vmatmul.f32.vlgmr.msrb.gmra.mxu1 %v3599_v15 }
 0x635   : > { %v3595_v25 = vpop.f32.mrf.mxu2 }
 0x636   : > { %3669 = vmatpush.msra.mxu3 %v3595_v25 }
 0x638   : > { %3670 = vmatpush.msra.mxu3 %v3592_v5  ;;  %3653 = vmatmul.f32.gmra.mxu1 %v3602_v27 }
 0x63a   : > { %3671 = vmatpush.msra.mxu3 %v3589_v60 }
 0x63c   : > { %3672 = vmatpush.msra.mxu3 %v3586_v23 }
 0x63d   : > { %4179 = vmatmul.msk.f32.vlgmr.msra.gmra.mxu3 %vm3604_vm3, %v3600_v30 }
 0x645   : > { %4180 = vmatmul.msk.f32.gmra.mxu3 %vm3604_vm3, %v3603_v18 }
 0x693   : > { %v3628_v21 = vpop.f32.mrf.mxu3 }
 0x69b   : > { %v3631_v31 = vpop.f32.mrf.mxu3 }
 0x6ad   : > { %v3651_v47 = vpop.f32.mrf.mxu1 }
 0x6ae   : > { %v3652_v36 = vadd.f32 %v3651_v47, %v3628_v21 }
 0x6b5   : > { %v3654_v40 = vpop.f32.mrf.mxu1 }
 0x6b6   : > { %v3655_v54 = vadd.f32 %v3654_v40, %v3631_v31 }
 0x6c0   : > { %v3674_v37 = vpop.f32.mrf.mxu3 }
 0x6c1   : > { %v3675_v63 = vadd.f32 %v3674_v37, %v3652_v36 }
 0x6c3   : > { %v3692_v41 = vmul.f32 %v3685_v56, %v3675_v63 }
 0x6c5   : > { %v3706_v58 = vadd.f32 %v3699_v34, %v3692_v41 }
 0x6c7   : > { %v3708_v43 = vmax.f32 %v3706_v58, 0.0 }
 0x6c8   : > { %v3677_v45 = vpop.f32.mrf.mxu3 }
 0x6c9   : > { %3710 = vst.msk [vmem:[%s636_s13] sm:$0xff] %vm3252_vm2, %v3708_v43  ;;  %v3678_v59 = vadd.f32 %v3677_v45, %v3655_v54 }
 0x6cb   : > { %v3693_v14 = vmul.f32 %v3690_v9, %v3678_v59 }
 0x6cd   : > { %v3707_v35 = vadd.f32 %v3704_v12, %v3693_v14 }
 0x6cf   : > { %v3709_v20 = vmax.f32 %v3707_v35, 0.0 }
 0x6d1   : > { %3711 = vst.msk [vmem:[%s636_s13 + $0x8] sm:$0xff] %vm3252_vm2, %v3709_v20 }
 0x6d2   : > { %4653 = shalt.err (!%p4650_p9)
}
 0x6d3   : > { %s4719_s14 = smov 128   ;;  %s4720_s0 = smov 8  }
 0x6d4   : > { %4214 = dma.vmem_to_hbm [thread:$0]  (%p4912_p4), %s3726_s5, 256, %s3728_s12, %s3713_s28, %s4719_s14, %s4719_s14, %s4720_s0  }
 0x6d5 PF: > { %s3742_s7 = sand.u32 1, %s4692_s21   ;;  %p7641_p10 = scmp.ge.s32.totalorder %s4704_s24, 2 }
 0x6d6   : > { %s3743_s13 = scalar_lea.sflag [#allocation4], %s3742_s7 }
 0x6d7   : > { %p4240_p13 = pnand %p7641_p10, %p4916_p6 }
 0x6d9   : > { %p4241_p11 = pneg %p4240_p13 }
 0x6db   : > { %4687 = dma.done.wait (%p4241_p11), %s3743_s13, 256  }
 0x6dc   : > { %4689 = vsyncadd (%p4241_p11), %s3743_s13, 4294967040  ;;  %p32_p0 = scmp.ge.s32.totalorder %s4886_s26, 4   ;;  %s7642_s21 = smov %s4696_s22 }
 0x6dd   : > { %s7643_s22 = smov %s4700_s23  ;;  %s7644_s23 = smov %s4897_s16 }
 0x6de   : > { %s7645_s24 = smov %s4886_s26  ;;  %34 = sbr.rel (!%p32_p0) target bundleno = 21 (0x15), region = 177 }
 0x6e3   :  { %3749 = vsyncpa [#allocation3], 1 }
 0x6e4   :  { %3751 = vsyncpa [#allocation3 + $0x1], 1 }
 0x6e5   :  { %3752 = vsyncpa [#allocation6], 1 }
 0x6e6   :  { %3753 = vsyncpa [#allocation9], 1 }
 0x6e7   :  { %3754 = vsyncpa [#allocation12], 1 }
 0x6e8   :  { %3755 = vsyncpa [#allocation4], 1 }
 0x6e9   :  { %3757 = vsyncpa [#allocation4 + $0x1], 1 }

</bundles_post_ra>
